<compile_context>
chip_gen: v7x
topology: tpu7x:2x2x1
jax: 0.10.0
libtpu: 0.0.40
codegen_flags: <defaults>
</compile_context>

<pallas_src>
import functools

import numpy as np
import jax
import jax.numpy as jnp
from jax.experimental import pallas as pl
from jax.experimental.pallas import tpu as pltpu

BN_EPS = 1e-5


# --------------------------------------------------------------------------
# Single fused kernel, lane-dense (rows, W*C) layout throughout.
# --------------------------------------------------------------------------
def _up_fused_kernel(x1_ref, x2_ref,
                     wup_ref, gup_ref, beup_ref,
                     wb1_ref, g1_ref, be1_ref,
                     wb2_ref, g2_ref, be2_ref,
                     o_ref,
                     cat_ref, mid_ref,
                     *, N, H2, W2, Cup, Cmid, Cout):
    # x1_ref : (N*H1, W1*Cin)               lane-dense input rows
    # x2_ref : (N, H2, W2*Cpass)            lane-dense skip rows
    # wup_ref: (2, W1*Cin, W2*Cup)          banded ConvT weight, one band per row parity
    # wb1_ref: (3, W2*(Cup+Cpass), W2*Cmid) banded conv1 weight, one band per kh
    # wb2_ref: (3, W2*Cmid, W2*Cout)        banded conv2 weight, one band per kh
    # g*/be* : (1, W2*C)                    BN gamma/beta, pre-tiled over W
    # o_ref  : (N*H2, W2*Cout)              lane-dense output (128 lanes -> unmasked stores)
    # cat_ref: (N, H2+2, W2*(Cup+Cpass))    H-padded concat(y, x2) scratch
    # mid_ref: (N, H2+2, W2*Cmid)           H-padded mid activation scratch
    M2 = N * H2 * W2
    inv_m2 = 1.0 / M2
    LY = W2 * Cup

    def fold_w(v, C):            # (1, W2*C) -> (1, C): per-channel sum over W
        out = v[:, 0:C]
        for w in range(1, W2):
            out = out + v[:, w * C:(w + 1) * C]
        return out

    def tile_w(v):               # (1, C) -> (1, W2*C): repeat along the lane dim
        return jnp.concatenate([v] * W2, axis=-1)

    # ---- Stage 1: ConvTranspose2d(2, s=2) = 2 lane-dense dots (one per parity) + BN
    xs = x1_ref[...]
    ye = jnp.dot(xs, wup_ref[0], preferred_element_type=jnp.float32)   # even output rows
    yo = jnp.dot(xs, wup_ref[1], preferred_element_type=jnp.float32)   # odd output rows
    # (ConvT bias omitted: cancels exactly in the train-mode BN mean subtraction.)
    mean_t = tile_w(fold_w(ye.sum(axis=0, keepdims=True)
                           + yo.sum(axis=0, keepdims=True), Cup) * inv_m2)
    ye = ye - mean_t
    yo = yo - mean_t
    var_c = fold_w((ye * ye).sum(axis=0, keepdims=True)
                   + (yo * yo).sum(axis=0, keepdims=True), Cup) * inv_m2
    scale_t = gup_ref[...] * tile_w(jax.lax.rsqrt(var_c + BN_EPS))
    ye = ye * scale_t + beup_ref[...]
    yo = yo * scale_t + beup_ref[...]
    # Stride-2 row interleave: row 2*(n*H1+i)+p == n*H2 + (2i+p); lane dim untouched.
    y = jnp.concatenate([ye[:, None, :], yo[:, None, :]], axis=1).reshape(N * H2, LY)

    # ---- Stage 2: H-padded concat(y, x2) scratch; zero ONLY the 1-row halo --------
    lc = cat_ref.shape[-1]
    cat_ref[:, 0:1, :] = jnp.zeros((N, 1, lc), jnp.float32)
    cat_ref[:, H2 + 1:H2 + 2, :] = jnp.zeros((N, 1, lc), jnp.float32)
    cat_ref[:, 1:H2 + 1, 0:LY] = y.reshape(N, H2, LY)
    cat_ref[:, 1:H2 + 1, LY:] = x2_ref[...]

    # ---- Stage 3: conv1 3x3 = 3 accumulated banded dots (no im2col patch) + BN + ReLU
    acc = jnp.dot(cat_ref[:, 0:H2, :].reshape(N * H2, lc), wb1_ref[0],
                  preferred_element_type=jnp.float32)
    for kh in (1, 2):
        acc = acc + jnp.dot(cat_ref[:, kh:kh + H2, :].reshape(N * H2, lc), wb1_ref[kh],
                            preferred_element_type=jnp.float32)
    mean1_t = tile_w(fold_w(acc.sum(axis=0, keepdims=True), Cmid) * inv_m2)
    acc = acc - mean1_t
    var1_c = fold_w((acc * acc).sum(axis=0, keepdims=True), Cmid) * inv_m2
    h = jnp.maximum(acc * (g1_ref[...] * tile_w(jax.lax.rsqrt(var1_c + BN_EPS)))
                    + be1_ref[...], 0.0)

    lm = mid_ref.shape[-1]
    mid_ref[:, 0:1, :] = jnp.zeros((N, 1, lm), jnp.float32)
    mid_ref[:, H2 + 1:H2 + 2, :] = jnp.zeros((N, 1, lm), jnp.float32)
    mid_ref[:, 1:H2 + 1, :] = h.reshape(N, H2, lm)

    # ---- Stage 4: conv2 3x3 = 3 accumulated banded dots + BN + ReLU ---------------
    acc2 = jnp.dot(mid_ref[:, 0:H2, :].reshape(N * H2, lm), wb2_ref[0],
                   preferred_element_type=jnp.float32)
    for kh in (1, 2):
        acc2 = acc2 + jnp.dot(mid_ref[:, kh:kh + H2, :].reshape(N * H2, lm), wb2_ref[kh],
                              preferred_element_type=jnp.float32)
    mean2_t = tile_w(fold_w(acc2.sum(axis=0, keepdims=True), Cout) * inv_m2)
    acc2 = acc2 - mean2_t
    var2_c = fold_w((acc2 * acc2).sum(axis=0, keepdims=True), Cout) * inv_m2
    o_ref[...] = jnp.maximum(acc2 * (g2_ref[...] * tile_w(jax.lax.rsqrt(var2_c + BN_EPS)))
                             + be2_ref[...], 0.0)


# --------------------------------------------------------------------------
# One-time host-side packing (hoisted out of the jitted per-step path)
# --------------------------------------------------------------------------
def _band_3x3(w_hwio, W):
    """(3,3,Ci,Co) conv weight -> (3, W*Ci, W*Co) lane-dense banded weights.
    Band kh maps an input row slab (lane layout w_in*Ci+ci) to an output row
    (lane layout w_out*Co+co); SAME padding along W becomes zero blocks."""
    w = np.asarray(w_hwio, np.float32)
    _, _, Ci, Co = w.shape
    B = np.zeros((3, W * Ci, W * Co), np.float32)
    for kh in range(3):
        for wo in range(W):
            for kw in range(3):
                wi = wo + kw - 1
                if 0 <= wi < W:
                    B[kh, wi * Ci:(wi + 1) * Ci, wo * Co:(wo + 1) * Co] = w[kh, kw]
    return B


def _band_convT_2x2(w_hwio, W_in):
    """(2,2,Cin,Cup) ConvTranspose(k=2,s=2) weight -> (2, W_in*Cin, 2*W_in*Cup).
    Band kh produces every output row of parity kh in lane layout w_out*Cup+co."""
    w = np.asarray(w_hwio, np.float32)
    _, _, Cin, Cup = w.shape
    B = np.zeros((2, W_in * Cin, 2 * W_in * Cup), np.float32)
    for kh in range(2):
        for j in range(W_in):
            for kw in range(2):
                wo = 2 * j + kw
                B[kh, j * Cin:(j + 1) * Cin, wo * Cup:(wo + 1) * Cup] = w[kh, kw]
    return B


def pack_up_params(p, W_in):
    """Pack weights into banded lane-dense matrices and pre-tile BN gamma/beta.
    Call ONCE outside the step function.  Conv biases b_up/b1/b2 are dropped on
    purpose: each feeds a train-mode BatchNorm and cancels in the mean subtraction."""
    W_out = 2 * W_in
    Cup = p["w_up"].shape[-1]
    Cmid = p["w1"].shape[-1]
    Cout = p["w2"].shape[-1]

    def tile_vec(v, C):
        return jnp.asarray(np.tile(np.asarray(v, np.float32).reshape(1, C), (1, W_out)))

    wb1 = np.concatenate([_band_3x3(p["w1"][:, :, :Cup, :], W_out),    # y part of cat
                          _band_3x3(p["w1"][:, :, Cup:, :], W_out)],   # x2 part of cat
                         axis=1)
    return {
        "wup_band": jnp.asarray(_band_convT_2x2(p["w_up"], W_in)),
        "wb1_band": jnp.asarray(wb1),
        "wb2_band": jnp.asarray(_band_3x3(p["w2"], W_out)),
        "g_up_t": tile_vec(p["g_up"], Cup), "be_up_t": tile_vec(p["be_up"], Cup),
        "g1_t": tile_vec(p["g1"], Cmid), "be1_t": tile_vec(p["be1"], Cmid),
        "g2_t": tile_vec(p["g2"], Cout), "be2_t": tile_vec(p["be2"], Cout),
    }


# --------------------------------------------------------------------------
# Wrapper (NCHW in/out to match PyTorch; kernel works on lane-dense slabs)
# --------------------------------------------------------------------------
def up_forward(x1_nchw, x2_nchw, pk):
    """Pallas implementation of Up.forward(x1, x2) (NCHW in, NCHW out)."""
    N, Cin, H1, W1 = x1_nchw.shape
    _, Cpass, H2, W2 = x2_nchw.shape
    Cup = pk["g_up_t"].shape[-1] // W2
    Cmid = pk["g1_t"].shape[-1] // W2
    Cout = pk["g2_t"].shape[-1] // W2
    LY, LX, LM, LO = W2 * Cup, W2 * Cpass, W2 * Cmid, W2 * Cout

    # NCHW -> lane-dense (rows, W*C) slabs.  Pure layout plumbing kept only for the
    # PyTorch interface; an NHWC / lane-dense surrounding model would drop it.
    x1 = jnp.transpose(x1_nchw, (0, 2, 3, 1)).reshape(N * H1, W1 * Cin).astype(jnp.float32)
    x2 = jnp.transpose(x2_nchw, (0, 2, 3, 1)).reshape(N, H2, LX).astype(jnp.float32)

    kernel = functools.partial(_up_fused_kernel, N=N, H2=H2, W2=W2,
                               Cup=Cup, Cmid=Cmid, Cout=Cout)

    flops = (2 * 2 * (N * H1) * (W1 * Cin) * LY          # convT: 2 banded dots
             + 2 * 3 * (N * H2) * (LY + LX) * LM         # conv1: 3 banded dots
             + 2 * 3 * (N * H2) * LM * LO)               # conv2: 3 banded dots
    buf_bytes = 4 * (x1.size + x2.size + N * H2 * LO
                     + sum(int(pk[k].size) for k in
                           ("wup_band", "wb1_band", "wb2_band",
                            "g_up_t", "be_up_t", "g1_t", "be1_t", "g2_t", "be2_t"))
                     + N * (H2 + 2) * (LY + LX) + N * (H2 + 2) * LM)
    # Explicit VMEM budget with headroom; stays far below v7x's 64 MiB physical VMEM.
    vmem_limit = int(min(48 * 2 ** 20, max(16 * 2 ** 20, 4 * buf_bytes)))

    vmem = pl.BlockSpec(memory_space=pltpu.MemorySpace.VMEM)
    out2d = pl.pallas_call(
        kernel,
        out_shape=jax.ShapeDtypeStruct((N * H2, LO), jnp.float32),
        in_specs=[vmem] * 11,
        out_specs=vmem,
        scratch_shapes=[
            pltpu.VMEM((N, H2 + 2, LY + LX), jnp.float32),   # H-padded concat(y, x2)
            pltpu.VMEM((N, H2 + 2, LM), jnp.float32),        # H-padded mid activation
        ],
        compiler_params=pltpu.CompilerParams(vmem_limit_bytes=vmem_limit),
        cost_estimate=pl.CostEstimate(flops=flops,
                                      transcendentals=Cup + Cmid + Cout,
                                      bytes_accessed=buf_bytes),
    )(x1, x2,
      pk["wup_band"], pk["g_up_t"], pk["be_up_t"],
      pk["wb1_band"], pk["g1_t"], pk["be1_t"],
      pk["wb2_band"], pk["g2_t"], pk["be2_t"])
    return jnp.transpose(out2d.reshape(N, H2, W2, Cout), (0, 3, 1, 2))


# --------------------------------------------------------------------------
# Pure-JAX reference (for numerical verification)
# --------------------------------------------------------------------------
def _ref_bn(x, g, b):
    mean = x.mean(axis=(0, 1, 2), keepdims=True)
    var = ((x - mean) ** 2).mean(axis=(0, 1, 2), keepdims=True)
    return (x - mean) * jax.lax.rsqrt(var + BN_EPS) * g + b


def _ref_conv3x3(x, w, b):
    return jax.lax.conv_general_dilated(
        x, w, (1, 1), "SAME",
        dimension_numbers=("NHWC", "HWIO", "NHWC")) + b


def reference_up(x1_nchw, x2_nchw, p):
    x1 = jnp.transpose(x1_nchw, (0, 2, 3, 1)).astype(jnp.float32)
    x2 = jnp.transpose(x2_nchw, (0, 2, 3, 1)).astype(jnp.float32)
    N, H, W, _ = x1.shape
    Cup = p["w_up"].shape[-1]
    y = jnp.zeros((N, 2 * H, 2 * W, Cup), jnp.float32)
    for kh in range(2):
        for kw in range(2):
            yk = jnp.einsum("nhwc,co->nhwo", x1, p["w_up"][kh, kw]) + p["b_up"]
            y = y.at[:, kh::2, kw::2, :].set(yk)
    y = _ref_bn(y, p["g_up"], p["be_up"])
    x = jnp.concatenate([y, x2], axis=-1)
    x = jnp.maximum(_ref_bn(_ref_conv3x3(x, p["w1"], p["b1"]), p["g1"], p["be1"]), 0.0)
    x = jnp.maximum(_ref_bn(_ref_conv3x3(x, p["w2"], p["b2"]), p["g2"], p["be2"]), 0.0)
    return jnp.transpose(x, (0, 3, 1, 2))


# --------------------------------------------------------------------------
if __name__ == "__main__":
    key = jax.random.PRNGKey(0)
    N = 2
    C_in, C_up, C_pass, C_mid, C_out = 8, 8, 8, 16, 8
    H1 = W1 = 8      # x1 spatial -> upsampled to 16x16
    H2 = W2 = 16     # x2 spatial

    keys = jax.random.split(key, 14)

    def nrm(k, shape, scale=0.1):
        return scale * jax.random.normal(k, shape, dtype=jnp.float32)

    params = {
        "w_up": nrm(keys[0], (2, 2, C_in, C_up)),              # ConvTranspose2d weight (HWIO)
        "b_up": nrm(keys[1], (1, C_up)),
        "g_up": 1.0 + nrm(keys[2], (1, C_up)),                 # BN gamma
        "be_up": nrm(keys[3], (1, C_up)),                      # BN beta
        "w1": nrm(keys[4], (3, 3, C_up + C_pass, C_mid)),      # mix conv1 (HWIO)
        "b1": nrm(keys[5], (1, C_mid)),
        "g1": 1.0 + nrm(keys[6], (1, C_mid)),
        "be1": nrm(keys[7], (1, C_mid)),
        "w2": nrm(keys[8], (3, 3, C_mid, C_out)),              # mix conv2 (HWIO)
        "b2": nrm(keys[9], (1, C_out)),
        "g2": 1.0 + nrm(keys[10], (1, C_out)),
        "be2": nrm(keys[11], (1, C_out)),
    }

    x1 = jax.random.normal(keys[12], (N, C_in, H1, W1), dtype=jnp.float32)    # NCHW
    x2 = jax.random.normal(keys[13], (N, C_pass, H2, W2), dtype=jnp.float32)  # NCHW

    packed = pack_up_params(params, W_in=W1)   # one-time host-side packing (outside jit)

    out = jax.jit(up_forward)(x1, x2, packed)
    out = jax.block_until_ready(out)
    assert out.shape == (N, C_out, H2, W2), out.shape

    ref = jax.block_until_ready(reference_up(x1, x2, params))
    np.testing.assert_allclose(np.asarray(out), np.asarray(ref), atol=5e-3, rtol=5e-3)

    print("KERNEL_OK")
</pallas_src>

<mosaic_0001>
module attributes {stable_mosaic.version = 11 : i64} {
  func.func @_up_fused_kernel(%arg0: memref<16x64xf32, #tpu.memory_space<vmem>>, %arg1: memref<2x16x128xf32, #tpu.memory_space<vmem>>, %arg2: memref<2x64x128xf32, #tpu.memory_space<vmem>>, %arg3: memref<1x128xf32, #tpu.memory_space<vmem>>, %arg4: memref<1x128xf32, #tpu.memory_space<vmem>>, %arg5: memref<3x256x256xf32, #tpu.memory_space<vmem>>, %arg6: memref<1x256xf32, #tpu.memory_space<vmem>>, %arg7: memref<1x256xf32, #tpu.memory_space<vmem>>, %arg8: memref<3x256x128xf32, #tpu.memory_space<vmem>>, %arg9: memref<1x128xf32, #tpu.memory_space<vmem>>, %arg10: memref<1x128xf32, #tpu.memory_space<vmem>>, %arg11: memref<32x128xf32, #tpu.memory_space<vmem>>, %arg12: memref<2x18x256xf32, #tpu.memory_space<vmem>>, %arg13: memref<2x18x256xf32, #tpu.memory_space<vmem>>) attributes {dimension_semantics = [], scalar_prefetch = 0 : i64, scratch_operands = 2 : i64, tpu.core_type = #tpu.core_type<tc>} {
    %c0 = arith.constant 0 : index
    %c0_0 = arith.constant 0 : index
    %0 = vector.load %arg0[%c0, %c0_0] : memref<16x64xf32, #tpu.memory_space<vmem>>, vector<16x64xf32>
    %c0_1 = arith.constant 0 : index
    %c0_2 = arith.constant 0 : index
    %c0_3 = arith.constant 0 : index
    %1 = vector.load %arg2[%c0_1, %c0_2, %c0_3] : memref<2x64x128xf32, #tpu.memory_space<vmem>>, vector<1x64x128xf32>
    %2 = vector.shape_cast %1 : vector<1x64x128xf32> to vector<64x128xf32>
    %cst = arith.constant dense<0.000000e+00> : vector<16x128xf32>
    %3 = tpu.matmul %0, %2, %cst {dimension_numbers = #tpu.dot_dimension_numbers<[1], [0], [0], [1], [0, 0, 1, 1], [], []>} : vector<16x64xf32>, vector<64x128xf32>, vector<16x128xf32> -> vector<16x128xf32>
    %c1 = arith.constant 1 : index
    %c0_4 = arith.constant 0 : index
    %c0_5 = arith.constant 0 : index
    %4 = vector.load %arg2[%c1, %c0_4, %c0_5] : memref<2x64x128xf32, #tpu.memory_space<vmem>>, vector<1x64x128xf32>
    %5 = vector.shape_cast %4 : vector<1x64x128xf32> to vector<64x128xf32>
    %cst_6 = arith.constant dense<0.000000e+00> : vector<16x128xf32>
    %6 = tpu.matmul %0, %5, %cst_6 {dimension_numbers = #tpu.dot_dimension_numbers<[1], [0], [0], [1], [0, 0, 1, 1], [], []>} : vector<16x64xf32>, vector<64x128xf32>, vector<16x128xf32> -> vector<16x128xf32>
    %cst_7 = arith.constant dense<0.000000e+00> : vector<128xf32>
    %7 = vector.multi_reduction <add>, %3, %cst_7 [0] : vector<16x128xf32> to vector<128xf32>
    %8 = vector.shape_cast %7 : vector<128xf32> to vector<1x128xf32>
    %cst_8 = arith.constant dense<0.000000e+00> : vector<128xf32>
    %9 = vector.multi_reduction <add>, %6, %cst_8 [0] : vector<16x128xf32> to vector<128xf32>
    %10 = vector.shape_cast %9 : vector<128xf32> to vector<1x128xf32>
    %11 = arith.addf %8, %10 : vector<1x128xf32>
    %12 = vector.extract_strided_slice %11 {offsets = [0, 0], sizes = [1, 8], strides = [1, 1]} : vector<1x128xf32> to vector<1x8xf32>
    %13 = vector.extract_strided_slice %11 {offsets = [0, 8], sizes = [1, 8], strides = [1, 1]} : vector<1x128xf32> to vector<1x8xf32>
    %14 = arith.addf %12, %13 : vector<1x8xf32>
    %15 = vector.extract_strided_slice %11 {offsets = [0, 16], sizes = [1, 8], strides = [1, 1]} : vector<1x128xf32> to vector<1x8xf32>
    %16 = arith.addf %14, %15 : vector<1x8xf32>
    %17 = vector.extract_strided_slice %11 {offsets = [0, 24], sizes = [1, 8], strides = [1, 1]} : vector<1x128xf32> to vector<1x8xf32>
    %18 = arith.addf %16, %17 : vector<1x8xf32>
    %19 = vector.extract_strided_slice %11 {offsets = [0, 32], sizes = [1, 8], strides = [1, 1]} : vector<1x128xf32> to vector<1x8xf32>
    %20 = arith.addf %18, %19 : vector<1x8xf32>
    %21 = vector.extract_strided_slice %11 {offsets = [0, 40], sizes = [1, 8], strides = [1, 1]} : vector<1x128xf32> to vector<1x8xf32>
    %22 = arith.addf %20, %21 : vector<1x8xf32>
    %23 = vector.extract_strided_slice %11 {offsets = [0, 48], sizes = [1, 8], strides = [1, 1]} : vector<1x128xf32> to vector<1x8xf32>
    %24 = arith.addf %22, %23 : vector<1x8xf32>
    %25 = vector.extract_strided_slice %11 {offsets = [0, 56], sizes = [1, 8], strides = [1, 1]} : vector<1x128xf32> to vector<1x8xf32>
    %26 = arith.addf %24, %25 : vector<1x8xf32>
    %27 = vector.extract_strided_slice %11 {offsets = [0, 64], sizes = [1, 8], strides = [1, 1]} : vector<1x128xf32> to vector<1x8xf32>
    %28 = arith.addf %26, %27 : vector<1x8xf32>
    %29 = vector.extract_strided_slice %11 {offsets = [0, 72], sizes = [1, 8], strides = [1, 1]} : vector<1x128xf32> to vector<1x8xf32>
    %30 = arith.addf %28, %29 : vector<1x8xf32>
    %31 = vector.extract_strided_slice %11 {offsets = [0, 80], sizes = [1, 8], strides = [1, 1]} : vector<1x128xf32> to vector<1x8xf32>
    %32 = arith.addf %30, %31 : vector<1x8xf32>
    %33 = vector.extract_strided_slice %11 {offsets = [0, 88], sizes = [1, 8], strides = [1, 1]} : vector<1x128xf32> to vector<1x8xf32>
    %34 = arith.addf %32, %33 : vector<1x8xf32>
    %35 = vector.extract_strided_slice %11 {offsets = [0, 96], sizes = [1, 8], strides = [1, 1]} : vector<1x128xf32> to vector<1x8xf32>
    %36 = arith.addf %34, %35 : vector<1x8xf32>
    %37 = vector.extract_strided_slice %11 {offsets = [0, 104], sizes = [1, 8], strides = [1, 1]} : vector<1x128xf32> to vector<1x8xf32>
    %38 = arith.addf %36, %37 : vector<1x8xf32>
    %39 = vector.extract_strided_slice %11 {offsets = [0, 112], sizes = [1, 8], strides = [1, 1]} : vector<1x128xf32> to vector<1x8xf32>
    %40 = arith.addf %38, %39 : vector<1x8xf32>
    %41 = vector.extract_strided_slice %11 {offsets = [0, 120], sizes = [1, 8], strides = [1, 1]} : vector<1x128xf32> to vector<1x8xf32>
    %42 = arith.addf %40, %41 : vector<1x8xf32>
    %cst_9 = arith.constant 0.001953125 : f32
    %43 = vector.broadcast %cst_9 : f32 to vector<1x8xf32>
    %44 = arith.mulf %42, %43 : vector<1x8xf32>
    %45 = tpu.concatenate %44, %44, %44, %44, %44, %44, %44, %44, %44, %44, %44, %44, %44, %44, %44, %44 in 1 : vector<1x8xf32>, vector<1x8xf32>, vector<1x8xf32>, vector<1x8xf32>, vector<1x8xf32>, vector<1x8xf32>, vector<1x8xf32>, vector<1x8xf32>, vector<1x8xf32>, vector<1x8xf32>, vector<1x8xf32>, vector<1x8xf32>, vector<1x8xf32>, vector<1x8xf32>, vector<1x8xf32>, vector<1x8xf32> -> vector<1x128xf32>
    %46 = vector.broadcast %45 : vector<1x128xf32> to vector<16x128xf32>
    %47 = arith.subf %3, %46 : vector<16x128xf32>
    %48 = vector.broadcast %45 : vector<1x128xf32> to vector<16x128xf32>
    %49 = arith.subf %6, %48 : vector<16x128xf32>
    %50 = arith.mulf %47, %47 : vector<16x128xf32>
    %cst_10 = arith.constant dense<0.000000e+00> : vector<128xf32>
    %51 = vector.multi_reduction <add>, %50, %cst_10 [0] : vector<16x128xf32> to vector<128xf32>
    %52 = vector.shape_cast %51 : vector<128xf32> to vector<1x128xf32>
    %53 = arith.mulf %49, %49 : vector<16x128xf32>
    %cst_11 = arith.constant dense<0.000000e+00> : vector<128xf32>
    %54 = vector.multi_reduction <add>, %53, %cst_11 [0] : vector<16x128xf32> to vector<128xf32>
    %55 = vector.shape_cast %54 : vector<128xf32> to vector<1x128xf32>
    %56 = arith.addf %52, %55 : vector<1x128xf32>
    %57 = vector.extract_strided_slice %56 {offsets = [0, 0], sizes = [1, 8], strides = [1, 1]} : vector<1x128xf32> to vector<1x8xf32>
    %58 = vector.extract_strided_slice %56 {offsets = [0, 8], sizes = [1, 8], strides = [1, 1]} : vector<1x128xf32> to vector<1x8xf32>
    %59 = arith.addf %57, %58 : vector<1x8xf32>
    %60 = vector.extract_strided_slice %56 {offsets = [0, 16], sizes = [1, 8], strides = [1, 1]} : vector<1x128xf32> to vector<1x8xf32>
    %61 = arith.addf %59, %60 : vector<1x8xf32>
    %62 = vector.extract_strided_slice %56 {offsets = [0, 24], sizes = [1, 8], strides = [1, 1]} : vector<1x128xf32> to vector<1x8xf32>
    %63 = arith.addf %61, %62 : vector<1x8xf32>
    %64 = vector.extract_strided_slice %56 {offsets = [0, 32], sizes = [1, 8], strides = [1, 1]} : vector<1x128xf32> to vector<1x8xf32>
    %65 = arith.addf %63, %64 : vector<1x8xf32>
    %66 = vector.extract_strided_slice %56 {offsets = [0, 40], sizes = [1, 8], strides = [1, 1]} : vector<1x128xf32> to vector<1x8xf32>
    %67 = arith.addf %65, %66 : vector<1x8xf32>
    %68 = vector.extract_strided_slice %56 {offsets = [0, 48], sizes = [1, 8], strides = [1, 1]} : vector<1x128xf32> to vector<1x8xf32>
    %69 = arith.addf %67, %68 : vector<1x8xf32>
    %70 = vector.extract_strided_slice %56 {offsets = [0, 56], sizes = [1, 8], strides = [1, 1]} : vector<1x128xf32> to vector<1x8xf32>
    %71 = arith.addf %69, %70 : vector<1x8xf32>
    %72 = vector.extract_strided_slice %56 {offsets = [0, 64], sizes = [1, 8], strides = [1, 1]} : vector<1x128xf32> to vector<1x8xf32>
    %73 = arith.addf %71, %72 : vector<1x8xf32>
    %74 = vector.extract_strided_slice %56 {offsets = [0, 72], sizes = [1, 8], strides = [1, 1]} : vector<1x128xf32> to vector<1x8xf32>
    %75 = arith.addf %73, %74 : vector<1x8xf32>
    %76 = vector.extract_strided_slice %56 {offsets = [0, 80], sizes = [1, 8], strides = [1, 1]} : vector<1x128xf32> to vector<1x8xf32>
    %77 = arith.addf %75, %76 : vector<1x8xf32>
    %78 = vector.extract_strided_slice %56 {offsets = [0, 88], sizes = [1, 8], strides = [1, 1]} : vector<1x128xf32> to vector<1x8xf32>
    %79 = arith.addf %77, %78 : vector<1x8xf32>
    %80 = vector.extract_strided_slice %56 {offsets = [0, 96], sizes = [1, 8], strides = [1, 1]} : vector<1x128xf32> to vector<1x8xf32>
    %81 = arith.addf %79, %80 : vector<1x8xf32>
    %82 = vector.extract_strided_slice %56 {offsets = [0, 104], sizes = [1, 8], strides = [1, 1]} : vector<1x128xf32> to vector<1x8xf32>
    %83 = arith.addf %81, %82 : vector<1x8xf32>
    %84 = vector.extract_strided_slice %56 {offsets = [0, 112], sizes = [1, 8], strides = [1, 1]} : vector<1x128xf32> to vector<1x8xf32>
    %85 = arith.addf %83, %84 : vector<1x8xf32>
    %86 = vector.extract_strided_slice %56 {offsets = [0, 120], sizes = [1, 8], strides = [1, 1]} : vector<1x128xf32> to vector<1x8xf32>
    %87 = arith.addf %85, %86 : vector<1x8xf32>
    %cst_12 = arith.constant 0.001953125 : f32
    %88 = vector.broadcast %cst_12 : f32 to vector<1x8xf32>
    %89 = arith.mulf %87, %88 : vector<1x8xf32>
    %c0_13 = arith.constant 0 : index
    %c0_14 = arith.constant 0 : index
    %90 = vector.load %arg3[%c0_13, %c0_14] : memref<1x128xf32, #tpu.memory_space<vmem>>, vector<1x128xf32>
    %cst_15 = arith.constant 9.99999974E-6 : f32
    %91 = vector.broadcast %cst_15 : f32 to vector<1x8xf32>
    %92 = arith.addf %89, %91 : vector<1x8xf32>
    %93 = math.rsqrt %92 : vector<1x8xf32>
    %94 = tpu.concatenate %93, %93, %93, %93, %93, %93, %93, %93, %93, %93, %93, %93, %93, %93, %93, %93 in 1 : vector<1x8xf32>, vector<1x8xf32>, vector<1x8xf32>, vector<1x8xf32>, vector<1x8xf32>, vector<1x8xf32>, vector<1x8xf32>, vector<1x8xf32>, vector<1x8xf32>, vector<1x8xf32>, vector<1x8xf32>, vector<1x8xf32>, vector<1x8xf32>, vector<1x8xf32>, vector<1x8xf32>, vector<1x8xf32> -> vector<1x128xf32>
    %95 = arith.mulf %90, %94 : vector<1x128xf32>
    %96 = vector.broadcast %95 : vector<1x128xf32> to vector<16x128xf32>
    %97 = arith.mulf %47, %96 : vector<16x128xf32>
    %c0_16 = arith.constant 0 : index
    %c0_17 = arith.constant 0 : index
    %98 = vector.load %arg4[%c0_16, %c0_17] : memref<1x128xf32, #tpu.memory_space<vmem>>, vector<1x128xf32>
    %99 = vector.broadcast %98 : vector<1x128xf32> to vector<16x128xf32>
    %100 = arith.addf %97, %99 : vector<16x128xf32>
    %101 = vector.broadcast %95 : vector<1x128xf32> to vector<16x128xf32>
    %102 = arith.mulf %49, %101 : vector<16x128xf32>
    %c0_18 = arith.constant 0 : index
    %c0_19 = arith.constant 0 : index
    %103 = vector.load %arg4[%c0_18, %c0_19] : memref<1x128xf32, #tpu.memory_space<vmem>>, vector<1x128xf32>
    %104 = vector.broadcast %103 : vector<1x128xf32> to vector<16x128xf32>
    %105 = arith.addf %102, %104 : vector<16x128xf32>
    %106 = vector.shape_cast %100 : vector<16x128xf32> to vector<16x1x128xf32>
    %107 = vector.shape_cast %105 : vector<16x128xf32> to vector<16x1x128xf32>
    %108 = tpu.concatenate %106, %107 in 1 : vector<16x1x128xf32>, vector<16x1x128xf32> -> vector<16x2x128xf32>
    %109 = vector.shape_cast %108 : vector<16x2x128xf32> to vector<32x128xf32>
    %cst_20 = arith.constant 0.000000e+00 : f32
    %110 = vector.broadcast %cst_20 : f32 to vector<2x1x256xf32>
    %c0_21 = arith.constant 0 : index
    %c0_22 = arith.constant 0 : index
    %c0_23 = arith.constant 0 : index
    %111 = vector.load %arg12[%c0_21, %c0_22, %c0_23] : memref<2x18x256xf32, #tpu.memory_space<vmem>>, vector<2x1x256xf32>
    tpu.vector_store %arg12[%c0_21, %c0_22, %c0_23], %110 {strides = array<i32>} : memref<2x18x256xf32, #tpu.memory_space<vmem>>, vector<2x1x256xf32>,
    %cst_24 = arith.constant 0.000000e+00 : f32
    %112 = vector.broadcast %cst_24 : f32 to vector<2x1x256xf32>
    %c0_25 = arith.constant 0 : index
    %c17 = arith.constant 17 : index
    %c0_26 = arith.constant 0 : index
    %113 = vector.load %arg12[%c0_25, %c17, %c0_26] : memref<2x18x256xf32, #tpu.memory_space<vmem>>, vector<2x1x256xf32>
    tpu.vector_store %arg12[%c0_25, %c17, %c0_26], %112 {strides = array<i32>} : memref<2x18x256xf32, #tpu.memory_space<vmem>>, vector<2x1x256xf32>,
    %114 = vector.shape_cast %109 : vector<32x128xf32> to vector<2x16x128xf32>
    %c0_27 = arith.constant 0 : index
    %c1_28 = arith.constant 1 : index
    %c0_29 = arith.constant 0 : index
    %115 = vector.load %arg12[%c0_27, %c1_28, %c0_29] : memref<2x18x256xf32, #tpu.memory_space<vmem>>, vector<2x16x128xf32>
    tpu.vector_store %arg12[%c0_27, %c1_28, %c0_29], %114 {strides = array<i32>} : memref<2x18x256xf32, #tpu.memory_space<vmem>>, vector<2x16x128xf32>,
    %c0_30 = arith.constant 0 : index
    %c0_31 = arith.constant 0 : index
    %c0_32 = arith.constant 0 : index
    %116 = vector.load %arg1[%c0_30, %c0_31, %c0_32] : memref<2x16x128xf32, #tpu.memory_space<vmem>>, vector<2x16x128xf32>
    %c0_33 = arith.constant 0 : index
    %c1_34 = arith.constant 1 : index
    %c128 = arith.constant 128 : index
    %117 = vector.load %arg12[%c0_33, %c1_34, %c128] : memref<2x18x256xf32, #tpu.memory_space<vmem>>, vector<2x16x128xf32>
    tpu.vector_store %arg12[%c0_33, %c1_34, %c128], %116 {strides = array<i32>} : memref<2x18x256xf32, #tpu.memory_space<vmem>>, vector<2x16x128xf32>,
    %c0_35 = arith.constant 0 : index
    %c0_36 = arith.constant 0 : index
    %c0_37 = arith.constant 0 : index
    %118 = vector.load %arg12[%c0_35, %c0_36, %c0_37] : memref<2x18x256xf32, #tpu.memory_space<vmem>>, vector<2x16x256xf32>
    %119 = vector.shape_cast %118 : vector<2x16x256xf32> to vector<32x256xf32>
    %c0_38 = arith.constant 0 : index
    %c0_39 = arith.constant 0 : index
    %c0_40 = arith.constant 0 : index
    %120 = vector.load %arg5[%c0_38, %c0_39, %c0_40] : memref<3x256x256xf32, #tpu.memory_space<vmem>>, vector<1x256x256xf32>
    %121 = vector.shape_cast %120 : vector<1x256x256xf32> to vector<256x256xf32>
    %cst_41 = arith.constant dense<0.000000e+00> : vector<32x256xf32>
    %122 = tpu.matmul %119, %121, %cst_41 {dimension_numbers = #tpu.dot_dimension_numbers<[1], [0], [0], [1], [0, 0, 1, 1], [], []>} : vector<32x256xf32>, vector<256x256xf32>, vector<32x256xf32> -> vector<32x256xf32>
    %c0_42 = arith.constant 0 : index
    %c1_43 = arith.constant 1 : index
    %c0_44 = arith.constant 0 : index
    %123 = vector.load %arg12[%c0_42, %c1_43, %c0_44] : memref<2x18x256xf32, #tpu.memory_space<vmem>>, vector<2x16x256xf32>
    %124 = vector.shape_cast %123 : vector<2x16x256xf32> to vector<32x256xf32>
    %c1_45 = arith.constant 1 : index
    %c0_46 = arith.constant 0 : index
    %c0_47 = arith.constant 0 : index
    %125 = vector.load %arg5[%c1_45, %c0_46, %c0_47] : memref<3x256x256xf32, #tpu.memory_space<vmem>>, vector<1x256x256xf32>
    %126 = vector.shape_cast %125 : vector<1x256x256xf32> to vector<256x256xf32>
    %cst_48 = arith.constant dense<0.000000e+00> : vector<32x256xf32>
    %127 = tpu.matmul %124, %126, %cst_48 {dimension_numbers = #tpu.dot_dimension_numbers<[1], [0], [0], [1], [0, 0, 1, 1], [], []>} : vector<32x256xf32>, vector<256x256xf32>, vector<32x256xf32> -> vector<32x256xf32>
    %128 = arith.addf %122, %127 : vector<32x256xf32>
    %c0_49 = arith.constant 0 : index
    %c2 = arith.constant 2 : index
    %c0_50 = arith.constant 0 : index
    %129 = vector.load %arg12[%c0_49, %c2, %c0_50] : memref<2x18x256xf32, #tpu.memory_space<vmem>>, vector<2x16x256xf32>
    %130 = vector.shape_cast %129 : vector<2x16x256xf32> to vector<32x256xf32>
    %c2_51 = arith.constant 2 : index
    %c0_52 = arith.constant 0 : index
    %c0_53 = arith.constant 0 : index
    %131 = vector.load %arg5[%c2_51, %c0_52, %c0_53] : memref<3x256x256xf32, #tpu.memory_space<vmem>>, vector<1x256x256xf32>
    %132 = vector.shape_cast %131 : vector<1x256x256xf32> to vector<256x256xf32>
    %cst_54 = arith.constant dense<0.000000e+00> : vector<32x256xf32>
    %133 = tpu.matmul %130, %132, %cst_54 {dimension_numbers = #tpu.dot_dimension_numbers<[1], [0], [0], [1], [0, 0, 1, 1], [], []>} : vector<32x256xf32>, vector<256x256xf32>, vector<32x256xf32> -> vector<32x256xf32>
    %134 = arith.addf %128, %133 : vector<32x256xf32>
    %cst_55 = arith.constant dense<0.000000e+00> : vector<256xf32>
    %135 = vector.multi_reduction <add>, %134, %cst_55 [0] : vector<32x256xf32> to vector<256xf32>
    %136 = vector.shape_cast %135 : vector<256xf32> to vector<1x256xf32>
    %137 = vector.extract_strided_slice %136 {offsets = [0, 0], sizes = [1, 16], strides = [1, 1]} : vector<1x256xf32> to vector<1x16xf32>
    %138 = vector.extract_strided_slice %136 {offsets = [0, 16], sizes = [1, 16], strides = [1, 1]} : vector<1x256xf32> to vector<1x16xf32>
    %139 = arith.addf %137, %138 : vector<1x16xf32>
    %140 = vector.extract_strided_slice %136 {offsets = [0, 32], sizes = [1, 16], strides = [1, 1]} : vector<1x256xf32> to vector<1x16xf32>
    %141 = arith.addf %139, %140 : vector<1x16xf32>
    %142 = vector.extract_strided_slice %136 {offsets = [0, 48], sizes = [1, 16], strides = [1, 1]} : vector<1x256xf32> to vector<1x16xf32>
    %143 = arith.addf %141, %142 : vector<1x16xf32>
    %144 = vector.extract_strided_slice %136 {offsets = [0, 64], sizes = [1, 16], strides = [1, 1]} : vector<1x256xf32> to vector<1x16xf32>
    %145 = arith.addf %143, %144 : vector<1x16xf32>
    %146 = vector.extract_strided_slice %136 {offsets = [0, 80], sizes = [1, 16], strides = [1, 1]} : vector<1x256xf32> to vector<1x16xf32>
    %147 = arith.addf %145, %146 : vector<1x16xf32>
    %148 = vector.extract_strided_slice %136 {offsets = [0, 96], sizes = [1, 16], strides = [1, 1]} : vector<1x256xf32> to vector<1x16xf32>
    %149 = arith.addf %147, %148 : vector<1x16xf32>
    %150 = vector.extract_strided_slice %136 {offsets = [0, 112], sizes = [1, 16], strides = [1, 1]} : vector<1x256xf32> to vector<1x16xf32>
    %151 = arith.addf %149, %150 : vector<1x16xf32>
    %152 = vector.extract_strided_slice %136 {offsets = [0, 128], sizes = [1, 16], strides = [1, 1]} : vector<1x256xf32> to vector<1x16xf32>
    %153 = arith.addf %151, %152 : vector<1x16xf32>
    %154 = vector.extract_strided_slice %136 {offsets = [0, 144], sizes = [1, 16], strides = [1, 1]} : vector<1x256xf32> to vector<1x16xf32>
    %155 = arith.addf %153, %154 : vector<1x16xf32>
    %156 = vector.extract_strided_slice %136 {offsets = [0, 160], sizes = [1, 16], strides = [1, 1]} : vector<1x256xf32> to vector<1x16xf32>
    %157 = arith.addf %155, %156 : vector<1x16xf32>
    %158 = vector.extract_strided_slice %136 {offsets = [0, 176], sizes = [1, 16], strides = [1, 1]} : vector<1x256xf32> to vector<1x16xf32>
    %159 = arith.addf %157, %158 : vector<1x16xf32>
    %160 = vector.extract_strided_slice %136 {offsets = [0, 192], sizes = [1, 16], strides = [1, 1]} : vector<1x256xf32> to vector<1x16xf32>
    %161 = arith.addf %159, %160 : vector<1x16xf32>
    %162 = vector.extract_strided_slice %136 {offsets = [0, 208], sizes = [1, 16], strides = [1, 1]} : vector<1x256xf32> to vector<1x16xf32>
    %163 = arith.addf %161, %162 : vector<1x16xf32>
    %164 = vector.extract_strided_slice %136 {offsets = [0, 224], sizes = [1, 16], strides = [1, 1]} : vector<1x256xf32> to vector<1x16xf32>
    %165 = arith.addf %163, %164 : vector<1x16xf32>
    %166 = vector.extract_strided_slice %136 {offsets = [0, 240], sizes = [1, 16], strides = [1, 1]} : vector<1x256xf32> to vector<1x16xf32>
    %167 = arith.addf %165, %166 : vector<1x16xf32>
    %cst_56 = arith.constant 0.001953125 : f32
    %168 = vector.broadcast %cst_56 : f32 to vector<1x16xf32>
    %169 = arith.mulf %167, %168 : vector<1x16xf32>
    %170 = tpu.concatenate %169, %169, %169, %169, %169, %169, %169, %169, %169, %169, %169, %169, %169, %169, %169, %169 in 1 : vector<1x16xf32>, vector<1x16xf32>, vector<1x16xf32>, vector<1x16xf32>, vector<1x16xf32>, vector<1x16xf32>, vector<1x16xf32>, vector<1x16xf32>, vector<1x16xf32>, vector<1x16xf32>, vector<1x16xf32>, vector<1x16xf32>, vector<1x16xf32>, vector<1x16xf32>, vector<1x16xf32>, vector<1x16xf32> -> vector<1x256xf32>
    %171 = vector.broadcast %170 : vector<1x256xf32> to vector<32x256xf32>
    %172 = arith.subf %134, %171 : vector<32x256xf32>
    %173 = arith.mulf %172, %172 : vector<32x256xf32>
    %cst_57 = arith.constant dense<0.000000e+00> : vector<256xf32>
    %174 = vector.multi_reduction <add>, %173, %cst_57 [0] : vector<32x256xf32> to vector<256xf32>
    %175 = vector.shape_cast %174 : vector<256xf32> to vector<1x256xf32>
    %176 = vector.extract_strided_slice %175 {offsets = [0, 0], sizes = [1, 16], strides = [1, 1]} : vector<1x256xf32> to vector<1x16xf32>
    %177 = vector.extract_strided_slice %175 {offsets = [0, 16], sizes = [1, 16], strides = [1, 1]} : vector<1x256xf32> to vector<1x16xf32>
    %178 = arith.addf %176, %177 : vector<1x16xf32>
    %179 = vector.extract_strided_slice %175 {offsets = [0, 32], sizes = [1, 16], strides = [1, 1]} : vector<1x256xf32> to vector<1x16xf32>
    %180 = arith.addf %178, %179 : vector<1x16xf32>
    %181 = vector.extract_strided_slice %175 {offsets = [0, 48], sizes = [1, 16], strides = [1, 1]} : vector<1x256xf32> to vector<1x16xf32>
    %182 = arith.addf %180, %181 : vector<1x16xf32>
    %183 = vector.extract_strided_slice %175 {offsets = [0, 64], sizes = [1, 16], strides = [1, 1]} : vector<1x256xf32> to vector<1x16xf32>
    %184 = arith.addf %182, %183 : vector<1x16xf32>
    %185 = vector.extract_strided_slice %175 {offsets = [0, 80], sizes = [1, 16], strides = [1, 1]} : vector<1x256xf32> to vector<1x16xf32>
    %186 = arith.addf %184, %185 : vector<1x16xf32>
    %187 = vector.extract_strided_slice %175 {offsets = [0, 96], sizes = [1, 16], strides = [1, 1]} : vector<1x256xf32> to vector<1x16xf32>
    %188 = arith.addf %186, %187 : vector<1x16xf32>
    %189 = vector.extract_strided_slice %175 {offsets = [0, 112], sizes = [1, 16], strides = [1, 1]} : vector<1x256xf32> to vector<1x16xf32>
    %190 = arith.addf %188, %189 : vector<1x16xf32>
    %191 = vector.extract_strided_slice %175 {offsets = [0, 128], sizes = [1, 16], strides = [1, 1]} : vector<1x256xf32> to vector<1x16xf32>
    %192 = arith.addf %190, %191 : vector<1x16xf32>
    %193 = vector.extract_strided_slice %175 {offsets = [0, 144], sizes = [1, 16], strides = [1, 1]} : vector<1x256xf32> to vector<1x16xf32>
    %194 = arith.addf %192, %193 : vector<1x16xf32>
    %195 = vector.extract_strided_slice %175 {offsets = [0, 160], sizes = [1, 16], strides = [1, 1]} : vector<1x256xf32> to vector<1x16xf32>
    %196 = arith.addf %194, %195 : vector<1x16xf32>
    %197 = vector.extract_strided_slice %175 {offsets = [0, 176], sizes = [1, 16], strides = [1, 1]} : vector<1x256xf32> to vector<1x16xf32>
    %198 = arith.addf %196, %197 : vector<1x16xf32>
    %199 = vector.extract_strided_slice %175 {offsets = [0, 192], sizes = [1, 16], strides = [1, 1]} : vector<1x256xf32> to vector<1x16xf32>
    %200 = arith.addf %198, %199 : vector<1x16xf32>
    %201 = vector.extract_strided_slice %175 {offsets = [0, 208], sizes = [1, 16], strides = [1, 1]} : vector<1x256xf32> to vector<1x16xf32>
    %202 = arith.addf %200, %201 : vector<1x16xf32>
    %203 = vector.extract_strided_slice %175 {offsets = [0, 224], sizes = [1, 16], strides = [1, 1]} : vector<1x256xf32> to vector<1x16xf32>
    %204 = arith.addf %202, %203 : vector<1x16xf32>
    %205 = vector.extract_strided_slice %175 {offsets = [0, 240], sizes = [1, 16], strides = [1, 1]} : vector<1x256xf32> to vector<1x16xf32>
    %206 = arith.addf %204, %205 : vector<1x16xf32>
    %cst_58 = arith.constant 0.001953125 : f32
    %207 = vector.broadcast %cst_58 : f32 to vector<1x16xf32>
    %208 = arith.mulf %206, %207 : vector<1x16xf32>
    %c0_59 = arith.constant 0 : index
    %c0_60 = arith.constant 0 : index
    %209 = vector.load %arg6[%c0_59, %c0_60] : memref<1x256xf32, #tpu.memory_space<vmem>>, vector<1x256xf32>
    %cst_61 = arith.constant 9.99999974E-6 : f32
    %210 = vector.broadcast %cst_61 : f32 to vector<1x16xf32>
    %211 = arith.addf %208, %210 : vector<1x16xf32>
    %212 = math.rsqrt %211 : vector<1x16xf32>
    %213 = tpu.concatenate %212, %212, %212, %212, %212, %212, %212, %212, %212, %212, %212, %212, %212, %212, %212, %212 in 1 : vector<1x16xf32>, vector<1x16xf32>, vector<1x16xf32>, vector<1x16xf32>, vector<1x16xf32>, vector<1x16xf32>, vector<1x16xf32>, vector<1x16xf32>, vector<1x16xf32>, vector<1x16xf32>, vector<1x16xf32>, vector<1x16xf32>, vector<1x16xf32>, vector<1x16xf32>, vector<1x16xf32>, vector<1x16xf32> -> vector<1x256xf32>
    %214 = arith.mulf %209, %213 : vector<1x256xf32>
    %215 = vector.broadcast %214 : vector<1x256xf32> to vector<32x256xf32>
    %216 = arith.mulf %172, %215 : vector<32x256xf32>
    %c0_62 = arith.constant 0 : index
    %c0_63 = arith.constant 0 : index
    %217 = vector.load %arg7[%c0_62, %c0_63] : memref<1x256xf32, #tpu.memory_space<vmem>>, vector<1x256xf32>
    %218 = vector.broadcast %217 : vector<1x256xf32> to vector<32x256xf32>
    %219 = arith.addf %216, %218 : vector<32x256xf32>
    %cst_64 = arith.constant 0.000000e+00 : f32
    %220 = vector.broadcast %cst_64 : f32 to vector<32x256xf32>
    %221 = arith.maximumf %219, %220 : vector<32x256xf32>
    %cst_65 = arith.constant 0.000000e+00 : f32
    %222 = vector.broadcast %cst_65 : f32 to vector<2x1x256xf32>
    %c0_66 = arith.constant 0 : index
    %c0_67 = arith.constant 0 : index
    %c0_68 = arith.constant 0 : index
    %223 = vector.load %arg13[%c0_66, %c0_67, %c0_68] : memref<2x18x256xf32, #tpu.memory_space<vmem>>, vector<2x1x256xf32>
    tpu.vector_store %arg13[%c0_66, %c0_67, %c0_68], %222 {strides = array<i32>} : memref<2x18x256xf32, #tpu.memory_space<vmem>>, vector<2x1x256xf32>,
    %cst_69 = arith.constant 0.000000e+00 : f32
    %224 = vector.broadcast %cst_69 : f32 to vector<2x1x256xf32>
    %c0_70 = arith.constant 0 : index
    %c17_71 = arith.constant 17 : index
    %c0_72 = arith.constant 0 : index
    %225 = vector.load %arg13[%c0_70, %c17_71, %c0_72] : memref<2x18x256xf32, #tpu.memory_space<vmem>>, vector<2x1x256xf32>
    tpu.vector_store %arg13[%c0_70, %c17_71, %c0_72], %224 {strides = array<i32>} : memref<2x18x256xf32, #tpu.memory_space<vmem>>, vector<2x1x256xf32>,
    %226 = vector.shape_cast %221 : vector<32x256xf32> to vector<2x16x256xf32>
    %c0_73 = arith.constant 0 : index
    %c1_74 = arith.constant 1 : index
    %c0_75 = arith.constant 0 : index
    %227 = vector.load %arg13[%c0_73, %c1_74, %c0_75] : memref<2x18x256xf32, #tpu.memory_space<vmem>>, vector<2x16x256xf32>
    tpu.vector_store %arg13[%c0_73, %c1_74, %c0_75], %226 {strides = array<i32>} : memref<2x18x256xf32, #tpu.memory_space<vmem>>, vector<2x16x256xf32>,
    %c0_76 = arith.constant 0 : index
    %c0_77 = arith.constant 0 : index
    %c0_78 = arith.constant 0 : index
    %228 = vector.load %arg13[%c0_76, %c0_77, %c0_78] : memref<2x18x256xf32, #tpu.memory_space<vmem>>, vector<2x16x256xf32>
    %229 = vector.shape_cast %228 : vector<2x16x256xf32> to vector<32x256xf32>
    %c0_79 = arith.constant 0 : index
    %c0_80 = arith.constant 0 : index
    %c0_81 = arith.constant 0 : index
    %230 = vector.load %arg8[%c0_79, %c0_80, %c0_81] : memref<3x256x128xf32, #tpu.memory_space<vmem>>, vector<1x256x128xf32>
    %231 = vector.shape_cast %230 : vector<1x256x128xf32> to vector<256x128xf32>
    %cst_82 = arith.constant dense<0.000000e+00> : vector<32x128xf32>
    %232 = tpu.matmul %229, %231, %cst_82 {dimension_numbers = #tpu.dot_dimension_numbers<[1], [0], [0], [1], [0, 0, 1, 1], [], []>} : vector<32x256xf32>, vector<256x128xf32>, vector<32x128xf32> -> vector<32x128xf32>
    %c0_83 = arith.constant 0 : index
    %c1_84 = arith.constant 1 : index
    %c0_85 = arith.constant 0 : index
    %233 = vector.load %arg13[%c0_83, %c1_84, %c0_85] : memref<2x18x256xf32, #tpu.memory_space<vmem>>, vector<2x16x256xf32>
    %234 = vector.shape_cast %233 : vector<2x16x256xf32> to vector<32x256xf32>
    %c1_86 = arith.constant 1 : index
    %c0_87 = arith.constant 0 : index
    %c0_88 = arith.constant 0 : index
    %235 = vector.load %arg8[%c1_86, %c0_87, %c0_88] : memref<3x256x128xf32, #tpu.memory_space<vmem>>, vector<1x256x128xf32>
    %236 = vector.shape_cast %235 : vector<1x256x128xf32> to vector<256x128xf32>
    %cst_89 = arith.constant dense<0.000000e+00> : vector<32x128xf32>
    %237 = tpu.matmul %234, %236, %cst_89 {dimension_numbers = #tpu.dot_dimension_numbers<[1], [0], [0], [1], [0, 0, 1, 1], [], []>} : vector<32x256xf32>, vector<256x128xf32>, vector<32x128xf32> -> vector<32x128xf32>
    %238 = arith.addf %232, %237 : vector<32x128xf32>
    %c0_90 = arith.constant 0 : index
    %c2_91 = arith.constant 2 : index
    %c0_92 = arith.constant 0 : index
    %239 = vector.load %arg13[%c0_90, %c2_91, %c0_92] : memref<2x18x256xf32, #tpu.memory_space<vmem>>, vector<2x16x256xf32>
    %240 = vector.shape_cast %239 : vector<2x16x256xf32> to vector<32x256xf32>
    %c2_93 = arith.constant 2 : index
    %c0_94 = arith.constant 0 : index
    %c0_95 = arith.constant 0 : index
    %241 = vector.load %arg8[%c2_93, %c0_94, %c0_95] : memref<3x256x128xf32, #tpu.memory_space<vmem>>, vector<1x256x128xf32>
    %242 = vector.shape_cast %241 : vector<1x256x128xf32> to vector<256x128xf32>
    %cst_96 = arith.constant dense<0.000000e+00> : vector<32x128xf32>
    %243 = tpu.matmul %240, %242, %cst_96 {dimension_numbers = #tpu.dot_dimension_numbers<[1], [0], [0], [1], [0, 0, 1, 1], [], []>} : vector<32x256xf32>, vector<256x128xf32>, vector<32x128xf32> -> vector<32x128xf32>
    %244 = arith.addf %238, %243 : vector<32x128xf32>
    %cst_97 = arith.constant dense<0.000000e+00> : vector<128xf32>
    %245 = vector.multi_reduction <add>, %244, %cst_97 [0] : vector<32x128xf32> to vector<128xf32>
    %246 = vector.shape_cast %245 : vector<128xf32> to vector<1x128xf32>
    %247 = vector.extract_strided_slice %246 {offsets = [0, 0], sizes = [1, 8], strides = [1, 1]} : vector<1x128xf32> to vector<1x8xf32>
    %248 = vector.extract_strided_slice %246 {offsets = [0, 8], sizes = [1, 8], strides = [1, 1]} : vector<1x128xf32> to vector<1x8xf32>
    %249 = arith.addf %247, %248 : vector<1x8xf32>
    %250 = vector.extract_strided_slice %246 {offsets = [0, 16], sizes = [1, 8], strides = [1, 1]} : vector<1x128xf32> to vector<1x8xf32>
    %251 = arith.addf %249, %250 : vector<1x8xf32>
    %252 = vector.extract_strided_slice %246 {offsets = [0, 24], sizes = [1, 8], strides = [1, 1]} : vector<1x128xf32> to vector<1x8xf32>
    %253 = arith.addf %251, %252 : vector<1x8xf32>
    %254 = vector.extract_strided_slice %246 {offsets = [0, 32], sizes = [1, 8], strides = [1, 1]} : vector<1x128xf32> to vector<1x8xf32>
    %255 = arith.addf %253, %254 : vector<1x8xf32>
    %256 = vector.extract_strided_slice %246 {offsets = [0, 40], sizes = [1, 8], strides = [1, 1]} : vector<1x128xf32> to vector<1x8xf32>
    %257 = arith.addf %255, %256 : vector<1x8xf32>
    %258 = vector.extract_strided_slice %246 {offsets = [0, 48], sizes = [1, 8], strides = [1, 1]} : vector<1x128xf32> to vector<1x8xf32>
    %259 = arith.addf %257, %258 : vector<1x8xf32>
    %260 = vector.extract_strided_slice %246 {offsets = [0, 56], sizes = [1, 8], strides = [1, 1]} : vector<1x128xf32> to vector<1x8xf32>
    %261 = arith.addf %259, %260 : vector<1x8xf32>
    %262 = vector.extract_strided_slice %246 {offsets = [0, 64], sizes = [1, 8], strides = [1, 1]} : vector<1x128xf32> to vector<1x8xf32>
    %263 = arith.addf %261, %262 : vector<1x8xf32>
    %264 = vector.extract_strided_slice %246 {offsets = [0, 72], sizes = [1, 8], strides = [1, 1]} : vector<1x128xf32> to vector<1x8xf32>
    %265 = arith.addf %263, %264 : vector<1x8xf32>
    %266 = vector.extract_strided_slice %246 {offsets = [0, 80], sizes = [1, 8], strides = [1, 1]} : vector<1x128xf32> to vector<1x8xf32>
    %267 = arith.addf %265, %266 : vector<1x8xf32>
    %268 = vector.extract_strided_slice %246 {offsets = [0, 88], sizes = [1, 8], strides = [1, 1]} : vector<1x128xf32> to vector<1x8xf32>
    %269 = arith.addf %267, %268 : vector<1x8xf32>
    %270 = vector.extract_strided_slice %246 {offsets = [0, 96], sizes = [1, 8], strides = [1, 1]} : vector<1x128xf32> to vector<1x8xf32>
    %271 = arith.addf %269, %270 : vector<1x8xf32>
    %272 = vector.extract_strided_slice %246 {offsets = [0, 104], sizes = [1, 8], strides = [1, 1]} : vector<1x128xf32> to vector<1x8xf32>
    %273 = arith.addf %271, %272 : vector<1x8xf32>
    %274 = vector.extract_strided_slice %246 {offsets = [0, 112], sizes = [1, 8], strides = [1, 1]} : vector<1x128xf32> to vector<1x8xf32>
    %275 = arith.addf %273, %274 : vector<1x8xf32>
    %276 = vector.extract_strided_slice %246 {offsets = [0, 120], sizes = [1, 8], strides = [1, 1]} : vector<1x128xf32> to vector<1x8xf32>
    %277 = arith.addf %275, %276 : vector<1x8xf32>
    %cst_98 = arith.constant 0.001953125 : f32
    %278 = vector.broadcast %cst_98 : f32 to vector<1x8xf32>
    %279 = arith.mulf %277, %278 : vector<1x8xf32>
    %280 = tpu.concatenate %279, %279, %279, %279, %279, %279, %279, %279, %279, %279, %279, %279, %279, %279, %279, %279 in 1 : vector<1x8xf32>, vector<1x8xf32>, vector<1x8xf32>, vector<1x8xf32>, vector<1x8xf32>, vector<1x8xf32>, vector<1x8xf32>, vector<1x8xf32>, vector<1x8xf32>, vector<1x8xf32>, vector<1x8xf32>, vector<1x8xf32>, vector<1x8xf32>, vector<1x8xf32>, vector<1x8xf32>, vector<1x8xf32> -> vector<1x128xf32>
    %281 = vector.broadcast %280 : vector<1x128xf32> to vector<32x128xf32>
    %282 = arith.subf %244, %281 : vector<32x128xf32>
    %283 = arith.mulf %282, %282 : vector<32x128xf32>
    %cst_99 = arith.constant dense<0.000000e+00> : vector<128xf32>
    %284 = vector.multi_reduction <add>, %283, %cst_99 [0] : vector<32x128xf32> to vector<128xf32>
    %285 = vector.shape_cast %284 : vector<128xf32> to vector<1x128xf32>
    %286 = vector.extract_strided_slice %285 {offsets = [0, 0], sizes = [1, 8], strides = [1, 1]} : vector<1x128xf32> to vector<1x8xf32>
    %287 = vector.extract_strided_slice %285 {offsets = [0, 8], sizes = [1, 8], strides = [1, 1]} : vector<1x128xf32> to vector<1x8xf32>
    %288 = arith.addf %286, %287 : vector<1x8xf32>
    %289 = vector.extract_strided_slice %285 {offsets = [0, 16], sizes = [1, 8], strides = [1, 1]} : vector<1x128xf32> to vector<1x8xf32>
    %290 = arith.addf %288, %289 : vector<1x8xf32>
    %291 = vector.extract_strided_slice %285 {offsets = [0, 24], sizes = [1, 8], strides = [1, 1]} : vector<1x128xf32> to vector<1x8xf32>
    %292 = arith.addf %290, %291 : vector<1x8xf32>
    %293 = vector.extract_strided_slice %285 {offsets = [0, 32], sizes = [1, 8], strides = [1, 1]} : vector<1x128xf32> to vector<1x8xf32>
    %294 = arith.addf %292, %293 : vector<1x8xf32>
    %295 = vector.extract_strided_slice %285 {offsets = [0, 40], sizes = [1, 8], strides = [1, 1]} : vector<1x128xf32> to vector<1x8xf32>
    %296 = arith.addf %294, %295 : vector<1x8xf32>
    %297 = vector.extract_strided_slice %285 {offsets = [0, 48], sizes = [1, 8], strides = [1, 1]} : vector<1x128xf32> to vector<1x8xf32>
    %298 = arith.addf %296, %297 : vector<1x8xf32>
    %299 = vector.extract_strided_slice %285 {offsets = [0, 56], sizes = [1, 8], strides = [1, 1]} : vector<1x128xf32> to vector<1x8xf32>
    %300 = arith.addf %298, %299 : vector<1x8xf32>
    %301 = vector.extract_strided_slice %285 {offsets = [0, 64], sizes = [1, 8], strides = [1, 1]} : vector<1x128xf32> to vector<1x8xf32>
    %302 = arith.addf %300, %301 : vector<1x8xf32>
    %303 = vector.extract_strided_slice %285 {offsets = [0, 72], sizes = [1, 8], strides = [1, 1]} : vector<1x128xf32> to vector<1x8xf32>
    %304 = arith.addf %302, %303 : vector<1x8xf32>
    %305 = vector.extract_strided_slice %285 {offsets = [0, 80], sizes = [1, 8], strides = [1, 1]} : vector<1x128xf32> to vector<1x8xf32>
    %306 = arith.addf %304, %305 : vector<1x8xf32>
    %307 = vector.extract_strided_slice %285 {offsets = [0, 88], sizes = [1, 8], strides = [1, 1]} : vector<1x128xf32> to vector<1x8xf32>
    %308 = arith.addf %306, %307 : vector<1x8xf32>
    %309 = vector.extract_strided_slice %285 {offsets = [0, 96], sizes = [1, 8], strides = [1, 1]} : vector<1x128xf32> to vector<1x8xf32>
    %310 = arith.addf %308, %309 : vector<1x8xf32>
    %311 = vector.extract_strided_slice %285 {offsets = [0, 104], sizes = [1, 8], strides = [1, 1]} : vector<1x128xf32> to vector<1x8xf32>
    %312 = arith.addf %310, %311 : vector<1x8xf32>
    %313 = vector.extract_strided_slice %285 {offsets = [0, 112], sizes = [1, 8], strides = [1, 1]} : vector<1x128xf32> to vector<1x8xf32>
    %314 = arith.addf %312, %313 : vector<1x8xf32>
    %315 = vector.extract_strided_slice %285 {offsets = [0, 120], sizes = [1, 8], strides = [1, 1]} : vector<1x128xf32> to vector<1x8xf32>
    %316 = arith.addf %314, %315 : vector<1x8xf32>
    %cst_100 = arith.constant 0.001953125 : f32
    %317 = vector.broadcast %cst_100 : f32 to vector<1x8xf32>
    %318 = arith.mulf %316, %317 : vector<1x8xf32>
    %c0_101 = arith.constant 0 : index
    %c0_102 = arith.constant 0 : index
    %319 = vector.load %arg9[%c0_101, %c0_102] : memref<1x128xf32, #tpu.memory_space<vmem>>, vector<1x128xf32>
    %cst_103 = arith.constant 9.99999974E-6 : f32
    %320 = vector.broadcast %cst_103 : f32 to vector<1x8xf32>
    %321 = arith.addf %318, %320 : vector<1x8xf32>
    %322 = math.rsqrt %321 : vector<1x8xf32>
    %323 = tpu.concatenate %322, %322, %322, %322, %322, %322, %322, %322, %322, %322, %322, %322, %322, %322, %322, %322 in 1 : vector<1x8xf32>, vector<1x8xf32>, vector<1x8xf32>, vector<1x8xf32>, vector<1x8xf32>, vector<1x8xf32>, vector<1x8xf32>, vector<1x8xf32>, vector<1x8xf32>, vector<1x8xf32>, vector<1x8xf32>, vector<1x8xf32>, vector<1x8xf32>, vector<1x8xf32>, vector<1x8xf32>, vector<1x8xf32> -> vector<1x128xf32>
    %324 = arith.mulf %319, %323 : vector<1x128xf32>
    %325 = vector.broadcast %324 : vector<1x128xf32> to vector<32x128xf32>
    %326 = arith.mulf %282, %325 : vector<32x128xf32>
    %c0_104 = arith.constant 0 : index
    %c0_105 = arith.constant 0 : index
    %327 = vector.load %arg10[%c0_104, %c0_105] : memref<1x128xf32, #tpu.memory_space<vmem>>, vector<1x128xf32>
    %328 = vector.broadcast %327 : vector<1x128xf32> to vector<32x128xf32>
    %329 = arith.addf %326, %328 : vector<32x128xf32>
    %cst_106 = arith.constant 0.000000e+00 : f32
    %330 = vector.broadcast %cst_106 : f32 to vector<32x128xf32>
    %331 = arith.maximumf %329, %330 : vector<32x128xf32>
    %c0_107 = arith.constant 0 : index
    %c0_108 = arith.constant 0 : index
    %332 = vector.load %arg11[%c0_107, %c0_108] : memref<32x128xf32, #tpu.memory_space<vmem>>, vector<32x128xf32>
    tpu.vector_store %arg11[%c0_107, %c0_108], %331 {strides = array<i32>} : memref<32x128xf32, #tpu.memory_space<vmem>>, vector<32x128xf32>,
    return
  }
}

</mosaic_0001>

<bundles_post_ra>
// kernel: up_forward.1
= control target key start
LH: loop header
LB: loop body
LE: loop exit
PB: predicated region body
PF: predicated region fallthrough
CT: control target
= control target key end

     0   :  { %16 = vsyncpa [#allocation5], 0  ;;  %s3364_s17 = smov [#allocation4]   ;;  %s4458_s0 = inlined_call_operand.vmem [shape: f32[16,64], index: 0, kind: input, shape index: {}]   ;;  %s4459_s1 = inlined_call_operand.vmem [shape: f32[2,16,128], index: 1, kind: input, shape index: {}]   ;;  %s4460_s2 = inlined_call_operand.vmem [shape: f32[2,64,128], index: 2, kind: input, shape index: {}]   ;;  %s4461_s3 = inlined_call_operand.vmem [shape: f32[1,128], index: 3, kind: input, shape index: {}]   ;;  %s4462_s4 = inlined_call_operand.vmem [shape: f32[1,128], index: 4, kind: input, shape index: {}]   ;;  %s4463_s5 = inlined_call_operand.hbm [shape: f32[3,256,256], index: 5, kind: input, shape index: {}]   ;;  %s4464_s6 = inlined_call_operand.vmem [shape: f32[1,256], index: 6, kind: input, shape index: {}]   ;;  %s4465_s7 = inlined_call_operand.vmem [shape: f32[1,256], index: 7, kind: input, shape index: {}]   ;;  %s4466_s8 = inlined_call_operand.vmem [shape: f32[3,256,128], index: 8, kind: input, shape index: {}]   ;;  %s4467_s9 = inlined_call_operand.vmem [shape: f32[1,128], index: 9, kind: input, shape index: {}]   ;;  %s4468_s10 = inlined_call_operand.vmem [shape: f32[1,128], index: 10, kind: input, shape index: {}]   ;;  %s4469_s11 = inlined_call_operand.vmem [shape: f32[32,128], index: 11, kind: output, shape index: {}]  }
   0x1   :  { %s32_s18 = sshll.u32 %s3364_s17, 4  ;;  %s3340_s21 = scalar_lea.hbm %s4463_s5, 24576  ;;  %s33_s18 = int_to_ptr.vmem [resolvable:$true] %s32_s18 }
   0x2   :  { %p3341_p0 = scmp.ne.s32.totalorder %s4463_s5, %s3340_s21  ;;  %p3344_p1 = scmp.lt.u32.totalorder %s3340_s21, %s4463_s5 }
   0x4   :  { %p3346_p2 = pnand %p3344_p1, %p3341_p0 }
   0x6   :  { %3349 = shalt.err (!%p3346_p2)
}
   0x7   :  { %s3350_s26 = scalar_lea.vmem %s33_s18, 24576  ;;  %p3355_p4 = scmp.lt.s32.totalorder %s33_s18, %s33_s18 }
   0x8   :  { %p3351_p3 = scmp.ne.s32.totalorder %s33_s18, %s3350_s26  ;;  %p3356_p5 = scmp.lt.s32.totalorder %s3350_s26, %s3350_s26 }
   0xa   :  { %p3357_p6 = por %p3356_p5, %p3355_p4 }
   0xc   :  { %p3358_p7 = pnand %p3357_p6, %p3351_p3 }
   0xe   :  { %3361 = shalt.err (!%p3358_p7)
}
   0xf   :  { %s3365_s27 = smov 256   ;;  %s3366_s28 = smov 16  }
  0x10   :  { %38 = dma.hbm_to_vmem [thread:$0]  %s4463_s5, 24576, %s33_s18, [#allocation5], %s3365_s27, %s3365_s27, %s3366_s28  }
  0x11   :  { %3362 = dma.done.wait [#allocation5], 24576  }
  0x12   :  { %3363 = vsyncadd [#allocation5], 4294942720  ;;  %v54_v0 = vld [vmem:[%s4460_s2] sm:$0xff]  ;;  %v55_v1 = vld [vmem:[%s4460_s2 + $0x8] sm:$0xff]  ;;  %vm62_vm0 = vcmask 523264   ;;  %s3368_s27 = smov 120  }
  0x13   :  { %v56_v2 = vld [vmem:[%s4460_s2 + $0x10] sm:$0xff]  ;;  %v2978_v3 = vpack.c.bf16 %v55_v1, %v54_v0  ;;  %v57_v4 = vld [vmem:[%s4460_s2 + $0x18] sm:$0xff]  ;;  %v58_v6 = vld [vmem:[%s4460_s2 + $0x20] sm:$0xff]  ;;  %s3369_s29 = smov 96   ;;  %s3370_s30 = smov 112   ;;  %vm351_vm1 = vcmask 64512  }
  0x14   :  { %v2982_v5 = vpack.c.bf16 %v57_v4, %v56_v2  ;;  %v59_v7 = vld [vmem:[%s4460_s2 + $0x28] sm:$0xff]  ;;  %v52_v8 = vld [vmem:[%s4458_s0] sm:$0xff]  ;;  %v60_v10 = vld [vmem:[%s4460_s2 + $0x30] sm:$0xff]  ;;  %s3371_s12 = smov 80   ;;  %s3372_s13 = smov 88   ;;  %vm353_vm2 = vcmask 130048  }
  0x15   :  { %2979 = vmatprep.subr.bf16.mxu0 %v2978_v3  ;;  %2956 = vmatprep.mubr.msk.f32.mxu0 %vm62_vm0, %v52_v8  ;;  %v2986_v9 = vpack.c.bf16 %v59_v7, %v58_v6  ;;  %v61_v11 = vld [vmem:[%s4460_s2 + $0x38] sm:$0xff]  ;;  %v2712_v13 = vld [vmem:[%s4460_s2 + $0x40] sm:$0xff]  ;;  %v2713_v14 = vld [vmem:[%s4460_s2 + $0x48] sm:$0xff]  ;;  %s3373_s14 = smov 64   ;;  %s3374_s15 = smov 72   ;;  %vm355_vm3 = vcmask 195584  }
  0x16   :  { %2981 = vmatpush3.bf16.msra.mxu0 %v2978_v3  ;;  %v2990_v12 = vpack.c.bf16 %v61_v11, %v60_v10  ;;  %v2994_v15 = vpack.c.bf16 %v2713_v14, %v2712_v13  ;;  %v2714_v16 = vld [vmem:[%s4460_s2 + $0x50] sm:$0xff]  ;;  %v2715_v17 = vld [vmem:[%s4460_s2 + $0x58] sm:$0xff]  ;;  %v53_v18 = vld [vmem:[%s4458_s0 + $0x8] sm:$0xff]  ;;  %s3375_s16 = smov 48   ;;  %s3376_s17 = smov 56   ;;  %vm357_vm4 = vcmask 261120  }
  0x17   :  { %2983 = vmatprep.subr.bf16.mxu0 %v2982_v5  ;;  %v2998_v19 = vpack.c.bf16 %v2715_v17, %v2714_v16  ;;  %v2716_v20 = vld [vmem:[%s4460_s2 + $0x60] sm:$0xff]  ;;  %v2717_v21 = vld [vmem:[%s4460_s2 + $0x68] sm:$0xff]  ;;  %v2718_v23 = vld [vmem:[%s4460_s2 + $0x70] sm:$0xff]  ;;  %s3377_s19 = smov 32   ;;  %s3378_s20 = smov 40   ;;  %vm359_vm5 = vcmask 326656  }
  0x18   :  { %v3002_v22 = vpack.c.bf16 %v2717_v21, %v2716_v20  ;;  %v2719_v24 = vld [vmem:[%s4460_s2 + $0x78] sm:$0xff]  ;;  %s3367_s2 = smov 104   ;;  %s3379_s5 = smov 24   ;;  %vm361_vm6 = vcmask 392192   ;;  %vm363_vm7 = vcmask 457728   ;;  %vm4471_vm8 = vcmask 588800  }
  0x19   :  { %v3006_v25 = vpack.c.bf16 %v2719_v24, %v2718_v23  ;;  %s3380_s18 = smov 8   ;;  %vm368_vm9 = vcmask 654336   ;;  %vm370_vm10 = vcmask 719872   ;;  %vm372_vm11 = vcmask 785408  }
  0x1a   :  { %2985 = vmatpush3.bf16.msra.mxu0 %v2982_v5  ;;  %vm374_vm12 = vcmask 850944   ;;  %vm376_vm13 = vcmask 916480   ;;  %vm4470_vm14 = vcmask 982016  }
  0x1b   :  { %2987 = vmatprep.subr.bf16.mxu0 %v2986_v9 }
  0x1e   :  { %2989 = vmatpush3.bf16.msra.mxu0 %v2986_v9 }
  0x1f   :  { %2991 = vmatprep.subr.bf16.mxu0 %v2990_v12 }
  0x22   :  { %2993 = vmatpush3.bf16.msra.mxu0 %v2990_v12 }
  0x23   :  { %2995 = vmatprep.subr.bf16.mxu0 %v2994_v15 }
  0x25   :  { %2957 = vmatmul.mubr.msk.f32.vlgmr.msra.gmra.mrb[0].mxu0 %vm62_vm0, %v53_v18 }
  0x26   :  { %2997 = vmatpush3.bf16.msra.mxu0 %v2994_v15  ;;  %2975 = vmatprep.mubr.msk.f32.mxu0 %vm62_vm0, %v52_v8 }
  0x27   :  { %2999 = vmatprep.subr.bf16.mxu0 %v2998_v19 }
  0x2a   :  { %3001 = vmatpush3.bf16.msra.mxu0 %v2998_v19 }
  0x2b   :  { %3003 = vmatprep.subr.bf16.mxu0 %v3002_v22 }
  0x2e   :  { %3005 = vmatpush3.bf16.msra.mxu0 %v3002_v22 }
  0x2f   :  { %3007 = vmatprep.subr.bf16.mxu0 %v3006_v25 }
  0x32   :  { %3009 = vmatpush3.bf16.msra.mxu0 %v3006_v25 }
  0x35   :  { %2976 = vmatmul.mubr.msk.f32.vlgmr.msra.gmra.mrb[2].mxu0 %vm62_vm0, %v53_v18 }
  0xf8   :  { %v3515_v26 = vpop.f32.mrb[0].mxu0 }
  0xf9   :  { %v3517_v27 = vpop.f32.mrb[1].mxu0 }
  0xfa   :  { %v228_v28 = vadd.f32 %v3515_v26, %v3517_v27 }
  0xfc   :  { %v229_v29 = vrot.slane %v228_v28, 4 }
  0xfe   :  { %v230_v30 = vadd.f32 %v229_v29, %v228_v28 }
 0x100   :  { %v231_v33 = vrot.slane %v230_v30, 2 }
 0x102   :  { %v232_v36 = vadd.f32 %v231_v33, %v230_v30 }
 0x104   :  { %v233_v39 = vrot.slane %v232_v36, 1 }
 0x106   :  { %v234_v42 = vadd.f32 %v233_v39, %v232_v36 }
 0x108   :  { %v3521_v31 = vpop.f32.mrb[2].mxu0 }
 0x109   :  { %v3523_v32 = vpop.f32.mrb[3].mxu0 }
 0x10a   :  { %v235_v34 = vadd.f32 %v3521_v31, %v3523_v32 }
 0x10c   :  { %v236_v35 = vrot.slane %v235_v34, 4 }
 0x10e   :  { %v237_v37 = vadd.f32 %v236_v35, %v235_v34  ;;  %v380_v35 = vlaneseq }
 0x110   :  { %v238_v38 = vrot.slane %v237_v37, 2  ;;  %vm3647_vm15 = vcmp.lt.s32.totalorder %v380_v35, 256 }
 0x112   :  { %v239_v40 = vadd.f32 %v238_v38, %v237_v37 }
 0x114   :  { %v240_v41 = vrot.slane %v239_v40, 1 }
 0x116   :  { %v241_v43 = vadd.f32 %v240_v41, %v239_v40  ;;  %v3569_v40 = vshrl.u32 %v380_v35, 7 }
 0x118   :  { %v242_v44 = vadd.f32 %v241_v43, %v234_v42 }
 0x11a   :  { %252 = vrot.lane.b32.xlu1 %v242_v44, %s3367_s2  ;;  %244 = vrot.lane.b32.xlu0 %v242_v44, %s3368_s27 }
 0x11e   :  { %256 = vrot.lane.b32.xlu1 %v242_v44, %s3369_s29  ;;  %248 = vrot.lane.b32.xlu0 %v242_v44, %s3370_s30 }
 0x122   :  { %264 = vrot.lane.b32.xlu1 %v242_v44, %s3371_s12  ;;  %260 = vrot.lane.b32.xlu0 %v242_v44, %s3372_s13 }
 0x126   :  { %272 = vrot.lane.b32.xlu1 %v242_v44, %s3373_s14  ;;  %268 = vrot.lane.b32.xlu0 %v242_v44, %s3374_s15 }
 0x12a   :  { %280 = vrot.lane.b32.xlu1 %v242_v44, %s3375_s16  ;;  %276 = vrot.lane.b32.xlu0 %v242_v44, %s3376_s17 }
 0x12e   :  { %288 = vrot.lane.b32.xlu1 %v242_v44, %s3377_s19  ;;  %284 = vrot.lane.b32.xlu0 %v242_v44, %s3378_s20 }
 0x132   :  { %296 = vrot.lane.b32.xlu1 %v242_v44, %s3366_s28  ;;  %292 = vrot.lane.b32.xlu0 %v242_v44, %s3379_s5 }
 0x136   :  { %300 = vrot.lane.b32.xlu0 %v242_v44, %s3380_s18 }
 0x18c   :  { %v253_v45 = vpop.permute.xlu1 %252  ;;  %v245_v46 = vpop.permute.xlu0 %244 }
 0x18d   :  { %v247_v47 = vadd.f32 %v245_v46, %v242_v44 }
 0x190   :  { %v257_v48 = vpop.permute.xlu1 %256  ;;  %v249_v49 = vpop.permute.xlu0 %248 }
 0x191   :  { %v251_v50 = vadd.f32 %v249_v49, %v247_v47 }
 0x193   :  { %v255_v51 = vadd.f32 %v253_v45, %v251_v50  ;;  %v3574_v45 = vsub.s32 0, %v3569_v40 }
 0x194   :  { %v265_v52 = vpop.permute.xlu1 %264  ;;  %v261_v53 = vpop.permute.xlu0 %260 }
 0x195   :  { %v259_v54 = vadd.f32 %v257_v48, %v255_v51 }
 0x197   :  { %v263_v55 = vadd.f32 %v261_v53, %v259_v54 }
 0x198   :  { %v273_v56 = vpop.permute.xlu1 %272  ;;  %v269_v57 = vpop.permute.xlu0 %268 }
 0x199   :  { %v267_v58 = vadd.f32 %v265_v52, %v263_v55 }
 0x19b   :  { %v271_v59 = vadd.f32 %v269_v57, %v267_v58 }
 0x19c   :  { %v281_v60 = vpop.permute.xlu1 %280  ;;  %v277_v61 = vpop.permute.xlu0 %276 }
 0x19d   :  { %v275_v62 = vadd.f32 %v273_v56, %v271_v59 }
 0x19f   :  { %v279_v63 = vadd.f32 %v277_v61, %v275_v62 }
 0x1a0   :  { %v285_v0 = vpop.permute.xlu0 %284  ;;  %v289_v2 = vpop.permute.xlu1 %288 }
 0x1a1   :  { %v283_v1 = vadd.f32 %v281_v60, %v279_v63 }
 0x1a3   :  { %v287_v3 = vadd.f32 %v285_v0, %v283_v1 }
 0x1a4   :  { %v293_v4 = vpop.permute.xlu0 %292  ;;  %v297_v7 = vpop.permute.xlu1 %296 }
 0x1a5   :  { %v291_v5 = vadd.f32 %v289_v2, %v287_v3 }
 0x1a7   :  { %v295_v6 = vadd.f32 %v293_v4, %v291_v5  ;;  %v1020_v5 = vld [vmem:[#allocation4 + $0x8] sm:$0xff] }
 0x1a8   :  { %v301_v9 = vpop.permute.xlu0 %300 }
 0x1a9   :  { %v299_v8 = vadd.f32 %v297_v7, %v295_v6  ;;  %v1022_v6 = vld [vmem:[#allocation4 + $0x18] sm:$0xff] }
 0x1aa   :  { %v3074_v7 = vpack.c.bf16 %v1022_v6, %v1020_v5 }
 0x1ab   :  { %v303_v10 = vadd.f32 %v301_v9, %v299_v8 }
 0x1ac   :  { %3075 = vmatprep.subr.bf16.mxu0 %v3074_v7  ;;  %v1137_v7 = vld [vmem:[#allocation4 + $0x220] sm:$0xff] }
 0x1ad   :  { %v304_v11 = vmul.f32 0.001953125, %v303_v10 }
 0x1af   :  { %309 = vrot.lane.b32.xlu0 %v304_v11, %s3366_s28  ;;  %306 = vrot.lane.b32.xlu1 %v304_v11, %s3380_s18 }
 0x1b3   :  { %315 = vrot.lane.b32.xlu0 %v304_v11, %s3377_s19  ;;  %312 = vrot.lane.b32.xlu1 %v304_v11, %s3379_s5 }
 0x1b7   :  { %321 = vrot.lane.b32.xlu0 %v304_v11, %s3375_s16  ;;  %318 = vrot.lane.b32.xlu1 %v304_v11, %s3378_s20 }
 0x1bb   :  { %327 = vrot.lane.b32.xlu0 %v304_v11, %s3373_s14  ;;  %324 = vrot.lane.b32.xlu1 %v304_v11, %s3376_s17 }
 0x1bf   :  { %333 = vrot.lane.b32.xlu0 %v304_v11, %s3371_s12  ;;  %330 = vrot.lane.b32.xlu1 %v304_v11, %s3374_s15 }
 0x1c3   :  { %339 = vrot.lane.b32.xlu0 %v304_v11, %s3369_s29  ;;  %336 = vrot.lane.b32.xlu1 %v304_v11, %s3372_s13 }
 0x1c7   :  { %345 = vrot.lane.b32.xlu0 %v304_v11, %s3370_s30  ;;  %342 = vrot.lane.b32.xlu1 %v304_v11, %s3367_s2 }
 0x1cb   :  { %348 = vrot.lane.b32.xlu1 %v304_v11, %s3368_s27 }
 0x221   :  { %v310_v12 = vpop.permute.xlu0 %309  ;;  %v307_v13 = vpop.permute.xlu1 %306 }
 0x222   :  { %v352_v14 = vsel %vm351_vm1, %v304_v11, %v307_v13 }
 0x223   :  { %v354_v16 = vsel %vm353_vm2, %v352_v14, %v310_v12 }
 0x225   :  { %v316_v15 = vpop.permute.xlu0 %315  ;;  %v313_v17 = vpop.permute.xlu1 %312 }
 0x226   :  { %v356_v18 = vsel %vm355_vm3, %v354_v16, %v313_v17 }
 0x227   :  { %v358_v20 = vsel %vm357_vm4, %v356_v18, %v316_v15 }
 0x229   :  { %v322_v19 = vpop.permute.xlu0 %321  ;;  %v319_v21 = vpop.permute.xlu1 %318 }
 0x22a   :  { %v360_v22 = vsel %vm359_vm5, %v358_v20, %v319_v21 }
 0x22b   :  { %v362_v24 = vsel %vm361_vm6, %v360_v22, %v322_v19 }
 0x22d   :  { %v328_v23 = vpop.permute.xlu0 %327  ;;  %v325_v25 = vpop.permute.xlu1 %324 }
 0x22e   :  { %v364_v28 = vsel %vm363_vm7, %v362_v24, %v325_v25 }
 0x22f   :  { %v365_v30 = vsel %vm62_vm0, %v364_v28, %v328_v23 }
 0x231   :  { %v334_v29 = vpop.permute.xlu0 %333  ;;  %v331_v33 = vpop.permute.xlu1 %330 }
 0x232   :  { %v367_v34 = vsel %vm4471_vm8, %v365_v30, %v331_v33 }
 0x233   :  { %v369_v37 = vsel %vm368_vm9, %v367_v34, %v334_v29 }
 0x235   :  { %v340_v36 = vpop.permute.xlu0 %339  ;;  %v337_v38 = vpop.permute.xlu1 %336 }
 0x236   :  { %v371_v39 = vsel %vm370_vm10, %v369_v37, %v337_v38 }
 0x237   :  { %v373_v41 = vsel %vm372_vm11, %v371_v39, %v340_v36 }
 0x239   :  { %v343_v42 = vpop.permute.xlu1 %342  ;;  %v346_v43 = vpop.permute.xlu0 %345 }
 0x23a   :  { %v375_v44 = vsel %vm374_vm12, %v373_v41, %v343_v42 }
 0x23b   :  { %v377_v46 = vsel %vm376_vm13, %v375_v44, %v346_v43  ;;  %v1019_v44 = vld [vmem:[#allocation4] sm:$0xff] }
 0x23d   :  { %v349_v47 = vpop.permute.xlu1 %348 }
 0x23e   :  { %v379_v48 = vsel %vm4470_vm14, %v377_v46, %v349_v47  ;;  %v1021_v46 = vld [vmem:[#allocation4 + $0x10] sm:$0xff]  ;;  %vm1103_vm14 = vcmask 1046528  }
 0x23f   :  { %v383_v49 = vrot.slane %v379_v48, %v3574_v45  ;;  %v3076_v48 = vpack.c.bf16 %v1021_v46, %v1019_v44  ;;  %v1039_v46 = vld [vmem:[#allocation4 + $0xa0] sm:$0xff] }
 0x241   :  { %v3580_v50 = vsub.f32 %v3517_v27, %v383_v49  ;;  %v3583_v51 = vsub.f32 %v3515_v26, %v383_v49  ;;  %v3586_v52 = vsub.f32 %v3523_v32, %v383_v49  ;;  %v3589_v53 = vsub.f32 %v3521_v31, %v383_v49  ;;  %3077 = vmatpush1.bf16.msra.mxu0 %v3076_v48  ;;  %v1152_v48 = vld [vmem:[#allocation4 + $0x298] sm:$0xff] }
 0x243   :  { %v388_v54 = vmul.f32 %v3580_v50, %v3580_v50  ;;  %v389_v55 = vmul.f32 %v3583_v51, %v3583_v51  ;;  %v397_v56 = vmul.f32 %v3586_v52, %v3586_v52  ;;  %v398_v27 = vmul.f32 %v3589_v53, %v3589_v53 }
 0x245   :  { %v390_v26 = vadd.f32 %v389_v55, %v388_v54  ;;  %v399_v57 = vadd.f32 %v398_v27, %v397_v56  ;;  %v1024_v54 = vld [vmem:[#allocation4 + $0x28] sm:$0xff]  ;;  %v1026_v55 = vld [vmem:[#allocation4 + $0x38] sm:$0xff] }
 0x246   :  { %v1134_v56 = vld [vmem:[#allocation4 + $0x208] sm:$0xff]  ;;  %v3078_v27 = vpack.c.bf16 %v1026_v55, %v1024_v54  ;;  %v1149_v55 = vld [vmem:[#allocation4 + $0x280] sm:$0xff] }
 0x247   :  { %v391_v58 = vrot.slane %v390_v26, 4  ;;  %v400_v32 = vrot.slane %v399_v57, 4 }
 0x248   :  { %3079 = vmatprep.subr.bf16.mxu0 %v3078_v27 }
 0x249   :  { %v392_v59 = vadd.f32 %v391_v58, %v390_v26  ;;  %v401_v60 = vadd.f32 %v400_v32, %v399_v57  ;;  %v1023_v26 = vld [vmem:[#allocation4 + $0x20] sm:$0xff]  ;;  %v1025_v57 = vld [vmem:[#allocation4 + $0x30] sm:$0xff]  ;;  %v1136_v58 = vld [vmem:[#allocation4 + $0x218] sm:$0xff] }
 0x24a   :  { %v3080_v32 = vpack.c.bf16 %v1025_v57, %v1023_v26  ;;  %v1044_v26 = vld [vmem:[#allocation4 + $0xc8] sm:$0xff]  ;;  %v1046_v57 = vld [vmem:[#allocation4 + $0xd8] sm:$0xff] }
 0x24b   :  { %v393_v31 = vrot.slane %v392_v59, 2  ;;  %v402_v61 = vrot.slane %v401_v60, 2 }
 0x24c   :  { %3081 = vmatpush1.bf16.msra.mxu0 %v3080_v32  ;;  %v3098_v32 = vpack.c.bf16 %v1046_v57, %v1044_v26  ;;  %v1169_v57 = vld [vmem:[#allocation4 + $0x320] sm:$0xff] }
 0x24d   :  { %v394_v62 = vadd.f32 %v393_v31, %v392_v59  ;;  %v403_v63 = vadd.f32 %v402_v61, %v401_v60  ;;  %v3010_v59 = vpack.c.bf16 %v1136_v58, %v1134_v56  ;;  %v1133_v60 = vld [vmem:[#allocation4 + $0x200] sm:$0xff]  ;;  %v1135_v31 = vld [vmem:[#allocation4 + $0x210] sm:$0xff]  ;;  %v1154_v58 = vld [vmem:[#allocation4 + $0x2a8] sm:$0xff] }
 0x24e   :  { %v3012_v61 = vpack.c.bf16 %v1135_v31, %v1133_v60  ;;  %v1151_v56 = vld [vmem:[#allocation4 + $0x290] sm:$0xff]  ;;  %v1156_v31 = vld [vmem:[#allocation4 + $0x2b8] sm:$0xff] }
 0x24f   :  { %v395_v0 = vrot.slane %v394_v62, 1  ;;  %v404_v1 = vrot.slane %v403_v63, 1  ;;  %3011 = vmatprep.subr.bf16.mxu1 %v3010_v59  ;;  %v3028_v27 = vpack.c.bf16 %v1151_v56, %v1149_v55  ;;  %v1043_v59 = vld [vmem:[#allocation4 + $0xc0] sm:$0xff]  ;;  %v1045_v60 = vld [vmem:[#allocation4 + $0xd0] sm:$0xff]  ;;  %v1172_v56 = vld [vmem:[#allocation4 + $0x338] sm:$0xff] }
 0x250   :  { %3013 = vmatpush1.bf16.msra.mxu1 %v3012_v61  ;;  %v3100_v61 = vpack.c.bf16 %v1045_v60, %v1043_v59  ;;  %v1061_v55 = vld [vmem:[#allocation4 + $0x150] sm:$0xff]  ;;  %v1064_v59 = vld [vmem:[#allocation4 + $0x168] sm:$0xff]  ;;  %v1066_v60 = vld [vmem:[#allocation4 + $0x178] sm:$0xff] }
 0x251   :  { %v396_v2 = vadd.f32 %v395_v0, %v394_v62  ;;  %v405_v3 = vadd.f32 %v404_v1, %v403_v63  ;;  %v1028_v62 = vld [vmem:[#allocation4 + $0x48] sm:$0xff]  ;;  %v1030_v63 = vld [vmem:[#allocation4 + $0x58] sm:$0xff] }
 0x252   :  { %v1138_v0 = vld [vmem:[#allocation4 + $0x228] sm:$0xff]  ;;  %v3082_v1 = vpack.c.bf16 %v1030_v63, %v1028_v62  ;;  %v3030_v62 = vpack.c.bf16 %v1156_v31, %v1154_v58  ;;  %v1153_v63 = vld [vmem:[#allocation4 + $0x2a0] sm:$0xff]  ;;  %v1171_v58 = vld [vmem:[#allocation4 + $0x330] sm:$0xff] }
 0x253   :  { %v406_v4 = vadd.f32 %v405_v3, %v396_v2  ;;  %v1027_v2 = vld [vmem:[#allocation4 + $0x40] sm:$0xff]  ;;  %v1029_v3 = vld [vmem:[#allocation4 + $0x50] sm:$0xff]  ;;  %v1174_v31 = vld [vmem:[#allocation4 + $0x348] sm:$0xff] }
 0x254   :  { %v3084_v5 = vpack.c.bf16 %v1029_v3, %v1027_v2  ;;  %3083 = vmatprep.subr.bf16.mxu0 %v3082_v1  ;;  %v1048_v2 = vld [vmem:[#allocation4 + $0xe8] sm:$0xff]  ;;  %v1050_v3 = vld [vmem:[#allocation4 + $0xf8] sm:$0xff] }
 0x255   :  { %412 = vrot.lane.b32.xlu1 %v406_v4, %s3370_s30  ;;  %408 = vrot.lane.b32.xlu0 %v406_v4, %s3368_s27 }
 0x256   :  { %3085 = vmatpush1.bf16.msra.mxu0 %v3084_v5  ;;  %v1158_v5 = vld [vmem:[#allocation4 + $0x2c8] sm:$0xff] }
 0x259   :  { %420 = vrot.lane.b32.xlu1 %v406_v4, %s3369_s29  ;;  %416 = vrot.lane.b32.xlu0 %v406_v4, %s3367_s2 }
 0x25d   :  { %428 = vrot.lane.b32.xlu1 %v406_v4, %s3371_s12  ;;  %424 = vrot.lane.b32.xlu0 %v406_v4, %s3372_s13 }
 0x261   :  { %436 = vrot.lane.b32.xlu1 %v406_v4, %s3373_s14  ;;  %432 = vrot.lane.b32.xlu0 %v406_v4, %s3374_s15 }
 0x265   :  { %444 = vrot.lane.b32.xlu1 %v406_v4, %s3375_s16  ;;  %440 = vrot.lane.b32.xlu0 %v406_v4, %s3376_s17 }
 0x269   :  { %452 = vrot.lane.b32.xlu1 %v406_v4, %s3377_s19  ;;  %448 = vrot.lane.b32.xlu0 %v406_v4, %s3378_s20 }
 0x26d   :  { %460 = vrot.lane.b32.xlu1 %v406_v4, %s3366_s28  ;;  %456 = vrot.lane.b32.xlu0 %v406_v4, %s3379_s5 }
 0x271   :  { %464 = vrot.lane.b32.xlu0 %v406_v4, %s3380_s18 }
 0x2c7   :  { %v413_v8 = vpop.permute.xlu1 %412  ;;  %v409_v9 = vpop.permute.xlu0 %408 }
 0x2c8   :  { %v411_v10 = vadd.f32 %v409_v9, %v406_v4  ;;  %v1140_v4 = vld [vmem:[#allocation4 + $0x238] sm:$0xff] }
 0x2c9   :  { %v3014_v6 = vpack.c.bf16 %v1140_v4, %v1138_v0  ;;  %v1155_v0 = vld [vmem:[#allocation4 + $0x2b0] sm:$0xff]  ;;  %v3102_v4 = vpack.c.bf16 %v1050_v3, %v1048_v2  ;;  %v1173_v3 = vld [vmem:[#allocation4 + $0x340] sm:$0xff] }
 0x2ca   :  { %v415_v11 = vadd.f32 %v413_v8, %v411_v10  ;;  %v1139_v8 = vld [vmem:[#allocation4 + $0x230] sm:$0xff]  ;;  %v1032_v10 = vld [vmem:[#allocation4 + $0x68] sm:$0xff]  ;;  %v3032_v1 = vpack.c.bf16 %v1155_v0, %v1153_v63  ;;  %v1176_v0 = vld [vmem:[#allocation4 + $0x358] sm:$0xff] }
 0x2cb   :  { %v421_v12 = vpop.permute.xlu1 %420  ;;  %v417_v13 = vpop.permute.xlu0 %416  ;;  %v3016_v9 = vpack.c.bf16 %v1139_v8, %v1137_v7  ;;  %3015 = vmatprep.subr.bf16.mxu1 %v3014_v6  ;;  %v1160_v6 = vld [vmem:[#allocation4 + $0x2d8] sm:$0xff]  ;;  %v1047_v7 = vld [vmem:[#allocation4 + $0xe0] sm:$0xff]  ;;  %v1049_v8 = vld [vmem:[#allocation4 + $0xf0] sm:$0xff]  ;;  %v3050_v2 = vpack.c.bf16 %v1176_v0, %v1174_v31 }
 0x2cc   :  { %v419_v14 = vadd.f32 %v417_v13, %v415_v11  ;;  %v1034_v11 = vld [vmem:[#allocation4 + $0x78] sm:$0xff]  ;;  %v1065_v63 = vld [vmem:[#allocation4 + $0x170] sm:$0xff]  ;;  %v1422_v0 = vld [vmem:[#allocation4 + $0x408] sm:$0xff] }
 0x2cd   :  { %3017 = vmatpush1.bf16.msra.mxu1 %v3016_v9  ;;  %v3086_v13 = vpack.c.bf16 %v1034_v11, %v1032_v10  ;;  %v3034_v9 = vpack.c.bf16 %v1160_v6, %v1158_v5  ;;  %v1157_v10 = vld [vmem:[#allocation4 + $0x2c0] sm:$0xff]  ;;  %v3104_v11 = vpack.c.bf16 %v1049_v8, %v1047_v7  ;;  %v1068_v6 = vld [vmem:[#allocation4 + $0x188] sm:$0xff]  ;;  %v1070_v7 = vld [vmem:[#allocation4 + $0x198] sm:$0xff] }
 0x2ce   :  { %v423_v15 = vadd.f32 %v421_v12, %v419_v14  ;;  %v1142_v12 = vld [vmem:[#allocation4 + $0x248] sm:$0xff]  ;;  %v1031_v14 = vld [vmem:[#allocation4 + $0x60] sm:$0xff] }
 0x2cf   :  { %v429_v16 = vpop.permute.xlu1 %428  ;;  %v425_v17 = vpop.permute.xlu0 %424  ;;  %3087 = vmatprep.subr.bf16.mxu0 %v3086_v13  ;;  %v1178_v8 = vld [vmem:[#allocation4 + $0x368] sm:$0xff] }
 0x2d0   :  { %v427_v18 = vadd.f32 %v425_v17, %v423_v15  ;;  %v1033_v15 = vld [vmem:[#allocation4 + $0x70] sm:$0xff] }
 0x2d1   :  { %v3088_v17 = vpack.c.bf16 %v1033_v15, %v1031_v14  ;;  %v1052_v14 = vld [vmem:[#allocation4 + $0x108] sm:$0xff]  ;;  %v1054_v15 = vld [vmem:[#allocation4 + $0x118] sm:$0xff] }
 0x2d2   :  { %v431_v19 = vadd.f32 %v429_v16, %v427_v18  ;;  %v1144_v16 = vld [vmem:[#allocation4 + $0x258] sm:$0xff] }
 0x2d3   :  { %v437_v20 = vpop.permute.xlu1 %436  ;;  %v433_v21 = vpop.permute.xlu0 %432  ;;  %v3018_v18 = vpack.c.bf16 %v1144_v16, %v1142_v12  ;;  %3089 = vmatpush1.bf16.msra.mxu0 %v3088_v17  ;;  %v1159_v12 = vld [vmem:[#allocation4 + $0x2d0] sm:$0xff]  ;;  %v1162_v16 = vld [vmem:[#allocation4 + $0x2e8] sm:$0xff]  ;;  %v3106_v17 = vpack.c.bf16 %v1054_v15, %v1052_v14  ;;  %v1177_v15 = vld [vmem:[#allocation4 + $0x360] sm:$0xff] }
 0x2d4   :  { %v435_v22 = vadd.f32 %v433_v21, %v431_v19  ;;  %v1141_v19 = vld [vmem:[#allocation4 + $0x240] sm:$0xff]  ;;  %v3036_v13 = vpack.c.bf16 %v1159_v12, %v1157_v10  ;;  %v1180_v12 = vld [vmem:[#allocation4 + $0x378] sm:$0xff] }
 0x2d5   :  { %3019 = vmatprep.subr.bf16.mxu1 %v3018_v18  ;;  %v1051_v18 = vld [vmem:[#allocation4 + $0x100] sm:$0xff]  ;;  %v3054_v14 = vpack.c.bf16 %v1180_v12, %v1178_v8  ;;  %v987_v8 = vld [vmem:[%s4459_s1 + $0x10] sm:$0xff] }
 0x2d6   :  { %v439_v23 = vadd.f32 %v437_v20, %v435_v22  ;;  %v1143_v20 = vld [vmem:[#allocation4 + $0x250] sm:$0xff]  ;;  %v1067_v10 = vld [vmem:[#allocation4 + $0x180] sm:$0xff] }
 0x2d7   :  { %v445_v24 = vpop.permute.xlu1 %444  ;;  %v441_v25 = vpop.permute.xlu0 %440  ;;  %v3020_v21 = vpack.c.bf16 %v1143_v20, %v1141_v19  ;;  %v1053_v19 = vld [vmem:[#allocation4 + $0x110] sm:$0xff]  ;;  %v1164_v20 = vld [vmem:[#allocation4 + $0x2f8] sm:$0xff] }
 0x2d8   :  { %v443_v28 = vadd.f32 %v441_v25, %v439_v23  ;;  %v1036_v23 = vld [vmem:[#allocation4 + $0x88] sm:$0xff]  ;;  %v1195_v12 = vld [vmem:[#allocation4 + $0x3f0] sm:$0xff] }
 0x2d9   :  { %v1146_v25 = vld [vmem:[#allocation4 + $0x268] sm:$0xff]  ;;  %3021 = vmatpush1.bf16.msra.mxu1 %v3020_v21  ;;  %v3108_v21 = vpack.c.bf16 %v1053_v19, %v1051_v18  ;;  %v1074_v19 = vld [vmem:[#allocation4 + $0x1b8] sm:$0xff] }
 0x2da   :  { %v447_v29 = vadd.f32 %v445_v24, %v443_v28  ;;  %v1038_v24 = vld [vmem:[#allocation4 + $0x98] sm:$0xff]  ;;  %v1072_v18 = vld [vmem:[#allocation4 + $0x1a8] sm:$0xff] }
 0x2db   :  { %v453_v30 = vpop.permute.xlu1 %452  ;;  %v449_v33 = vpop.permute.xlu0 %448  ;;  %v3090_v28 = vpack.c.bf16 %v1038_v24, %v1036_v23  ;;  %v3038_v23 = vpack.c.bf16 %v1164_v20, %v1162_v16  ;;  %v1161_v24 = vld [vmem:[#allocation4 + $0x2e0] sm:$0xff]  ;;  %v1179_v16 = vld [vmem:[#allocation4 + $0x370] sm:$0xff]  ;;  %v1182_v20 = vld [vmem:[#allocation4 + $0x388] sm:$0xff] }
 0x2dc   :  { %v451_v34 = vadd.f32 %v449_v33, %v447_v29  ;;  %v1035_v29 = vld [vmem:[#allocation4 + $0x80] sm:$0xff]  ;;  %v1148_v33 = vld [vmem:[#allocation4 + $0x278] sm:$0xff] }
 0x2dd   :  { %3091 = vmatprep.subr.bf16.mxu0 %v3090_v28 }
 0x2de   :  { %v455_v36 = vadd.f32 %v453_v30, %v451_v34  ;;  %v1037_v30 = vld [vmem:[#allocation4 + $0x90] sm:$0xff] }
 0x2df   :  { %v457_v37 = vpop.permute.xlu0 %456  ;;  %v461_v39 = vpop.permute.xlu1 %460  ;;  %v3092_v34 = vpack.c.bf16 %v1037_v30, %v1035_v29  ;;  %v1056_v29 = vld [vmem:[#allocation4 + $0x128] sm:$0xff]  ;;  %v1058_v30 = vld [vmem:[#allocation4 + $0x138] sm:$0xff] }
 0x2e0   :  { %v459_v38 = vadd.f32 %v457_v37, %v455_v36  ;;  %v3022_v36 = vpack.c.bf16 %v1148_v33, %v1146_v25  ;;  %v1145_v37 = vld [vmem:[#allocation4 + $0x260] sm:$0xff]  ;;  %v1163_v25 = vld [vmem:[#allocation4 + $0x2f0] sm:$0xff]  ;;  %v1166_v33 = vld [vmem:[#allocation4 + $0x308] sm:$0xff] }
 0x2e1   :  { %3093 = vmatpush1.bf16.msra.mxu0 %v3092_v34  ;;  %v3040_v28 = vpack.c.bf16 %v1163_v25, %v1161_v24  ;;  %v3110_v34 = vpack.c.bf16 %v1058_v30, %v1056_v29  ;;  %v1073_v24 = vld [vmem:[#allocation4 + $0x1b0] sm:$0xff]  ;;  %v1184_v25 = vld [vmem:[#allocation4 + $0x398] sm:$0xff]  ;;  %v1181_v30 = vld [vmem:[#allocation4 + $0x380] sm:$0xff] }
 0x2e2   :  { %v463_v41 = vadd.f32 %v461_v39, %v459_v38  ;;  %v1147_v38 = vld [vmem:[#allocation4 + $0x270] sm:$0xff]  ;;  %3023 = vmatprep.subr.bf16.mxu1 %v3022_v36  ;;  %v1055_v36 = vld [vmem:[#allocation4 + $0x120] sm:$0xff]  ;;  %v3058_v29 = vpack.c.bf16 %v1184_v25, %v1182_v20 }
 0x2e3   :  { %v465_v42 = vpop.permute.xlu0 %464  ;;  %v3024_v39 = vpack.c.bf16 %v1147_v38, %v1145_v37  ;;  %v1057_v37 = vld [vmem:[#allocation4 + $0x130] sm:$0xff]  ;;  %v1168_v38 = vld [vmem:[#allocation4 + $0x318] sm:$0xff] }
 0x2e4   :  { %v467_v43 = vadd.f32 %v465_v42, %v463_v41  ;;  %v1040_v41 = vld [vmem:[#allocation4 + $0xa8] sm:$0xff]  ;;  %v1042_v42 = vld [vmem:[#allocation4 + $0xb8] sm:$0xff] }
 0x2e5   :  { %v3094_v44 = vpack.c.bf16 %v1042_v42, %v1040_v41  ;;  %3025 = vmatpush1.bf16.msra.mxu1 %v3024_v39  ;;  %v3112_v39 = vpack.c.bf16 %v1057_v37, %v1055_v36  ;;  %v3042_v41 = vpack.c.bf16 %v1168_v38, %v1166_v33  ;;  %v1165_v42 = vld [vmem:[#allocation4 + $0x300] sm:$0xff]  ;;  %v1183_v33 = vld [vmem:[#allocation4 + $0x390] sm:$0xff]  ;;  %v1076_v36 = vld [vmem:[#allocation4 + $0x1c8] sm:$0xff] }
 0x2e6   :  { %v468_v47 = vmul.f32 0.001953125, %v467_v43  ;;  %v1150_v43 = vld [vmem:[#allocation4 + $0x288] sm:$0xff]  ;;  %v1078_v37 = vld [vmem:[#allocation4 + $0x1d8] sm:$0xff] }
 0x2e7   :  { %v3026_v54 = vpack.c.bf16 %v1152_v48, %v1150_v43  ;;  %3095 = vmatprep.subr.bf16.mxu0 %v3094_v44  ;;  %v1167_v43 = vld [vmem:[#allocation4 + $0x310] sm:$0xff]  ;;  %v1170_v48 = vld [vmem:[#allocation4 + $0x328] sm:$0xff] }
 0x2e8   :  { %v470_v49 = vadd.f32 1e-05, %v468_v47  ;;  %v1041_v47 = vld [vmem:[#allocation4 + $0xb0] sm:$0xff]  ;;  %v3044_v44 = vpack.c.bf16 %v1167_v43, %v1165_v42  ;;  %v3046_v26 = vpack.c.bf16 %v1172_v56, %v1170_v48  ;;  %v1186_v38 = vld [vmem:[#allocation4 + $0x3a8] sm:$0xff]  ;;  %v1188_v43 = vld [vmem:[#allocation4 + $0x3b8] sm:$0xff] }
 0x2e9   :  { %3027 = vmatprep.subr.bf16.mxu1 %v3026_v54  ;;  %v1059_v54 = vld [vmem:[#allocation4 + $0x140] sm:$0xff]  ;;  %v1077_v42 = vld [vmem:[#allocation4 + $0x1d0] sm:$0xff]  ;;  %v1080_v56 = vld [vmem:[#allocation4 + $0x1e8] sm:$0xff] }
 0x2ea   :  { %3334 = vrsqrt.f32 %v470_v49  ;;  %v3096_v49 = vpack.c.bf16 %v1041_v47, %v1039_v46  ;;  %3029 = vmatpush1.bf16.msra.mxu1 %v3028_v27  ;;  %v1060_v46 = vld [vmem:[#allocation4 + $0x148] sm:$0xff]  ;;  %v1062_v47 = vld [vmem:[#allocation4 + $0x158] sm:$0xff]  ;;  %v3116_v27 = vpack.c.bf16 %v1061_v55, %v1059_v54  ;;  %v1187_v48 = vld [vmem:[#allocation4 + $0x3b0] sm:$0xff] }
 0x2eb   :  { %3031 = vmatprep.subr.bf16.mxu1 %v3030_v62  ;;  %v1063_v62 = vld [vmem:[#allocation4 + $0x160] sm:$0xff] }
 0x2ec   :  { %3097 = vmatpush1.bf16.msra.mxu0 %v3096_v49  ;;  %v3114_v49 = vpack.c.bf16 %v1062_v47, %v1060_v46  ;;  %v3062_v46 = vpack.c.bf16 %v1188_v43, %v1186_v38  ;;  %v1185_v47 = vld [vmem:[#allocation4 + $0x3a0] sm:$0xff] }
 0x2ed   :  { %3099 = vmatprep.subr.bf16.mxu0 %v3098_v32  ;;  %v3048_v32 = vpack.c.bf16 %v1171_v58, %v1169_v57  ;;  %v985_v54 = vld [vmem:[%s4459_s1] sm:$0xff]  ;;  %v3064_v55 = vpack.c.bf16 %v1187_v48, %v1185_v47  ;;  %v3381_v57 = vmov 0.0  }
 0x2ee   :  { %3033 = vmatpush1.bf16.msra.mxu1 %v3032_v1  ;;  %v3120_v1 = vpack.c.bf16 %v1065_v63, %v1063_v62  ;;  %872 = vst.msk [vmem:[#allocation2] ss:$8 sm:$0x3] %vm3647_vm15, %v3381_v57  ;;  %v993_v58 = vrot.slane %v985_v54, 7  ;;  %v1189_v62 = vld [vmem:[#allocation4 + $0x3c0] sm:$0xff]  ;;  %v1191_v63 = vld [vmem:[#allocation4 + $0x3d0] sm:$0xff] }
 0x2ef   :  { %3035 = vmatprep.subr.bf16.mxu1 %v3034_v9  ;;  %v3122_v9 = vpack.c.bf16 %v1070_v7, %v1068_v6  ;;  %875 = vst.msk [vmem:[#allocation2 + $0x30] ss:$8 sm:$0x3] %vm3647_vm15, %v3381_v57  ;;  %878 = vst.msk [vmem:[#allocation2 + $0x21] ss:$8 sm:$0x3] %vm3647_vm15, %v3381_v57 }
 0x2f0   :  { %3101 = vmatpush1.bf16.msra.mxu0 %v3100_v61  ;;  %v3118_v61 = vpack.c.bf16 %v1066_v60, %v1064_v59  ;;  %881 = vst.msk [vmem:[#allocation2 + $0x51] ss:$8 sm:$0x3] %vm3647_vm15, %v3381_v57  ;;  %1884 = vst.msk [vmem:[#allocation3] ss:$8 sm:$0x3] %vm3647_vm15, %v3381_v57 }
 0x2f1   :  { %3103 = vmatprep.subr.bf16.mxu0 %v3102_v4  ;;  %v1175_v4 = vld [vmem:[#allocation4 + $0x350] sm:$0xff]  ;;  %1887 = vst.msk [vmem:[#allocation3 + $0x30] ss:$8 sm:$0x3] %vm3647_vm15, %v3381_v57  ;;  %v1190_v59 = vld [vmem:[#allocation4 + $0x3c8] sm:$0xff]  ;;  %v1192_v60 = vld [vmem:[#allocation4 + $0x3d8] sm:$0xff] }
 0x2f2   :  { %3037 = vmatpush1.bf16.msra.mxu1 %v3036_v13  ;;  %v3052_v5 = vpack.c.bf16 %v1175_v4, %v1173_v3  ;;  %1890 = vst.msk [vmem:[#allocation3 + $0x21] ss:$8 sm:$0x3] %vm3647_vm15, %v3381_v57  ;;  %1893 = vst.msk [vmem:[#allocation3 + $0x51] ss:$8 sm:$0x3] %vm3647_vm15, %v3381_v57 }
 0x2f3   :  { %3039 = vmatprep.subr.bf16.mxu1 %v3038_v23  ;;  %v1071_v23 = vld [vmem:[#allocation4 + $0x1a0] sm:$0xff]  ;;  %1005 = vst [vmem:[#allocation2 + $0x8] sm:$0xfe] %v993_v58  ;;  %v986_v3 = vld [vmem:[%s4459_s1 + $0x8] sm:$0xff]  ;;  %v1196_v7 = vld [vmem:[#allocation4 + $0x3f8] sm:$0xff]  ;;  %vm851_vm15 = vcmask 1040384  }
 0x2f4   :  { %v3614_v22 = vpop.eup %3334  ;;  %3105 = vmatpush1.bf16.msra.mxu0 %v3104_v11  ;;  %v1069_v11 = vld [vmem:[#allocation4 + $0x190] sm:$0xff]  ;;  %v1194_v6 = vld [vmem:[#allocation4 + $0x3e8] sm:$0xff]  ;;  %v3382_v57 = vmov 1966171168  }
 0x2f5   :  { %476 = vrot.lane.b32.xlu0 %v3614_v22, %s3366_s28  ;;  %473 = vrot.lane.b32.xlu1 %v3614_v22, %s3380_s18  ;;  %v3124_v13 = vpack.c.bf16 %v1069_v11, %v1067_v10  ;;  %v1193_v10 = vld [vmem:[#allocation4 + $0x3e0] sm:$0xff]  ;;  %v996_v11 = vrot.slane %v987_v8, 7 }
 0x2f6   :  { %3107 = vmatprep.subr.bf16.mxu0 %v3106_v17  ;;  %3041 = vmatpush1.bf16.msra.mxu1 %v3040_v28  ;;  %v3056_v17 = vpack.c.bf16 %v1179_v16, %v1177_v15  ;;  %v3128_v28 = vpack.c.bf16 %v1073_v24, %v1071_v23 }
 0x2f7   :  { %3043 = vmatprep.subr.bf16.mxu1 %v3042_v41  ;;  %v1075_v41 = vld [vmem:[#allocation4 + $0x1c0] sm:$0xff]  ;;  %1008 = vst [vmem:[#allocation2 + $0x38] sm:$0xfe] %v996_v11 }
 0x2f8   :  { %3109 = vmatpush1.bf16.msra.mxu0 %v3108_v21  ;;  %v3126_v21 = vpack.c.bf16 %v1074_v19, %v1072_v18  ;;  %v988_v18 = vld [vmem:[%s4459_s1 + $0x18] sm:$0xff] }
 0x2f9   :  { %482 = vrot.lane.b32.xlu0 %v3614_v22, %s3377_s19  ;;  %479 = vrot.lane.b32.xlu1 %v3614_v22, %s3379_s5  ;;  %v997_v20 = vrot.slane %v988_v18, 7 }
 0x2fa   :  { %3111 = vmatprep.subr.bf16.mxu0 %v3110_v34  ;;  %3045 = vmatpush1.bf16.msra.mxu1 %v3044_v44  ;;  %v3060_v34 = vpack.c.bf16 %v1183_v33, %v1181_v30  ;;  %v3132_v44 = vpack.c.bf16 %v1077_v42, %v1075_v41  ;;  %v1012_v16 = vld [vmem:[#allocation2 + $0x8] sm:$0xff] }
 0x2fb   :  { %3047 = vmatprep.subr.bf16.mxu1 %v3046_v26  ;;  %v1079_v26 = vld [vmem:[#allocation4 + $0x1e0] sm:$0xff]  ;;  %1350 = vmatprep.mubr.f32.mxu0 %v1012_v16  ;;  %1010 = vst [vmem:[#allocation2 + $0x58] sm:$0x1] %v997_v20  ;;  %v3687_v23 = vsel %vm851_vm15, %v996_v11, %v997_v20 }
 0x2fc   :  { %3113 = vmatpush1.bf16.msra.mxu0 %v3112_v39  ;;  %v3130_v39 = vpack.c.bf16 %v1078_v37, %v1076_v36 }
 0x2fd   :  { %488 = vrot.lane.b32.xlu0 %v3614_v22, %s3375_s16  ;;  %485 = vrot.lane.b32.xlu1 %v3614_v22, %s3378_s20 }
 0x2fe   :  { %3115 = vmatprep.subr.bf16.mxu0 %v3114_v49  ;;  %3049 = vmatpush1.bf16.msra.mxu1 %v3048_v32  ;;  %v1081_v32 = vld [vmem:[#allocation4 + $0x1f0] sm:$0xff] }
 0x2ff   :  { %3051 = vmatprep.subr.bf16.mxu1 %v3050_v2  ;;  %v3136_v31 = vpack.c.bf16 %v1081_v32, %v1079_v26  ;;  %v1424_v2 = vld [vmem:[#allocation4 + $0x418] sm:$0xff] }
 0x300   :  { %3117 = vmatpush1.bf16.msra.mxu0 %v3116_v27  ;;  %v1082_v27 = vld [vmem:[#allocation4 + $0x1f8] sm:$0xff]  ;;  %v3138_v4 = vpack.c.bf16 %v1424_v2, %v1422_v0 }
 0x301   :  { %494 = vrot.lane.b32.xlu0 %v3614_v22, %s3373_s14  ;;  %491 = vrot.lane.b32.xlu1 %v3614_v22, %s3376_s17  ;;  %v3134_v35 = vpack.c.bf16 %v1082_v27, %v1080_v56 }
 0x302   :  { %3119 = vmatprep.subr.bf16.mxu0 %v3118_v61  ;;  %3053 = vmatpush1.bf16.msra.mxu1 %v3052_v5  ;;  %v3066_v61 = vpack.c.bf16 %v1192_v60, %v1190_v59  ;;  %v994_v5 = vrot.slane %v986_v3, 7  ;;  %v469_v59 = vld [vmem:[%s4461_s3] sm:$0x1] }
 0x303   :  { %3055 = vmatprep.subr.bf16.mxu1 %v3054_v14  ;;  %v3072_v14 = vpack.c.bf16 %v1195_v12, %v1193_v10 }
 0x304   :  { %3121 = vmatpush1.bf16.msra.mxu0 %v3120_v1  ;;  %v3068_v1 = vpack.c.bf16 %v1191_v63, %v1189_v62  ;;  %1007 = vst [vmem:[#allocation2 + $0x28] sm:$0x1] %v994_v5  ;;  %v3383_v62 = vmov 1983009808  }
 0x305   :  { %500 = vrot.lane.b32.xlu0 %v3614_v22, %s3371_s12  ;;  %497 = vrot.lane.b32.xlu1 %v3614_v22, %s3374_s15  ;;  %v902_v63 = vunpack.c.l.s4 %v3383_v62 }
 0x306   :  { %3123 = vmatprep.subr.bf16.mxu0 %v3122_v9  ;;  %3057 = vmatpush1.bf16.msra.mxu1 %v3056_v17  ;;  %v3070_v9 = vpack.c.bf16 %v1196_v7, %v1194_v6  ;;  %v1084_v17 = vld [vmem:[#allocation2 + $0x8] sm:$0xfe] }
 0x307   :  { %3059 = vmatprep.subr.bf16.mxu1 %v3058_v29  ;;  %v1107_v19 = vrot.slane %v1084_v17, 1 }
 0x308   :  { %3125 = vmatpush1.bf16.msra.mxu0 %v3124_v13  ;;  %v3677_v13 = vsel %vm851_vm15, %v993_v58, %v994_v5  ;;  %v559_v58 = vunpack.c.l.s4 %v3382_v57  ;;  %v903_v5 = vunpack.c.0.s8 %v902_v63 }
 0x309   :  { %506 = vrot.lane.b32.xlu0 %v3614_v22, %s3369_s29  ;;  %503 = vrot.lane.b32.xlu1 %v3614_v22, %s3372_s13  ;;  %v1108_v15 = vrot.slane %v3677_v13, 1 }
 0x30a   :  { %3127 = vmatprep.subr.bf16.mxu0 %v3126_v21  ;;  %3061 = vmatpush1.bf16.msra.mxu1 %v3060_v34  ;;  %v3720_v16 = vsub.s32 %v903_v5, %v3569_v40 }
 0x30b   :  { %3063 = vmatprep.subr.bf16.mxu1 %v3062_v46  ;;  %v1109_v21 = vsel %vm1103_vm14, %v1107_v19, %v1108_v15 }
 0x30c   :  { %3129 = vmatpush1.bf16.msra.mxu0 %v3128_v28  ;;  %1261 = vmatprep.mubr.f32.mxu1 %v1109_v21 }
 0x30d   :  { %512 = vrot.lane.b32.xlu0 %v3614_v22, %s3370_s30  ;;  %509 = vrot.lane.b32.xlu1 %v3614_v22, %s3367_s2 }
 0x30e   :  { %3131 = vmatprep.subr.bf16.mxu0 %v3130_v39  ;;  %3065 = vmatpush1.bf16.msra.mxu1 %v3064_v55 }
 0x30f   :  { %3067 = vmatprep.subr.bf16.mxu1 %v3066_v61  ;;  %v560_v61 = vunpack.c.0.s8 %v559_v58 }
 0x310   :  { %3133 = vmatpush1.bf16.msra.mxu0 %v3132_v44 }
 0x311   :  { %515 = vrot.lane.b32.xlu1 %v3614_v22, %s3368_s27  ;;  %3135 = vmatprep.subr.bf16.mxu0 %v3134_v35  ;;  %v3710_v3 = vsub.s32 %v560_v61, %v3569_v40 }
 0x312   :  { %3069 = vmatpush1.bf16.msra.mxu1 %v3068_v1 }
 0x313   :  { %3071 = vmatprep.subr.bf16.mxu1 %v3070_v9 }
 0x314   :  { %3137 = vmatpush1.bf16.msra.mxu0 %v3136_v31 }
 0x315   :  { %3139 = vmatprep.subr.bf16.mxu0 %v3138_v4  ;;  %v2722_v4 = vld [vmem:[%s4462_s4] ss:$0 sm:$0xff] }
 0x316   :  { %3073 = vmatpush1.bf16.msra.mxu1 %v3072_v14 }
 0x367   :  { %v477_v24 = vpop.permute.xlu0 %476  ;;  %v474_v25 = vpop.permute.xlu1 %473 }
 0x368   :  { %v518_v28 = vsel %vm351_vm1, %v3614_v22, %v474_v25 }
 0x369   :  { %v519_v30 = vsel %vm353_vm2, %v518_v28, %v477_v24 }
 0x36b   :  { %v483_v29 = vpop.permute.xlu0 %482  ;;  %v480_v33 = vpop.permute.xlu1 %479 }
 0x36c   :  { %v520_v34 = vsel %vm355_vm3, %v519_v30, %v480_v33 }
 0x36d   :  { %v521_v37 = vsel %vm357_vm4, %v520_v34, %v483_v29 }
 0x36f   :  { %v489_v36 = vpop.permute.xlu0 %488  ;;  %v486_v38 = vpop.permute.xlu1 %485 }
 0x370   :  { %v522_v39 = vsel %vm359_vm5, %v521_v37, %v486_v38 }
 0x371   :  { %v523_v42 = vsel %vm361_vm6, %v522_v39, %v489_v36 }
 0x373   :  { %v495_v41 = vpop.permute.xlu0 %494  ;;  %v492_v43 = vpop.permute.xlu1 %491 }
 0x374   :  { %v524_v44 = vsel %vm363_vm7, %v523_v42, %v492_v43 }
 0x375   :  { %v525_v22 = vsel %vm62_vm0, %v524_v44, %v495_v41 }
 0x377   :  { %v501_v46 = vpop.permute.xlu0 %500  ;;  %v498_v47 = vpop.permute.xlu1 %497 }
 0x378   :  { %v526_v48 = vsel %vm4471_vm8, %v525_v22, %v498_v47  ;;  %vm4474_vm8 = vcmask 982016  }
 0x379   :  { %v527_v54 = vsel %vm368_vm9, %v526_v48, %v501_v46 }
 0x37b   :  { %v507_v49 = vpop.permute.xlu0 %506  ;;  %v504_v55 = vpop.permute.xlu1 %503 }
 0x37c   :  { %v528_v56 = vsel %vm370_vm10, %v527_v54, %v504_v55 }
 0x37d   :  { %v529_v27 = vsel %vm372_vm11, %v528_v56, %v507_v49 }
 0x37f   :  { %v510_v26 = vpop.permute.xlu1 %509  ;;  %v513_v35 = vpop.permute.xlu0 %512 }
 0x380   :  { %v530_v32 = vsel %vm374_vm12, %v529_v27, %v510_v26 }
 0x381   :  { %v531_v60 = vsel %vm376_vm13, %v530_v32, %v513_v35 }
 0x383   :  { %v516_v31 = vpop.permute.xlu1 %515 }
 0x384   :  { %v532_v0 = vsel %vm4474_vm8, %v531_v60, %v516_v31  ;;  %vm1391_vm8 = vcmask 1045504  }
 0x385   :  { %v533_v1 = vmul.f32 %v532_v0, %v469_v59 }
 0x387   :  { %v538_v2 = vrot.slane %v533_v1, %v3574_v45 }
 0x389   :  { %v540_v6 = vmul.f32 %v538_v2, %v3580_v50  ;;  %v541_v7 = vmul.f32 %v538_v2, %v3583_v51  ;;  %v551_v8 = vmul.f32 %v538_v2, %v3586_v52  ;;  %v552_v9 = vmul.f32 %v538_v2, %v3589_v53 }
 0x38b   :  { %v549_v10 = vadd.f32 %v2722_v4, %v540_v6  ;;  %v550_v11 = vadd.f32 %v2722_v4, %v541_v7  ;;  %v553_v12 = vadd.f32 %v2722_v4, %v551_v8  ;;  %v554_v14 = vadd.f32 %v2722_v4, %v552_v9 }
 0x38d   :  { %v557_v17 = vcombine.high %v549_v10, %v549_v10  ;;  %v564_v18 = vrot.slane %v549_v10, %v3710_v3  ;;  %v606_v19 = vcombine.high %v550_v11, %v550_v11  ;;  %v613_v20 = vrot.slane %v550_v11, %v3710_v3 }
 0x38e   :  { %v673_v50 = vcombine.high %v553_v12, %v553_v12  ;;  %v680_v51 = vrot.slane %v553_v12, %v3710_v3  ;;  %v722_v21 = vcombine.high %v554_v14, %v554_v14  ;;  %v729_v52 = vrot.slane %v554_v14, %v3710_v3 }
 0x38f   :  { %v571_v53 = vrot.slane %v557_v17, %v3710_v3  ;;  %v572_v24 = vcombine.high %v564_v18, %v564_v18  ;;  %v580_v25 = vrot.slane %v564_v18, %v3710_v3  ;;  %v620_v28 = vrot.slane %v606_v19, %v3710_v3 }
 0x390   :  { %v621_v29 = vcombine.high %v613_v20, %v613_v20  ;;  %v3730_v30 = vrot.slane %v613_v20, %v3710_v3  ;;  %v687_v33 = vrot.slane %v673_v50, %v3710_v3  ;;  %v688_v34 = vcombine.high %v680_v51, %v680_v51 }
 0x391   :  { %v573_v36 = vcombine.high %v571_v53, %v571_v53  ;;  %v587_v37 = vrot.slane %v571_v53, %v3710_v3  ;;  %v594_v38 = vrot.slane %v572_v24, %v3710_v3  ;;  %v602_v39 = vcombine.high %v580_v25, %v580_v25 }
 0x392   :  { %v622_v41 = vcombine.high %v620_v28, %v620_v28  ;;  %v3736_v42 = vrot.slane %v620_v28, %v3710_v3  ;;  %v643_v43 = vrot.slane %v621_v29, %v3710_v3  ;;  %v651_v44 = vcombine.high %v3730_v30, %v3730_v30 }
 0x393   :  { %v601_v46 = vrot.slane %v573_v36, %v3710_v3  ;;  %v603_v22 = vcombine.high %v587_v37, %v587_v37  ;;  %v604_v47 = vcombine.high %v594_v38, %v594_v38  ;;  %v689_v48 = vcombine.high %v687_v33, %v687_v33 }
 0x394   :  { %v650_v49 = vrot.slane %v622_v41, %v3710_v3  ;;  %v652_v54 = vcombine.high %v3736_v42, %v3736_v42  ;;  %v653_v55 = vcombine.high %v643_v43, %v643_v43  ;;  %v696_v56 = vrot.slane %v680_v51, %v3710_v3 }
 0x395   :  { %v605_v27 = vcombine.high %v601_v46, %v601_v46  ;;  %v703_v26 = vrot.slane %v687_v33, %v3710_v3  ;;  %v710_v57 = vrot.slane %v688_v34, %v3710_v3  ;;  %v717_v58 = vrot.slane %v689_v48, %v3710_v3 }
 0x396   :  { %v654_v35 = vcombine.high %v650_v49, %v650_v49  ;;  %v718_v32 = vcombine.high %v696_v56, %v696_v56  ;;  %v736_v59 = vrot.slane %v722_v21, %v3710_v3  ;;  %v737_v60 = vcombine.high %v729_v52, %v729_v52 }
 0x397   :  { %v719_v31 = vcombine.high %v703_v26, %v703_v26  ;;  %v720_v61 = vcombine.high %v710_v57, %v710_v57  ;;  %v721_v62 = vcombine.high %v717_v58, %v717_v58  ;;  %v745_v63 = vrot.slane %v729_v52, %v3710_v3 }
 0x398   :  { %v738_v0 = vcombine.high %v736_v59, %v736_v59  ;;  %v752_v1 = vrot.slane %v736_v59, %v3710_v3  ;;  %v759_v2 = vrot.slane %v737_v60, %v3710_v3  ;;  %v774_v4 = vrot.slane %v696_v56, %v3574_v45 }
 0x399   :  { %v767_v5 = vcombine.high %v745_v63, %v745_v63  ;;  %v778_v6 = vrot.slane %v710_v57, %v3574_v45  ;;  %v782_v7 = vrot.slane %v718_v32, %v3574_v45  ;;  %v786_v8 = vrot.slane %v720_v61, %v3574_v45 }
 0x39a   :  { %v766_v9 = vrot.slane %v738_v0, %v3710_v3  ;;  %v768_v10 = vcombine.high %v752_v1, %v752_v1  ;;  %v769_v11 = vcombine.high %v759_v2, %v759_v2  ;;  %v790_v12 = vrot.slane %v703_v26, %v3574_v45 }
 0x39b   :  { %v794_v14 = vrot.slane %v717_v58, %v3574_v45  ;;  %v798_v17 = vrot.slane %v719_v31, %v3574_v45  ;;  %v802_v18 = vrot.slane %v721_v62, %v3574_v45  ;;  %v806_v19 = vrot.slane %v745_v63, %v3574_v45 }
 0x39c   :  { %v770_v20 = vcombine.high %v766_v9, %v766_v9  ;;  %v810_v50 = vrot.slane %v759_v2, %v3574_v45  ;;  %v814_v51 = vrot.slane %v767_v5, %v3574_v45  ;;  %v818_v21 = vrot.slane %v769_v11, %v3574_v45  ;;  %v1086_v11 = vld [vmem:[#allocation2 + $0x28] sm:$0x1] }
 0x39d   :  { %v822_v52 = vrot.slane %v752_v1, %v3574_v45  ;;  %v826_v53 = vrot.slane %v766_v9, %v3574_v45  ;;  %v830_v24 = vrot.slane %v768_v10, %v3574_v45  ;;  %v852_v28 = vsel %vm851_vm15, %v580_v25, %v774_v4  ;;  %v1421_v10 = vld [vmem:[#allocation4 + $0x400] sm:$0xff] }
 0x39e   :  { %v834_v29 = vrot.slane %v770_v20, %v3574_v45  ;;  %v853_v33 = vsel %vm851_vm15, %v594_v38, %v778_v6  ;;  %v854_v34 = vsel %vm851_vm15, %v602_v39, %v782_v7  ;;  %v855_v36 = vsel %vm851_vm15, %v604_v47, %v786_v8 }
 0x39f   :  { %v856_v41 = vsel %vm851_vm15, %v587_v37, %v790_v12  ;;  %v857_v48 = vsel %vm851_vm15, %v601_v46, %v794_v14  ;;  %v858_v56 = vsel %vm851_vm15, %v603_v22, %v798_v17  ;;  %v859_v26 = vsel %vm851_vm15, %v605_v27, %v802_v18  ;;  %v1426_v12 = vld [vmem:[#allocation4 + $0x428] sm:$0xff]  ;;  %v1428_v14 = vld [vmem:[#allocation4 + $0x438] sm:$0xff]  ;;  %v1425_v18 = vld [vmem:[#allocation4 + $0x420] sm:$0xff] }
 0x3a0   :  { %v860_v57 = vsel %vm851_vm15, %v3730_v30, %v806_v19  ;;  %v861_v25 = vsel %vm851_vm15, %v643_v43, %v810_v50  ;;  %v862_v58 = vsel %vm851_vm15, %v651_v44, %v814_v51  ;;  %v863_v38 = vsel %vm851_vm15, %v653_v55, %v818_v21  ;;  %v1427_v19 = vld [vmem:[#allocation4 + $0x430] sm:$0xff]  ;;  %v1430_v51 = vld [vmem:[#allocation4 + $0x448] sm:$0xff]  ;;  %v1432_v21 = vld [vmem:[#allocation4 + $0x458] sm:$0xff] }
 0x3a1   :  { %v864_v39 = vsel %vm851_vm15, %v3736_v42, %v822_v52  ;;  %v865_v37 = vsel %vm851_vm15, %v650_v49, %v826_v53  ;;  %v866_v46 = vsel %vm851_vm15, %v652_v54, %v830_v24  ;;  %v867_v22 = vsel %vm851_vm15, %v654_v35, %v834_v29  ;;  %v1088_v52 = vld [vmem:[#allocation2 + $0x38] sm:$0xfe] }
 0x3a2   :  { %v899_v47 = vcombine.low %v852_v28, %v853_v33  ;;  %v900_v27 = vcombine.low %v854_v34, %v855_v36  ;;  %v916_v32 = vcombine.low %v856_v41, %v857_v48  ;;  %v917_v59 = vcombine.low %v858_v56, %v859_v26  ;;  %v1429_v36 = vld [vmem:[#allocation4 + $0x440] sm:$0xff]  ;;  %v1431_v41 = vld [vmem:[#allocation4 + $0x450] sm:$0xff] }
 0x3a3   :  { %v933_v30 = vcombine.low %v860_v57, %v861_v25  ;;  %v934_v60 = vcombine.low %v862_v58, %v863_v38  ;;  %v950_v43 = vcombine.low %v864_v39, %v865_v37  ;;  %v951_v31 = vcombine.low %v866_v46, %v867_v22  ;;  %v1016_v25 = vld [vmem:[#allocation2 + $0x38] sm:$0xff]  ;;  %v1434_v39 = vld [vmem:[#allocation4 + $0x468] sm:$0xff] }
 0x3a4   :  { %v907_v44 = vrot.slane %v899_v47, %v3720_v16  ;;  %v914_v55 = vrot.slane %v900_v27, %v3720_v16  ;;  %v924_v42 = vrot.slane %v916_v32, %v3720_v16  ;;  %v931_v49 = vrot.slane %v917_v59, %v3720_v16  ;;  %v1090_v37 = vld [vmem:[#allocation2 + $0x58] sm:$0x1]  ;;  %v1376_v47 = vld [vmem:[#allocation2 + $0x8] sm:$0xfc] }
 0x3a5   :  { %v941_v54 = vrot.slane %v933_v30, %v3720_v16  ;;  %v948_v35 = vrot.slane %v934_v60, %v3720_v16  ;;  %v958_v61 = vrot.slane %v950_v43, %v3720_v16  ;;  %v965_v62 = vrot.slane %v951_v31, %v3720_v16  ;;  %v1423_v16 = vld [vmem:[#allocation4 + $0x410] sm:$0xff]  ;;  %v1436_v46 = vld [vmem:[#allocation4 + $0x478] sm:$0xff]  ;;  %v1433_v43 = vld [vmem:[#allocation4 + $0x460] sm:$0xff] }
 0x3a6   :  { %v915_v63 = vcombine.low %v907_v44, %v914_v55  ;;  %v932_v0 = vcombine.low %v924_v42, %v931_v49  ;;  %v3140_v17 = vpack.c.bf16 %v1423_v16, %v1421_v10  ;;  %v1112_v20 = vrot.slane %v1086_v11, 1  ;;  %v1435_v31 = vld [vmem:[#allocation4 + $0x470] sm:$0xff]  ;;  %v1438_v55 = vld [vmem:[#allocation4 + $0x488] sm:$0xff]  ;;  %v1444_v10 = vld [vmem:[#allocation4 + $0x4b8] sm:$0xff] }
 0x3a7   :  { %v949_v1 = vcombine.low %v941_v54, %v948_v35  ;;  %v966_v2 = vcombine.low %v958_v61, %v965_v62  ;;  %v3142_v50 = vpack.c.bf16 %v1428_v14, %v1426_v12  ;;  %v3144_v34 = vpack.c.bf16 %v1427_v19, %v1425_v18  ;;  %v1440_v54 = vld [vmem:[#allocation4 + $0x498] sm:$0xff]  ;;  %v1441_v14 = vld [vmem:[#allocation4 + $0x4a0] sm:$0xff]  ;;  %v1446_v18 = vld [vmem:[#allocation4 + $0x4c8] sm:$0xff] }
 0x3a8   :  { %v967_v4 = vrot.slane %v915_v63, 7  ;;  %v968_v5 = vrot.slane %v932_v0, 7  ;;  %v1113_v48 = vsel %vm1103_vm14, %v1108_v15, %v1112_v20  ;;  %v1118_v56 = vrot.slane %v3687_v23, 1  ;;  %v1448_v19 = vld [vmem:[#allocation4 + $0x4d8] sm:$0xff] }
 0x3a9   :  { %v970_v6 = vrot.slane %v949_v1, 7  ;;  %v971_v7 = vrot.slane %v966_v2, 7  ;;  %v1117_v26 = vrot.slane %v1088_v52, 1  ;;  %v3146_v58 = vpack.c.bf16 %v1432_v21, %v1430_v51  ;;  %v1437_v2 = vld [vmem:[#allocation4 + $0x480] sm:$0xff]  ;;  %v1447_v21 = vld [vmem:[#allocation4 + $0x4d0] sm:$0xff]  ;;  %v1450_v52 = vld [vmem:[#allocation4 + $0x4e8] sm:$0xff] }
 0x3aa   :  { %v3797_v8 = vsel %vm851_vm15, %v967_v4, %v968_v5  ;;  %979 = vst [vmem:[#allocation2] sm:$0xfe] %v967_v4  ;;  %981 = vst [vmem:[#allocation2 + $0x20] sm:$0x1] %v968_v5  ;;  %v1396_v15 = vrot.slane %v3677_v13, 2  ;;  %v3148_v27 = vpack.c.bf16 %v1431_v41, %v1429_v36  ;;  %v1122_v59 = vrot.slane %v1090_v37, 1 }
 0x3ab   :  { %v3800_v9 = vsel %vm851_vm15, %v970_v6, %v971_v7  ;;  %982 = vst [vmem:[#allocation2 + $0x30] sm:$0xfe] %v970_v6  ;;  %984 = vst [vmem:[#allocation2 + $0x50] sm:$0x1] %v971_v7  ;;  %v1105_v29 = vrot.slane %v3797_v8, 1  ;;  %v1119_v32 = vsel %vm1103_vm14, %v1117_v26, %v1118_v56  ;;  %v3150_v60 = vpack.c.bf16 %v1436_v46, %v1434_v39  ;;  %v1439_v4 = vld [vmem:[#allocation4 + $0x490] sm:$0xff] }
 0x3ac   :  { %v1395_v42 = vrot.slane %v1376_v47, 2  ;;  %v1115_v61 = vrot.slane %v3800_v9, 1  ;;  %v3152_v62 = vpack.c.bf16 %v1435_v31, %v1433_v43  ;;  %v1123_v63 = vsel %vm1103_vm14, %v1118_v56, %v1122_v59  ;;  %v1442_v7 = vld [vmem:[#allocation4 + $0x4a8] sm:$0xff]  ;;  %v1445_v51 = vld [vmem:[#allocation4 + $0x4c0] sm:$0xff]  ;;  %v1456_v36 = vld [vmem:[#allocation4 + $0x518] sm:$0xff] }
 0x3ad   :  { %v3154_v1 = vpack.c.bf16 %v1440_v54, %v1438_v55  ;;  %v3156_v16 = vpack.c.bf16 %v1439_v4, %v1437_v2  ;;  %v3158_v12 = vpack.c.bf16 %v1444_v10, %v1442_v7  ;;  %v1453_v56 = vld [vmem:[#allocation4 + $0x500] sm:$0xff]  ;;  %v1455_v26 = vld [vmem:[#allocation4 + $0x510] sm:$0xff]  ;;  %v1462_v46 = vld [vmem:[#allocation4 + $0x548] sm:$0xff] }
 0x3ae   :  { %v1397_v6 = vsel %vm1391_vm8, %v1395_v42, %v1396_v15  ;;  %v1457_v39 = vld [vmem:[#allocation4 + $0x520] sm:$0xff]  ;;  %v1459_v37 = vld [vmem:[#allocation4 + $0x530] sm:$0xff]  ;;  %v1470_v42 = vld [vmem:[#allocation4 + $0x588] sm:$0xff] }
 0x3af   :  { %v3176_v47 = vpack.c.bf16 %v1459_v37, %v1457_v39  ;;  %v1463_v59 = vld [vmem:[#allocation4 + $0x550] sm:$0xff]  ;;  %v1473_v4 = vld [vmem:[#allocation4 + $0x5a0] sm:$0xff]  ;;  %v1480_v7 = vld [vmem:[#allocation4 + $0x5d8] sm:$0xff] }
 0x3b0   :  { %v1467_v55 = vld [vmem:[#allocation4 + $0x570] sm:$0xff] }
 0x3b1   :  { %v1011_v53 = vld [vmem:[#allocation2] sm:$0xff] }
 0x3b2   :  { %v1083_v24 = vld [vmem:[#allocation2] sm:$0xfe]  ;;  %v1085_v28 = vld [vmem:[#allocation2 + $0x20] sm:$0x1]  ;;  %1351 = vmatmul.mubr.f32.vlgmr.msra.gmra.mrb[4].mxu0 %v1011_v53  ;;  %v1087_v22 = vld [vmem:[#allocation2 + $0x30] sm:$0xfe] }
 0x3b3   :  { %v1104_v33 = vrot.slane %v1083_v24, 1  ;;  %3141 = vmatpush1.bf16.msra.mxu0 %v3140_v17  ;;  %1356 = vmatprep.mubr.f32.mxu0 %v3677_v13  ;;  %v1110_v38 = vrot.slane %v1085_v28, 1  ;;  %v1114_v44 = vrot.slane %v1087_v22, 1  ;;  %v1015_v49 = vld [vmem:[#allocation2 + $0x30] sm:$0xff]  ;;  %v1452_v53 = vld [vmem:[#allocation4 + $0x4f8] sm:$0xff]  ;;  %v3164_v24 = vpack.c.bf16 %v1447_v21, %v1445_v51 }
 0x3b4   :  { %3143 = vmatprep.subr.bf16.mxu0 %v3142_v50  ;;  %v1089_v35 = vld [vmem:[#allocation2 + $0x50] sm:$0x1]  ;;  %v3162_v50 = vpack.c.bf16 %v1448_v19, %v1446_v18  ;;  %v3166_v28 = vpack.c.bf16 %v1452_v53, %v1450_v52  ;;  %v1464_v22 = vld [vmem:[#allocation4 + $0x558] sm:$0xff]  ;;  %v1378_v51 = vld [vmem:[#allocation2 + $0x28] sm:$0x3]  ;;  %v1403_v13 = vrot.slane %v3800_v9, 2 }
 0x3b5   :  { %v1106_v57 = vsel %vm1103_vm14, %v1104_v33, %v1105_v29  ;;  %v1111_v30 = vsel %vm1103_vm14, %v1105_v29, %v1110_v38  ;;  %v1116_v0 = vsel %vm1103_vm14, %v1114_v44, %v1115_v61  ;;  %v1120_v5 = vrot.slane %v1089_v35, 1  ;;  %v1443_v17 = vld [vmem:[#allocation4 + $0x4b0] sm:$0xff]  ;;  %v1449_v29 = vld [vmem:[#allocation4 + $0x4e0] sm:$0xff] }
 0x3b6   :  { %1262 = vmatmul.mubr.f32.vlgmr.msra.gmra.mrb[0].mxu1 %v1106_v57  ;;  %1357 = vmatmul.mubr.f32.gmra.mrb[6].mxu0 %v3797_v8  ;;  %v3160_v20 = vpack.c.bf16 %v1443_v17, %v1441_v14  ;;  %v1451_v33 = vld [vmem:[#allocation4 + $0x4f0] sm:$0xff]  ;;  %v1458_v57 = vld [vmem:[#allocation4 + $0x528] sm:$0xff]  ;;  %v1465_v44 = vld [vmem:[#allocation4 + $0x560] sm:$0xff]  ;;  %v1400_v53 = vrot.slane %v1378_v51, 2 }
 0x3b7   :  { %1267 = vmatprep.mubr.f32.mxu1 %v1113_v48  ;;  %3145 = vmatpush1.bf16.msra.mxu0 %v3144_v34  ;;  %v1121_v11 = vsel %vm1103_vm14, %v1115_v61, %v1120_v5  ;;  %v1454_v34 = vld [vmem:[#allocation4 + $0x508] sm:$0xff]  ;;  %v3168_v41 = vpack.c.bf16 %v1451_v33, %v1449_v29  ;;  %v3184_v54 = vpack.c.bf16 %v1467_v55, %v1465_v44  ;;  %v1469_v61 = vld [vmem:[#allocation4 + $0x580] sm:$0xff]  ;;  %v1475_v5 = vld [vmem:[#allocation4 + $0x5b0] sm:$0xff]  ;;  %v1393_v33 = vrot.slane %v3797_v8, 2 }
 0x3b8   :  { %1362 = vmatprep.mubr.f32.mxu0 %v1016_v25  ;;  %3147 = vmatprep.subr.bf16.mxu0 %v3146_v58  ;;  %v3170_v48 = vpack.c.bf16 %v1456_v36, %v1454_v34  ;;  %v1460_v25 = vld [vmem:[#allocation4 + $0x538] sm:$0xff]  ;;  %v3172_v58 = vpack.c.bf16 %v1455_v26, %v1453_v56  ;;  %v3192_v10 = vpack.c.bf16 %v1475_v5, %v1473_v4  ;;  %v1482_v14 = vld [vmem:[#allocation4 + $0x5e8] sm:$0xff]  ;;  %v1375_v21 = vld [vmem:[#allocation2] sm:$0xfc]  ;;  %v1406_v34 = vrot.slane %v3687_v23, 2 }
 0x3b9   :  { %v3174_v38 = vpack.c.bf16 %v1460_v25, %v1458_v57  ;;  %v1484_v17 = vld [vmem:[#allocation4 + $0x5f8] sm:$0xff]  ;;  %v1377_v29 = vld [vmem:[#allocation2 + $0x20] sm:$0x3]  ;;  %v1401_v36 = vsel %vm1391_vm8, %v1396_v15, %v1400_v53  ;;  %v1379_v57 = vld [vmem:[#allocation2 + $0x30] sm:$0xfc] }
 0x3ba   :  { %1268 = vmatmul.mubr.f32.gmra.mrb[2].mxu1 %v1111_v30  ;;  %1363 = vmatmul.mubr.f32.gmra.mrb[8].mxu0 %v1015_v49  ;;  %v1466_v30 = vld [vmem:[#allocation4 + $0x568] sm:$0xff]  ;;  %v1472_v49 = vld [vmem:[#allocation4 + $0x598] sm:$0xff]  ;;  %v3198_v19 = vpack.c.bf16 %v1484_v17, %v1482_v14  ;;  %v1398_v56 = vrot.slane %v1377_v29, 2 }
 0x3bb   :  { %1273 = vmatprep.mubr.f32.mxu1 %v1119_v32  ;;  %3149 = vmatpush1.bf16.msra.mxu0 %v3148_v27  ;;  %v3178_v27 = vpack.c.bf16 %v1464_v22, %v1462_v46  ;;  %v1461_v32 = vld [vmem:[#allocation4 + $0x540] sm:$0xff]  ;;  %v3186_v35 = vpack.c.bf16 %v1472_v49, %v1470_v42  ;;  %v1382_v26 = vld [vmem:[#allocation2 + $0x58] sm:$0x3] }
 0x3bc   :  { %1368 = vmatprep.mubr.f32.mxu0 %v3687_v23  ;;  %3151 = vmatprep.subr.bf16.mxu0 %v3150_v60  ;;  %v1468_v60 = vld [vmem:[#allocation4 + $0x578] sm:$0xff]  ;;  %v3180_v43 = vpack.c.bf16 %v1463_v59, %v1461_v32  ;;  %v1399_v8 = vsel %vm1391_vm8, %v1393_v33, %v1398_v56  ;;  %v1381_v23 = vld [vmem:[#allocation2 + $0x50] sm:$0x3] }
 0x3bd   :  { %v3182_v31 = vpack.c.bf16 %v1468_v60, %v1466_v30  ;;  %v1408_v37 = vrot.slane %v1381_v23, 2 }
 0x3be   :  { %1274 = vmatmul.mubr.f32.gmra.mrb[4].mxu1 %v1116_v0  ;;  %1369 = vmatmul.mubr.f32.gmra.mrb[10].mxu0 %v3800_v9  ;;  %v1476_v0 = vld [vmem:[#allocation4 + $0x5b8] sm:$0xff] }
 0x3bf   :  { %1279 = vmatprep.mubr.f32.mxu1 %v1123_v63  ;;  %3153 = vmatpush1.bf16.msra.mxu0 %v3152_v62  ;;  %v1471_v62 = vld [vmem:[#allocation4 + $0x590] sm:$0xff]  ;;  %v1474_v63 = vld [vmem:[#allocation4 + $0x5a8] sm:$0xff]  ;;  %v1409_v46 = vsel %vm1391_vm8, %v1403_v13, %v1408_v37 }
 0x3c0   :  { %1549 = vmatprep.mubr.f32.mxu0 %v1397_v6  ;;  %3155 = vmatprep.subr.bf16.mxu0 %v3154_v1  ;;  %v3188_v1 = vpack.c.bf16 %v1471_v62, %v1469_v61  ;;  %v3190_v2 = vpack.c.bf16 %v1476_v0, %v1474_v63  ;;  %v1478_v6 = vld [vmem:[#allocation4 + $0x5c8] sm:$0xff] }
 0x3c2   :  { %1280 = vmatmul.mubr.f32.gmra.mrb[6].mxu1 %v1121_v11  ;;  %v1477_v11 = vld [vmem:[#allocation4 + $0x5c0] sm:$0xff] }
 0x3c3   :  { %3157 = vmatpush1.bf16.msra.mxu0 %v3156_v16  ;;  %v3194_v16 = vpack.c.bf16 %v1480_v7, %v1478_v6 }
 0x3c4   :  { %3159 = vmatprep.subr.bf16.mxu0 %v3158_v12  ;;  %v1479_v12 = vld [vmem:[#allocation4 + $0x5d0] sm:$0xff] }
 0x3c5   :  { %v3196_v18 = vpack.c.bf16 %v1479_v12, %v1477_v11 }
 0x3c7   :  { %3161 = vmatpush1.bf16.msra.mxu0 %v3160_v20  ;;  %v1481_v20 = vld [vmem:[#allocation4 + $0x5e0] sm:$0xff] }
 0x3c8   :  { %3163 = vmatprep.subr.bf16.mxu0 %v3162_v50  ;;  %v1483_v50 = vld [vmem:[#allocation4 + $0x5f0] sm:$0xff] }
 0x3c9   :  { %v3200_v52 = vpack.c.bf16 %v1483_v50, %v1481_v20 }
 0x3cb   :  { %3165 = vmatpush1.bf16.msra.mxu0 %v3164_v24  ;;  %v1392_v24 = vrot.slane %v1375_v21, 2 }
 0x3cc   :  { %3167 = vmatprep.subr.bf16.mxu0 %v3166_v28  ;;  %v1380_v28 = vld [vmem:[#allocation2 + $0x38] sm:$0xfc] }
 0x3cf   :  { %3169 = vmatpush1.bf16.msra.mxu0 %v3168_v41  ;;  %v1405_v41 = vrot.slane %v1380_v28, 2 }
 0x3d0   :  { %3171 = vmatprep.subr.bf16.mxu0 %v3170_v48  ;;  %v1394_v48 = vsel %vm1391_vm8, %v1392_v24, %v1393_v33 }
 0x3d1   :  { %v1407_v25 = vsel %vm1391_vm8, %v1405_v41, %v1406_v34 }
 0x3d3   :  { %3173 = vmatpush1.bf16.msra.mxu0 %v3172_v58  ;;  %v1410_v58 = vrot.slane %v1382_v26, 2 }
 0x3d4   :  { %3175 = vmatprep.subr.bf16.mxu0 %v3174_v38  ;;  %v1402_v38 = vrot.slane %v1379_v57, 2 }
 0x3d5   :  { %v1411_v15 = vsel %vm1391_vm8, %v1406_v34, %v1410_v58 }
 0x3d6   :  { %v1404_v39 = vsel %vm1391_vm8, %v1402_v38, %v1403_v13 }
 0x3d7   :  { %3177 = vmatpush1.bf16.msra.mxu0 %v3176_v47 }
 0x3d8   :  { %3179 = vmatprep.subr.bf16.mxu0 %v3178_v27 }
 0x3db   :  { %3181 = vmatpush1.bf16.msra.mxu0 %v3180_v43 }
 0x3dc   :  { %3183 = vmatprep.subr.bf16.mxu0 %v3182_v31 }
 0x3df   :  { %3185 = vmatpush1.bf16.msra.mxu0 %v3184_v54 }
 0x3e0   :  { %3187 = vmatprep.subr.bf16.mxu0 %v3186_v35 }
 0x3e3   :  { %3189 = vmatpush1.bf16.msra.mxu0 %v3188_v1 }
 0x3e4   :  { %3191 = vmatprep.subr.bf16.mxu0 %v3190_v2 }
 0x3e7   :  { %3193 = vmatpush1.bf16.msra.mxu0 %v3192_v10 }
 0x3e8   :  { %3195 = vmatprep.subr.bf16.mxu0 %v3194_v16 }
 0x3eb   :  { %3197 = vmatpush1.bf16.msra.mxu0 %v3196_v18 }
 0x3ec   :  { %3199 = vmatprep.subr.bf16.mxu0 %v3198_v19 }
 0x3ef   :  { %3201 = vmatpush1.bf16.msra.mxu0 %v3200_v52 }
 0x3f2   :  { %1550 = vmatmul.mubr.f32.vlgmr.msra.gmra.mrb[4].mxu0 %v1394_v48 }
 0x3f3   :  { %1555 = vmatprep.mubr.f32.mxu0 %v1401_v36 }
 0x3f6   :  { %1556 = vmatmul.mubr.f32.gmra.mrb[6].mxu0 %v1399_v8 }
 0x3f7   :  { %1561 = vmatprep.mubr.f32.mxu0 %v1407_v25 }
 0x3fa   :  { %1562 = vmatmul.mubr.f32.gmra.mrb[8].mxu0 %v1404_v39 }
 0x3fb   :  { %1567 = vmatprep.mubr.f32.mxu0 %v1411_v15 }
 0x3fe   :  { %1568 = vmatmul.mubr.f32.gmra.mrb[10].mxu0 %v1409_v46 }
 0x489   :  { %v1263_v22 = vpop.f32.mrb[0].mxu1 }
 0x48a   :  { %v1265_v47 = vpop.f32.mrb[1].mxu1 }
 0x48d   :  { %v1269_v27 = vpop.f32.mrb[2].mxu1 }
 0x48e   :  { %v1271_v32 = vpop.f32.mrb[3].mxu1 }
 0x491   :  { %v1275_v59 = vpop.f32.mrb[4].mxu1 }
 0x492   :  { %v1277_v30 = vpop.f32.mrb[5].mxu1 }
 0x495   :  { %v1281_v60 = vpop.f32.mrb[6].mxu1 }
 0x496   :  { %v1283_v43 = vpop.f32.mrb[7].mxu1 }
 0x4c5   :  { %v1551_v9 = vpop.f32.mrb[4].mxu0 }
 0x4c6   :  { %v3834_v31 = vadd.f32 %v1551_v9, %v1263_v22  ;;  %v1553_v44 = vpop.f32.mrb[5].mxu0 }
 0x4c7   :  { %v3836_v55 = vadd.f32 %v1553_v44, %v1265_v47 }
 0x4c9   :  { %v1557_v42 = vpop.f32.mrb[6].mxu0 }
 0x4ca   :  { %v3838_v49 = vadd.f32 %v1557_v42, %v1269_v27  ;;  %v1559_v54 = vpop.f32.mrb[7].mxu0 }
 0x4cb   :  { %v3840_v35 = vadd.f32 %v1559_v54, %v1271_v32 }
 0x4cc   :  { %v1582_v1 = vadd.f32 %v3838_v49, %v3834_v31 }
 0x4cd   :  { %v1563_v61 = vpop.f32.mrb[8].mxu0  ;;  %v1591_v2 = vadd.f32 %v3840_v35, %v3836_v55 }
 0x4ce   :  { %v3842_v62 = vadd.f32 %v1563_v61, %v1275_v59  ;;  %v1565_v63 = vpop.f32.mrb[9].mxu0 }
 0x4cf   :  { %v3844_v0 = vadd.f32 %v1565_v63, %v1277_v30 }
 0x4d0   :  { %v1583_v5 = vadd.f32 %v3842_v62, %v1582_v1 }
 0x4d1   :  { %v1569_v4 = vpop.f32.mrb[10].mxu0  ;;  %v1592_v10 = vadd.f32 %v3844_v0, %v1591_v2 }
 0x4d2   :  { %v3851_v6 = vadd.f32 %v1569_v4, %v1281_v60  ;;  %v1571_v7 = vpop.f32.mrb[11].mxu0 }
 0x4d3   :  { %v3854_v16 = vadd.f32 %v1571_v7, %v1283_v43 }
 0x4d4   :  { %v1584_v11 = vadd.f32 %v3851_v6, %v1583_v5 }
 0x4d5   :  { %v1593_v12 = vadd.f32 %v3854_v16, %v1592_v10 }
 0x4d6   :  { %v1585_v14 = vrot.slane %v1584_v11, 4 }
 0x4d7   :  { %v1594_v18 = vrot.slane %v1593_v12, 4 }
 0x4d8   :  { %v1586_v17 = vadd.f32 %v1585_v14, %v1584_v11 }
 0x4d9   :  { %v1595_v50 = vadd.f32 %v1594_v18, %v1593_v12 }
 0x4da   :  { %v1587_v19 = vrot.slane %v1586_v17, 2 }
 0x4db   :  { %v1596_v52 = vrot.slane %v1595_v50, 2 }
 0x4dc   :  { %v1588_v20 = vadd.f32 %v1587_v19, %v1586_v17 }
 0x4dd   :  { %v1597_v53 = vadd.f32 %v1596_v52, %v1595_v50 }
 0x4de   :  { %v1589_v51 = vrot.slane %v1588_v20, 1 }
 0x4df   :  { %v1598_v24 = vrot.slane %v1597_v53, 1 }
 0x4e0   :  { %v1590_v21 = vadd.f32 %v1589_v51, %v1588_v20 }
 0x4e1   :  { %v1599_v28 = vadd.f32 %v1598_v24, %v1597_v53 }
 0x4e2   :  { %1605 = vrot.lane.b32.xlu1 %v1590_v21, %s3369_s29  ;;  %1601 = vrot.lane.b32.xlu0 %v1590_v21, %s3370_s30 }
 0x4e6   :  { %1613 = vrot.lane.b32.xlu1 %v1590_v21, %s3373_s14  ;;  %1609 = vrot.lane.b32.xlu0 %v1590_v21, %s3371_s12 }
 0x4ea   :  { %1621 = vrot.lane.b32.xlu1 %v1590_v21, %s3377_s19  ;;  %1617 = vrot.lane.b32.xlu0 %v1590_v21, %s3375_s16 }
 0x4ee   :  { %1625 = vrot.lane.b32.xlu0 %v1590_v21, %s3366_s28  ;;  %1631 = vrot.lane.b32.xlu1 %v1599_v28, %s3370_s30 }
 0x4f2   :  { %1635 = vrot.lane.b32.xlu0 %v1599_v28, %s3369_s29  ;;  %1639 = vrot.lane.b32.xlu1 %v1599_v28, %s3371_s12 }
 0x4f6   :  { %1643 = vrot.lane.b32.xlu0 %v1599_v28, %s3373_s14  ;;  %1647 = vrot.lane.b32.xlu1 %v1599_v28, %s3375_s16 }
 0x4fa   :  { %1651 = vrot.lane.b32.xlu0 %v1599_v28, %s3377_s19  ;;  %1655 = vrot.lane.b32.xlu1 %v1599_v28, %s3366_s28 }
 0x554   :  { %v1606_v29 = vpop.permute.xlu1 %1605  ;;  %v1602_v33 = vpop.permute.xlu0 %1601 }
 0x555   :  { %v1604_v34 = vadd.f32 %v1602_v33, %v1590_v21 }
 0x557   :  { %v1608_v36 = vadd.f32 %v1606_v29, %v1604_v34 }
 0x558   :  { %v1614_v41 = vpop.permute.xlu1 %1613  ;;  %v1610_v48 = vpop.permute.xlu0 %1609 }
 0x559   :  { %v1612_v56 = vadd.f32 %v1610_v48, %v1608_v36 }
 0x55b   :  { %v1616_v26 = vadd.f32 %v1614_v41, %v1612_v56 }
 0x55c   :  { %v1622_v57 = vpop.permute.xlu1 %1621  ;;  %v1618_v25 = vpop.permute.xlu0 %1617 }
 0x55d   :  { %v1620_v58 = vadd.f32 %v1618_v25, %v1616_v26 }
 0x55f   :  { %v1624_v8 = vadd.f32 %v1622_v57, %v1620_v58 }
 0x560   :  { %v1626_v38 = vpop.permute.xlu0 %1625  ;;  %v1632_v23 = vpop.permute.xlu1 %1631 }
 0x561   :  { %v1628_v13 = vadd.f32 %v1626_v38, %v1624_v8 }
 0x563   :  { %v1629_v15 = vadd.f32 %v1628_v13, %v1599_v28 }
 0x564   :  { %v1636_v39 = vpop.permute.xlu0 %1635  ;;  %v1640_v37 = vpop.permute.xlu1 %1639 }
 0x565   :  { %v1634_v46 = vadd.f32 %v1632_v23, %v1629_v15 }
 0x567   :  { %v1638_v22 = vadd.f32 %v1636_v39, %v1634_v46 }
 0x568   :  { %v1644_v47 = vpop.permute.xlu0 %1643  ;;  %v1648_v32 = vpop.permute.xlu1 %1647 }
 0x569   :  { %v1642_v27 = vadd.f32 %v1640_v37, %v1638_v22 }
 0x56b   :  { %v1646_v59 = vadd.f32 %v1644_v47, %v1642_v27 }
 0x56c   :  { %v1652_v60 = vpop.permute.xlu0 %1651  ;;  %v1656_v9 = vpop.permute.xlu1 %1655 }
 0x56d   :  { %v1650_v30 = vadd.f32 %v1648_v32, %v1646_v59 }
 0x56f   :  { %v1654_v43 = vadd.f32 %v1652_v60, %v1650_v30 }
 0x571   :  { %v1658_v44 = vadd.f32 %v1656_v9, %v1654_v43 }
 0x573   :  { %v1659_v42 = vmul.f32 0.001953125, %v1658_v44 }
 0x575   :  { %1664 = vrot.lane.b32.xlu1 %v1659_v42, %s3377_s19  ;;  %1661 = vrot.lane.b32.xlu0 %v1659_v42, %s3366_s28 }
 0x579   :  { %1670 = vrot.lane.b32.xlu1 %v1659_v42, %s3373_s14  ;;  %1667 = vrot.lane.b32.xlu0 %v1659_v42, %s3375_s16 }
 0x57d   :  { %1676 = vrot.lane.b32.xlu1 %v1659_v42, %s3369_s29  ;;  %1673 = vrot.lane.b32.xlu0 %v1659_v42, %s3371_s12 }
 0x581   :  { %1679 = vrot.lane.b32.xlu0 %v1659_v42, %s3370_s30 }
 0x5e7   :  { %v1665_v54 = vpop.permute.xlu1 %1664  ;;  %v1662_v61 = vpop.permute.xlu0 %1661 }
 0x5e8   :  { %v1682_v63 = vsel %vm353_vm2, %v1659_v42, %v1662_v61 }
 0x5e9   :  { %v1683_v2 = vsel %vm357_vm4, %v1682_v63, %v1665_v54 }
 0x5eb   :  { %v1671_v1 = vpop.permute.xlu1 %1670  ;;  %v1668_v4 = vpop.permute.xlu0 %1667 }
 0x5ec   :  { %v1684_v5 = vsel %vm361_vm6, %v1683_v2, %v1668_v4 }
 0x5ed   :  { %v1685_v7 = vsel %vm62_vm0, %v1684_v5, %v1671_v1 }
 0x5ef   :  { %v1674_v10 = vpop.permute.xlu0 %1673  ;;  %v1677_v11 = vpop.permute.xlu1 %1676 }
 0x5f0   :  { %v1686_v12 = vsel %vm368_vm9, %v1685_v7, %v1674_v10 }
 0x5f1   :  { %v1687_v14 = vsel %vm372_vm11, %v1686_v12, %v1677_v11 }
 0x5f3   :  { %v1680_v17 = vpop.permute.xlu0 %1679 }
 0x5f4   :  { %v1688_v18 = vsel %vm376_vm13, %v1687_v14, %v1680_v17 }
 0x5f5   :  { %v1692_v19 = vrot.slane %v1688_v18, %v3574_v45 }
 0x5f7   :  { %v3888_v20 = vsub.f32 %v3834_v31, %v1692_v19  ;;  %v3891_v50 = vsub.f32 %v3836_v55, %v1692_v19  ;;  %v3894_v51 = vsub.f32 %v3838_v49, %v1692_v19  ;;  %v3897_v21 = vsub.f32 %v3840_v35, %v1692_v19 }
 0x5f8   :  { %v3900_v52 = vsub.f32 %v3842_v62, %v1692_v19  ;;  %v3903_v53 = vsub.f32 %v3844_v0, %v1692_v19  ;;  %v3906_v24 = vsub.f32 %v3851_v6, %v1692_v19  ;;  %v3909_v31 = vsub.f32 %v3854_v16, %v1692_v19 }
 0x5f9   :  { %v1701_v55 = vmul.f32 %v3888_v20, %v3888_v20  ;;  %v1702_v49 = vmul.f32 %v3891_v50, %v3891_v50  ;;  %v1703_v35 = vmul.f32 %v3894_v51, %v3894_v51  ;;  %v1704_v62 = vmul.f32 %v3897_v21, %v3897_v21 }
 0x5fa   :  { %v1705_v0 = vmul.f32 %v3900_v52, %v3900_v52  ;;  %v1706_v6 = vmul.f32 %v3903_v53, %v3903_v53  ;;  %v1707_v29 = vmul.f32 %v3906_v24, %v3906_v24  ;;  %v1708_v33 = vmul.f32 %v3909_v31, %v3909_v31 }
 0x5fb   :  { %v1709_v16 = vadd.f32 %v1703_v35, %v1701_v55  ;;  %v1718_v28 = vadd.f32 %v1704_v62, %v1702_v49 }
 0x5fd   :  { %v1710_v34 = vadd.f32 %v1709_v16, %v1705_v0  ;;  %v1719_v36 = vadd.f32 %v1718_v28, %v1706_v6  ;;  %v2739_v0 = vld [vmem:[%s4466_s8 + $0x180] sm:$0xff]  ;;  %v2740_v6 = vld [vmem:[%s4466_s8 + $0x188] sm:$0xff] }
 0x5fe   :  { %v3202_v16 = vpack.c.bf16 %v2740_v6, %v2739_v0  ;;  %v2723_v28 = vld [vmem:[%s4466_s8 + $0x100] sm:$0xff] }
 0x5ff   :  { %v1711_v41 = vadd.f32 %v1710_v34, %v1707_v29  ;;  %v1720_v48 = vadd.f32 %v1719_v36, %v1708_v33  ;;  %v2724_v29 = vld [vmem:[%s4466_s8 + $0x108] sm:$0xff]  ;;  %v2741_v36 = vld [vmem:[%s4466_s8 + $0x190] sm:$0xff] }
 0x600   :  { %3203 = vmatprep.subr.bf16.mxu1 %v3202_v16  ;;  %v3204_v33 = vpack.c.bf16 %v2724_v29, %v2723_v28 }
 0x601   :  { %v1712_v56 = vrot.slane %v1711_v41, 4  ;;  %v1721_v57 = vrot.slane %v1720_v48, 4 }
 0x602   :  { %3205 = vmatpush3.bf16.msra.mxu1 %v3204_v33 }
 0x603   :  { %v1713_v26 = vadd.f32 %v1712_v56, %v1711_v41  ;;  %v1722_v8 = vadd.f32 %v1721_v57, %v1720_v48  ;;  %v2742_v41 = vld [vmem:[%s4466_s8 + $0x198] sm:$0xff]  ;;  %v2725_v56 = vld [vmem:[%s4466_s8 + $0x110] sm:$0xff] }
 0x604   :  { %v3206_v48 = vpack.c.bf16 %v2742_v41, %v2741_v36 }
 0x605   :  { %v1714_v25 = vrot.slane %v1713_v26, 2  ;;  %v1723_v13 = vrot.slane %v1722_v8, 2 }
 0x606   :  { %3207 = vmatprep.subr.bf16.mxu1 %v3206_v48 }
 0x607   :  { %v1715_v58 = vadd.f32 %v1714_v25, %v1713_v26  ;;  %v1724_v15 = vadd.f32 %v1723_v13, %v1722_v8  ;;  %v2726_v26 = vld [vmem:[%s4466_s8 + $0x118] sm:$0xff]  ;;  %v2743_v25 = vld [vmem:[%s4466_s8 + $0x1a0] sm:$0xff] }
 0x608   :  { %v3208_v57 = vpack.c.bf16 %v2726_v26, %v2725_v56 }
 0x609   :  { %v1716_v38 = vrot.slane %v1715_v58, 1  ;;  %v1725_v39 = vrot.slane %v1724_v15, 1 }
 0x60a   :  { %3209 = vmatpush3.bf16.msra.mxu1 %v3208_v57 }
 0x60b   :  { %v1717_v23 = vadd.f32 %v1716_v38, %v1715_v58  ;;  %v1726_v37 = vadd.f32 %v1725_v39, %v1724_v15  ;;  %v2744_v58 = vld [vmem:[%s4466_s8 + $0x1a8] sm:$0xff]  ;;  %v2727_v38 = vld [vmem:[%s4466_s8 + $0x120] sm:$0xff]  ;;  %v2745_v15 = vld [vmem:[%s4466_s8 + $0x1b0] sm:$0xff] }
 0x60c   :  { %v3210_v8 = vpack.c.bf16 %v2744_v58, %v2743_v25  ;;  %v2746_v39 = vld [vmem:[%s4466_s8 + $0x1b8] sm:$0xff] }
 0x60d   :  { %1732 = vrot.lane.b32.xlu0 %v1717_v23, %s3369_s29  ;;  %1728 = vrot.lane.b32.xlu1 %v1717_v23, %s3370_s30 }
 0x60e   :  { %3211 = vmatprep.subr.bf16.mxu1 %v3210_v8  ;;  %v1787_v8 = vld [vmem:[%s4464_s6] sm:$0x3] }
 0x611   :  { %1740 = vrot.lane.b32.xlu0 %v1717_v23, %s3373_s14  ;;  %1736 = vrot.lane.b32.xlu1 %v1717_v23, %s3371_s12 }
 0x615   :  { %1748 = vrot.lane.b32.xlu0 %v1717_v23, %s3377_s19  ;;  %1744 = vrot.lane.b32.xlu1 %v1717_v23, %s3375_s16 }
 0x619   :  { %1758 = vrot.lane.b32.xlu0 %v1726_v37, %s3370_s30  ;;  %1752 = vrot.lane.b32.xlu1 %v1717_v23, %s3366_s28 }
 0x61d   :  { %1766 = vrot.lane.b32.xlu0 %v1726_v37, %s3371_s12  ;;  %1762 = vrot.lane.b32.xlu1 %v1726_v37, %s3369_s29 }
 0x621   :  { %1774 = vrot.lane.b32.xlu0 %v1726_v37, %s3375_s16  ;;  %1770 = vrot.lane.b32.xlu1 %v1726_v37, %s3373_s14 }
 0x625   :  { %1782 = vrot.lane.b32.xlu0 %v1726_v37, %s3366_s28  ;;  %1778 = vrot.lane.b32.xlu1 %v1726_v37, %s3377_s19 }
 0x67f   :  { %v1733_v46 = vpop.permute.xlu0 %1732  ;;  %v1729_v22 = vpop.permute.xlu1 %1728 }
 0x680   :  { %v1731_v47 = vadd.f32 %v1729_v22, %v1717_v23  ;;  %v2728_v23 = vld [vmem:[%s4466_s8 + $0x128] sm:$0xff]  ;;  %v2730_v22 = vld [vmem:[%s4466_s8 + $0x138] sm:$0xff] }
 0x681   :  { %v3212_v13 = vpack.c.bf16 %v2728_v23, %v2727_v38  ;;  %v1844_v38 = vsub.s32 1, %v3569_v40 }
 0x682   :  { %v1735_v27 = vadd.f32 %v1733_v46, %v1731_v47  ;;  %v2729_v46 = vld [vmem:[%s4466_s8 + $0x130] sm:$0xff] }
 0x683   :  { %v1741_v32 = vpop.permute.xlu0 %1740  ;;  %v1737_v59 = vpop.permute.xlu1 %1736  ;;  %3213 = vmatpush3.bf16.msra.mxu1 %v3212_v13  ;;  %v3216_v47 = vpack.c.bf16 %v2730_v22, %v2729_v46  ;;  %v1856_v13 = vld [vmem:[%s4465_s7] sm:$0x3] }
 0x684   :  { %v1739_v30 = vadd.f32 %v1737_v59, %v1735_v27  ;;  %v2747_v27 = vld [vmem:[%s4466_s8 + $0x1c0] sm:$0xff] }
 0x686   :  { %v1743_v60 = vadd.f32 %v1741_v32, %v1739_v30  ;;  %v2748_v32 = vld [vmem:[%s4466_s8 + $0x1c8] sm:$0xff]  ;;  %v2731_v30 = vld [vmem:[%s4466_s8 + $0x140] sm:$0xff] }
 0x687   :  { %v1749_v43 = vpop.permute.xlu0 %1748  ;;  %v1745_v9 = vpop.permute.xlu1 %1744  ;;  %v3218_v59 = vpack.c.bf16 %v2748_v32, %v2747_v27 }
 0x688   :  { %v1747_v44 = vadd.f32 %v1745_v9, %v1743_v60  ;;  %v2732_v60 = vld [vmem:[%s4466_s8 + $0x148] sm:$0xff]  ;;  %v2749_v9 = vld [vmem:[%s4466_s8 + $0x1d0] sm:$0xff] }
 0x68a   :  { %v1751_v42 = vadd.f32 %v1749_v43, %v1747_v44  ;;  %v3220_v43 = vpack.c.bf16 %v2732_v60, %v2731_v30  ;;  %v2750_v44 = vld [vmem:[%s4466_s8 + $0x1d8] sm:$0xff] }
 0x68b   :  { %v1759_v54 = vpop.permute.xlu0 %1758  ;;  %v1753_v61 = vpop.permute.xlu1 %1752 }
 0x68c   :  { %v1755_v63 = vadd.f32 %v1753_v61, %v1751_v42  ;;  %v3222_v42 = vpack.c.bf16 %v2750_v44, %v2749_v9  ;;  %v2734_v61 = vld [vmem:[%s4466_s8 + $0x158] sm:$0xff] }
 0x68e   :  { %v1756_v1 = vadd.f32 %v1755_v63, %v1726_v37  ;;  %v3214_v37 = vpack.c.bf16 %v2746_v39, %v2745_v15  ;;  %v1861_v39 = vrot.slane %v1856_v13, %v3574_v45 }
 0x68f   :  { %v1767_v2 = vpop.permute.xlu0 %1766  ;;  %v1763_v4 = vpop.permute.xlu1 %1762 }
 0x690   :  { %v1761_v5 = vadd.f32 %v1759_v54, %v1756_v1  ;;  %3215 = vmatprep.subr.bf16.mxu1 %v3214_v37  ;;  %v2733_v54 = vld [vmem:[%s4466_s8 + $0x150] sm:$0xff]  ;;  %v2751_v1 = vld [vmem:[%s4466_s8 + $0x1e0] sm:$0xff]  ;;  %v1865_v37 = vrot.slane %v1856_v13, %v1844_v38 }
 0x691   :  { %3217 = vmatpush3.bf16.msra.mxu1 %v3216_v47  ;;  %v3224_v63 = vpack.c.bf16 %v2734_v61, %v2733_v54  ;;  %v1967_v13 = vld [vmem:[%s4466_s8 + $0xa0] sm:$0xff] }
 0x692   :  { %v1765_v7 = vadd.f32 %v1763_v4, %v1761_v5  ;;  %3219 = vmatprep.subr.bf16.mxu1 %v3218_v59  ;;  %v2735_v4 = vld [vmem:[%s4466_s8 + $0x160] sm:$0xff] }
 0x693   :  { %v1771_v10 = vpop.permute.xlu1 %1770  ;;  %v1775_v12 = vpop.permute.xlu0 %1774 }
 0x694   :  { %v1769_v11 = vadd.f32 %v1767_v2, %v1765_v7  ;;  %v2752_v2 = vld [vmem:[%s4466_s8 + $0x1e8] sm:$0xff] }
 0x695   :  { %3221 = vmatpush3.bf16.msra.mxu1 %v3220_v43  ;;  %v3226_v5 = vpack.c.bf16 %v2752_v2, %v2751_v1  ;;  %v2736_v7 = vld [vmem:[%s4466_s8 + $0x168] sm:$0xff] }
 0x696   :  { %v1773_v14 = vadd.f32 %v1771_v10, %v1769_v11  ;;  %3223 = vmatprep.subr.bf16.mxu1 %v3222_v42  ;;  %v2753_v10 = vld [vmem:[%s4466_s8 + $0x1f0] sm:$0xff]  ;;  %v2754_v11 = vld [vmem:[%s4466_s8 + $0x1f8] sm:$0xff] }
 0x697   :  { %v1779_v18 = vpop.permute.xlu1 %1778  ;;  %v1783_v55 = vpop.permute.xlu0 %1782 }
 0x698   :  { %v1777_v17 = vadd.f32 %v1775_v12, %v1773_v14  ;;  %v3228_v12 = vpack.c.bf16 %v2736_v7, %v2735_v4  ;;  %v3230_v14 = vpack.c.bf16 %v2754_v11, %v2753_v10 }
 0x699   :  { %3225 = vmatpush3.bf16.msra.mxu1 %v3224_v63 }
 0x69a   :  { %v1781_v19 = vadd.f32 %v1779_v18, %v1777_v17  ;;  %v2737_v17 = vld [vmem:[%s4466_s8 + $0x170] sm:$0xff]  ;;  %v2738_v18 = vld [vmem:[%s4466_s8 + $0x178] sm:$0xff]  ;;  %3227 = vmatprep.subr.bf16.mxu1 %v3226_v5 }
 0x69c   :  { %v1785_v49 = vadd.f32 %v1783_v55, %v1781_v19  ;;  %v3232_v19 = vpack.c.bf16 %v2738_v18, %v2737_v17  ;;  %v1963_v55 = vld [vmem:[%s4466_s8 + $0x80] sm:$0xff] }
 0x69d   :  { %3229 = vmatpush3.bf16.msra.mxu1 %v3228_v12 }
 0x69e   :  { %v1786_v35 = vmul.f32 0.001953125, %v1785_v49  ;;  %3231 = vmatprep.subr.bf16.mxu1 %v3230_v14  ;;  %v1964_v49 = vld [vmem:[%s4466_s8 + $0x88] sm:$0xff] }
 0x6a0   :  { %v1788_v62 = vadd.f32 1e-05, %v1786_v35  ;;  %v3234_v35 = vpack.c.bf16 %v1964_v49, %v1963_v55  ;;  %v1947_v49 = vld [vmem:[%s4466_s8] sm:$0xff] }
 0x6a1   :  { %3233 = vmatpush3.bf16.msra.mxu1 %v3232_v19 }
 0x6a2   :  { %3336 = vrsqrt.f32 %v1788_v62  ;;  %3235 = vmatprep.subr.bf16.mxu1 %v3234_v35 }
 0x6ac   :  { %v3953_v34 = vpop.eup %3336 }
 0x6ad   :  { %1794 = vrot.lane.b32.xlu0 %v3953_v34, %s3377_s19  ;;  %1791 = vrot.lane.b32.xlu1 %v3953_v34, %s3366_s28 }
 0x6b1   :  { %1800 = vrot.lane.b32.xlu0 %v3953_v34, %s3373_s14  ;;  %1797 = vrot.lane.b32.xlu1 %v3953_v34, %s3375_s16 }
 0x6b5   :  { %1806 = vrot.lane.b32.xlu0 %v3953_v34, %s3369_s29  ;;  %1803 = vrot.lane.b32.xlu1 %v3953_v34, %s3371_s12 }
 0x6b9   :  { %1809 = vrot.lane.b32.xlu1 %v3953_v34, %s3370_s30 }
 0x71f   :  { %v1795_v62 = vpop.permute.xlu0 %1794  ;;  %v1792_v0 = vpop.permute.xlu1 %1791 }
 0x720   :  { %v1812_v6 = vsel %vm353_vm2, %v3953_v34, %v1792_v0  ;;  %v1965_v0 = vld [vmem:[%s4466_s8 + $0x90] sm:$0xff] }
 0x721   :  { %v1813_v28 = vsel %vm357_vm4, %v1812_v6, %v1795_v62  ;;  %v1948_v62 = vld [vmem:[%s4466_s8 + $0x8] sm:$0xff]  ;;  %v1966_v6 = vld [vmem:[%s4466_s8 + $0x98] sm:$0xff] }
 0x723   :  { %v1801_v16 = vpop.permute.xlu0 %1800  ;;  %v1798_v29 = vpop.permute.xlu1 %1797 }
 0x724   :  { %v1814_v33 = vsel %vm361_vm6, %v1813_v28, %v1798_v29 }
 0x725   :  { %v1815_v36 = vsel %vm62_vm0, %v1814_v33, %v1801_v16 }
 0x727   :  { %v1804_v41 = vpop.permute.xlu1 %1803  ;;  %v1807_v48 = vpop.permute.xlu0 %1806 }
 0x728   :  { %v1816_v56 = vsel %vm368_vm9, %v1815_v36, %v1804_v41 }
 0x729   :  { %v1817_v26 = vsel %vm372_vm11, %v1816_v56, %v1807_v48 }
 0x72b   :  { %v1810_v57 = vpop.permute.xlu1 %1809 }
 0x72c   :  { %v1818_v25 = vsel %vm376_vm13, %v1817_v26, %v1810_v57  ;;  %v3236_v26 = vpack.c.bf16 %v1948_v62, %v1947_v49  ;;  %v1957_v49 = vld [vmem:[%s4466_s8 + $0x50] sm:$0xff]  ;;  %v1975_v62 = vld [vmem:[%s4466_s8 + $0xe0] sm:$0xff] }
 0x72d   :  { %v1820_v58 = vcombine.low %v1818_v25, %v1818_v25 }
 0x72f   :  { %v1827_v34 = vrot.slane %v1820_v58, %v3710_v3 }
 0x731   :  { %v1834_v23 = vrot.slane %v1827_v34, %v3710_v3  ;;  %v3238_v34 = vpack.c.bf16 %v1966_v6, %v1965_v0  ;;  %v1976_v0 = vld [vmem:[%s4466_s8 + $0xe8] sm:$0xff] }
 0x733   :  { %v1836_v15 = vmul.f32 %v1834_v23, %v1787_v8  ;;  %v1949_v8 = vld [vmem:[%s4466_s8 + $0x10] sm:$0xff] }
 0x735   :  { %v1841_v46 = vrot.slane %v1836_v15, %v3574_v45  ;;  %v1845_v22 = vrot.slane %v1836_v15, %v1844_v38  ;;  %v1950_v38 = vld [vmem:[%s4466_s8 + $0x18] sm:$0xff]  ;;  %v1968_v15 = vld [vmem:[%s4466_s8 + $0xa8] sm:$0xff] }
 0x737   :  { %v1848_v47 = vmul.f32 %v1841_v46, %v3888_v20  ;;  %v1849_v27 = vmul.f32 %v1845_v22, %v3891_v50  ;;  %v1850_v32 = vmul.f32 %v1841_v46, %v3894_v51  ;;  %v1851_v40 = vmul.f32 %v1845_v22, %v3897_v21 }
 0x738   :  { %v1852_v3 = vmul.f32 %v1841_v46, %v3900_v52  ;;  %v1853_v59 = vmul.f32 %v1845_v22, %v3903_v53  ;;  %v1854_v30 = vmul.f32 %v1841_v46, %v3906_v24  ;;  %v1855_v60 = vmul.f32 %v1845_v22, %v3909_v31 }
 0x739   :  { %v1868_v43 = vadd.f32 %v1861_v39, %v1848_v47  ;;  %v1869_v9 = vadd.f32 %v1865_v37, %v1849_v27  ;;  %v1870_v44 = vadd.f32 %v1861_v39, %v1850_v32  ;;  %v1871_v42 = vadd.f32 %v1865_v37, %v1851_v40  ;;  %v1951_v40 = vld [vmem:[%s4466_s8 + $0x20] sm:$0xff] }
 0x73a   :  { %v1872_v54 = vadd.f32 %v1861_v39, %v1852_v3  ;;  %v1873_v20 = vadd.f32 %v1865_v37, %v1853_v59  ;;  %v1874_v61 = vadd.f32 %v1861_v39, %v1854_v30  ;;  %v1875_v50 = vadd.f32 %v1865_v37, %v1855_v60  ;;  %v1952_v3 = vld [vmem:[%s4466_s8 + $0x28] sm:$0xff]  ;;  %v1969_v60 = vld [vmem:[%s4466_s8 + $0xb0] sm:$0xff] }
 0x73b   :  { %v1876_v63 = vmax.f32 %v1868_v43, 0.0  ;;  %v1877_v51 = vmax.f32 %v1869_v9, 0.0  ;;  %v1878_v1 = vmax.f32 %v1870_v44, 0.0  ;;  %v1879_v21 = vmax.f32 %v1871_v42, 0.0  ;;  %v1970_v43 = vld [vmem:[%s4466_s8 + $0xb8] sm:$0xff] }
 0x73c   :  { %v1880_v2 = vmax.f32 %v1872_v54, 0.0  ;;  %v1881_v52 = vmax.f32 %v1873_v20, 0.0  ;;  %v1882_v4 = vmax.f32 %v1874_v61, 0.0  ;;  %v1883_v53 = vmax.f32 %v1875_v50, 0.0  ;;  %v1953_v50 = vld [vmem:[%s4466_s8 + $0x30] sm:$0xff] }
 0x73d   :  { %v1903_v5 = vrot.slane %v1876_v63, 7  ;;  %v1904_v24 = vrot.slane %v1877_v51, 7  ;;  %v1905_v7 = vrot.slane %v1878_v1, 7  ;;  %v1907_v31 = vrot.slane %v1879_v21, 7  ;;  %v1954_v63 = vld [vmem:[%s4466_s8 + $0x38] sm:$0xff]  ;;  %v1971_v21 = vld [vmem:[%s4466_s8 + $0xc0] sm:$0xff] }
 0x73e   :  { %v1909_v10 = vrot.slane %v1880_v2, 7  ;;  %v1910_v11 = vrot.slane %v1881_v52, 7  ;;  %v1911_v12 = vrot.slane %v1882_v4, 7  ;;  %v1913_v14 = vrot.slane %v1883_v53, 7  ;;  %v1972_v2 = vld [vmem:[%s4466_s8 + $0xc8] sm:$0xff] }
 0x73f   :  { %v4087_v17 = vsel %vm851_vm15, %v1903_v5, %v1905_v7  ;;  %v4090_v18 = vsel %vm851_vm15, %v1904_v24, %v1907_v31  ;;  %1927 = vst [vmem:[#allocation3] sm:$0xfe] %v1903_v5  ;;  %1928 = vst [vmem:[#allocation3 + $0x8] sm:$0xfe] %v1904_v24  ;;  %v3240_v22 = vpack.c.bf16 %v1950_v38, %v1949_v8  ;;  %v1955_v5 = vld [vmem:[%s4466_s8 + $0x40] sm:$0xff]  ;;  %v1956_v24 = vld [vmem:[%s4466_s8 + $0x48] sm:$0xff] }
 0x740   :  { %1931 = vst [vmem:[#allocation3 + $0x20] sm:$0x1] %v1905_v7  ;;  %1932 = vst [vmem:[#allocation3 + $0x28] sm:$0x1] %v1907_v31  ;;  %v4093_v19 = vsel %vm851_vm15, %v1909_v10, %v1911_v12  ;;  %v4096_v55 = vsel %vm851_vm15, %v1910_v11, %v1913_v14  ;;  %v2003_v35 = vrot.slane %v4090_v18, 1  ;;  %v2000_v41 = vrot.slane %v4087_v17, 1 }
 0x741   :  { %1933 = vst [vmem:[#allocation3 + $0x30] sm:$0xfe] %v1909_v10  ;;  %1934 = vst [vmem:[#allocation3 + $0x38] sm:$0xfe] %v1910_v11  ;;  %v2013_v27 = vrot.slane %v4096_v55, 1  ;;  %v3242_v32 = vpack.c.bf16 %v1968_v15, %v1967_v13  ;;  %v2010_v54 = vrot.slane %v4093_v19, 1  ;;  %v3244_v20 = vpack.c.bf16 %v1952_v3, %v1951_v40 }
 0x742   :  { %1937 = vst [vmem:[#allocation3 + $0x50] sm:$0x1] %v1911_v12  ;;  %1938 = vst [vmem:[#allocation3 + $0x58] sm:$0x1] %v1913_v14  ;;  %v3246_v61 = vpack.c.bf16 %v1970_v43, %v1969_v60  ;;  %v3248_v4 = vpack.c.bf16 %v1954_v63, %v1953_v50  ;;  %v3250_v53 = vpack.c.bf16 %v1972_v2, %v1971_v21  ;;  %v1973_v31 = vld [vmem:[%s4466_s8 + $0xd0] sm:$0xff]  ;;  %v1974_v10 = vld [vmem:[%s4466_s8 + $0xd8] sm:$0xff] }
 0x743   :  { %v3252_v12 = vpack.c.bf16 %v1956_v24, %v1955_v5  ;;  %v3254_v14 = vpack.c.bf16 %v1974_v10, %v1973_v31  ;;  %v2755_v8 = vld [vmem:[%s4466_s8 + $0x200] sm:$0xff]  ;;  %v2756_v38 = vld [vmem:[%s4466_s8 + $0x208] sm:$0xff]  ;;  %v2774_v13 = vld [vmem:[%s4466_s8 + $0x298] sm:$0xff]  ;;  %v2250_v21 = vrot.slane %v4090_v18, 2  ;;  %vm4476_vm15 = vcmask 982016  }
 0x744   :  { %v3268_v15 = vpack.c.bf16 %v2756_v38, %v2755_v8  ;;  %v2759_v3 = vld [vmem:[%s4466_s8 + $0x220] sm:$0xff]  ;;  %v2778_v60 = vld [vmem:[%s4466_s8 + $0x2b8] sm:$0xff]  ;;  %v2780_v63 = vld [vmem:[%s4466_s8 + $0x2c8] sm:$0xff] }
 0x745   :  { %v2779_v50 = vld [vmem:[%s4466_s8 + $0x2c0] sm:$0xff]  ;;  %v2782_v5 = vld [vmem:[%s4466_s8 + $0x2d8] sm:$0xff]  ;;  %v2765_v31 = vld [vmem:[%s4466_s8 + $0x250] sm:$0xff] }
 0x746   :  { %v1980_v16 = vld [vmem:[#allocation3 + $0x8] sm:$0xfe]  ;;  %v1979_v28 = vld [vmem:[#allocation3] sm:$0xfe]  ;;  %v3282_v2 = vpack.c.bf16 %v2780_v63, %v2779_v50  ;;  %v2766_v10 = vld [vmem:[%s4466_s8 + $0x258] sm:$0xff] }
 0x747   :  { %v1982_v29 = vld [vmem:[#allocation3 + $0x28] sm:$0x1]  ;;  %v2002_v33 = vrot.slane %v1980_v16, 1  ;;  %v1999_v36 = vrot.slane %v1979_v28, 1  ;;  %v1981_v56 = vld [vmem:[#allocation3 + $0x20] sm:$0x1]  ;;  %v3258_v16 = vpack.c.bf16 %v1976_v0, %v1975_v62 }
 0x748   :  { %v2007_v48 = vrot.slane %v1982_v29, 1  ;;  %v1984_v57 = vld [vmem:[#allocation3 + $0x38] sm:$0xfe]  ;;  %v2005_v23 = vrot.slane %v1981_v56, 1  ;;  %v1983_v46 = vld [vmem:[#allocation3 + $0x30] sm:$0xfe] }
 0x749   :  { %v2004_v25 = vsel %vm1103_vm14, %v2002_v33, %v2003_v35  ;;  %v2001_v58 = vsel %vm1103_vm14, %v1999_v36, %v2000_v41  ;;  %v2012_v37 = vrot.slane %v1984_v57, 1  ;;  %v1986_v47 = vld [vmem:[#allocation3 + $0x58] sm:$0x1]  ;;  %v2009_v30 = vrot.slane %v1983_v46, 1  ;;  %v1985_v42 = vld [vmem:[#allocation3 + $0x50] sm:$0x1] }
 0x74a   :  { %2124 = vmatprep.mubr.f32.mxu1 %v2004_v25  ;;  %v2008_v39 = vsel %vm1103_vm14, %v2003_v35, %v2007_v48  ;;  %v2006_v59 = vsel %vm1103_vm14, %v2000_v41, %v2005_v23  ;;  %v2017_v44 = vrot.slane %v1986_v47, 1  ;;  %v2015_v1 = vrot.slane %v1985_v42, 1  ;;  %v1940_v11 = vld [vmem:[#allocation3 + $0x8] sm:$0xff]  ;;  %v1958_v35 = vld [vmem:[%s4466_s8 + $0x58] sm:$0xff]  ;;  %v1959_v28 = vld [vmem:[%s4466_s8 + $0x60] sm:$0xff] }
 0x74b   :  { %2125 = vmatmul.mubr.f32.vlgmr.msra.gmra.mrb[8].mxu1 %v2001_v58  ;;  %v2014_v9 = vsel %vm1103_vm14, %v2012_v37, %v2013_v27  ;;  %v2011_v51 = vsel %vm1103_vm14, %v2009_v30, %v2010_v54  ;;  %v3256_v6 = vpack.c.bf16 %v1958_v35, %v1957_v49  ;;  %v1960_v29 = vld [vmem:[%s4466_s8 + $0x68] sm:$0xff]  ;;  %v1977_v33 = vld [vmem:[%s4466_s8 + $0xf0] sm:$0xff]  ;;  %v1978_v36 = vld [vmem:[%s4466_s8 + $0xf8] sm:$0xff] }
 0x74c   :  { %3237 = vmatpush3.bf16.msra.mxu1 %v3236_v26  ;;  %2129 = vmatprep.mubr.f32.mxu1 %v2008_v39  ;;  %v2018_v52 = vsel %vm1103_vm14, %v2013_v27, %v2017_v44  ;;  %v2016_v7 = vsel %vm1103_vm14, %v2010_v54, %v2015_v1  ;;  %v3260_v41 = vpack.c.bf16 %v1960_v29, %v1959_v28  ;;  %v1961_v56 = vld [vmem:[%s4466_s8 + $0x70] sm:$0xff]  ;;  %v1962_v26 = vld [vmem:[%s4466_s8 + $0x78] sm:$0xff]  ;;  %v2771_v57 = vld [vmem:[%s4466_s8 + $0x280] sm:$0xff]  ;;  %vm4475_vm14 = vcmask 588800  }
 0x74d   :  { %3239 = vmatprep.subr.bf16.mxu1 %v3238_v34  ;;  %v3262_v48 = vpack.c.bf16 %v1978_v36, %v1977_v33  ;;  %v2772_v25 = vld [vmem:[%s4466_s8 + $0x288] sm:$0xff]  ;;  %v3264_v58 = vpack.c.bf16 %v1962_v26, %v1961_v56  ;;  %v2773_v23 = vld [vmem:[%s4466_s8 + $0x290] sm:$0xff]  ;;  %v2758_v46 = vld [vmem:[%s4466_s8 + $0x218] sm:$0xff] }
 0x74e   :  { %v3266_v34 = vpack.c.bf16 %v2772_v25, %v2771_v57  ;;  %v3270_v39 = vpack.c.bf16 %v2774_v13, %v2773_v23  ;;  %v2757_v37 = vld [vmem:[%s4466_s8 + $0x210] sm:$0xff]  ;;  %v2775_v47 = vld [vmem:[%s4466_s8 + $0x2a0] sm:$0xff]  ;;  %v2776_v27 = vld [vmem:[%s4466_s8 + $0x2a8] sm:$0xff]  ;;  %v2247_v25 = vrot.slane %v4087_v17, 2 }
 0x74f   :  { %2130 = vmatmul.mubr.f32.gmra.mrb[10].mxu1 %v2006_v59  ;;  %v3274_v40 = vpack.c.bf16 %v2776_v27, %v2775_v47  ;;  %v2760_v59 = vld [vmem:[%s4466_s8 + $0x228] sm:$0xff]  ;;  %v2777_v30 = vld [vmem:[%s4466_s8 + $0x2b0] sm:$0xff]  ;;  %v1944_v43 = vld [vmem:[#allocation3 + $0x38] sm:$0xff]  ;;  %v2257_v27 = vrot.slane %v4093_v19, 2 }
 0x750   :  { %3241 = vmatpush3.bf16.msra.mxu1 %v3240_v22  ;;  %2134 = vmatprep.mubr.f32.mxu1 %v2014_v9  ;;  %v1939_v22 = vld [vmem:[#allocation3] sm:$0xff]  ;;  %v3276_v9 = vpack.c.bf16 %v2760_v59, %v2759_v3  ;;  %v2231_v44 = vld [vmem:[#allocation3 + $0x8] sm:$0xfc]  ;;  %v3278_v42 = vpack.c.bf16 %v2778_v60, %v2777_v30  ;;  %v2761_v54 = vld [vmem:[%s4466_s8 + $0x230] sm:$0xff] }
 0x751   :  { %3243 = vmatprep.subr.bf16.mxu1 %v3242_v32  ;;  %v3272_v32 = vpack.c.bf16 %v2758_v46, %v2757_v37  ;;  %v2767_v35 = vld [vmem:[%s4466_s8 + $0x260] sm:$0xff]  ;;  %v2768_v62 = vld [vmem:[%s4466_s8 + $0x268] sm:$0xff]  ;;  %v2785_v0 = vld [vmem:[%s4466_s8 + $0x2f0] sm:$0xff] }
 0x752   :  { %v2769_v29 = vld [vmem:[%s4466_s8 + $0x270] sm:$0xff]  ;;  %v2770_v33 = vld [vmem:[%s4466_s8 + $0x278] sm:$0xff]  ;;  %v2230_v36 = vld [vmem:[#allocation3] sm:$0xfc] }
 0x753   :  { %2135 = vmatmul.mubr.f32.gmra.mrb[12].mxu1 %v2011_v51  ;;  %v2249_v51 = vrot.slane %v2231_v44, 2  ;;  %v2246_v56 = vrot.slane %v2230_v36, 2  ;;  %v2232_v57 = vld [vmem:[#allocation3 + $0x20] sm:$0x3]  ;;  %v2234_v13 = vld [vmem:[#allocation3 + $0x30] sm:$0xfc] }
 0x754   :  { %3245 = vmatpush3.bf16.msra.mxu1 %v3244_v20  ;;  %2139 = vmatprep.mubr.f32.mxu1 %v2018_v52  ;;  %v2762_v20 = vld [vmem:[%s4466_s8 + $0x238] sm:$0xff]  ;;  %v2763_v52 = vld [vmem:[%s4466_s8 + $0x240] sm:$0xff]  ;;  %v2252_v8 = vrot.slane %v2232_v57, 2  ;;  %v2256_v46 = vrot.slane %v2234_v13, 2  ;;  %v2236_v47 = vld [vmem:[#allocation3 + $0x50] sm:$0x3] }
 0x755   :  { %3247 = vmatprep.subr.bf16.mxu1 %v3246_v61  ;;  %v1943_v61 = vld [vmem:[#allocation3 + $0x30] sm:$0xff]  ;;  %v3280_v1 = vpack.c.bf16 %v2762_v20, %v2761_v54 }
 0x756   :  { %v2253_v37 = vsel %vm1391_vm8, %v2247_v25, %v2252_v8 }
 0x757   :  { %2140 = vmatmul.mubr.f32.gmra.mrb[14].mxu1 %v2016_v7 }
 0x758   :  { %3249 = vmatpush3.bf16.msra.mxu1 %v3248_v4  ;;  %2209 = vmatprep.mubr.f32.mxu1 %v1940_v11  ;;  %v2764_v4 = vld [vmem:[%s4466_s8 + $0x248] sm:$0xff]  ;;  %v2783_v11 = vld [vmem:[%s4466_s8 + $0x2e0] sm:$0xff] }
 0x759   :  { %3251 = vmatprep.subr.bf16.mxu1 %v3250_v53  ;;  %v2781_v53 = vld [vmem:[%s4466_s8 + $0x2d0] sm:$0xff]  ;;  %v3284_v24 = vpack.c.bf16 %v2764_v4, %v2763_v52 }
 0x75a   :  { %v3286_v7 = vpack.c.bf16 %v2782_v5, %v2781_v53 }
 0x75c   :  { %3253 = vmatpush3.bf16.msra.mxu1 %v3252_v12  ;;  %v2784_v12 = vld [vmem:[%s4466_s8 + $0x2e8] sm:$0xff] }
 0x75d   :  { %3255 = vmatprep.subr.bf16.mxu1 %v3254_v14  ;;  %v3288_v14 = vpack.c.bf16 %v2766_v10, %v2765_v31  ;;  %v3290_v49 = vpack.c.bf16 %v2784_v12, %v2783_v11 }
 0x760   :  { %3257 = vmatpush3.bf16.msra.mxu1 %v3256_v6  ;;  %v2786_v6 = vld [vmem:[%s4466_s8 + $0x2f8] sm:$0xff] }
 0x761   :  { %3259 = vmatprep.subr.bf16.mxu1 %v3258_v16  ;;  %v3292_v16 = vpack.c.bf16 %v2768_v62, %v2767_v35  ;;  %v3294_v28 = vpack.c.bf16 %v2786_v6, %v2785_v0 }
 0x764   :  { %3261 = vmatpush3.bf16.msra.mxu1 %v3260_v41  ;;  %v3296_v41 = vpack.c.bf16 %v2770_v33, %v2769_v29 }
 0x765   :  { %3263 = vmatprep.subr.bf16.mxu1 %v3262_v48  ;;  %v2233_v48 = vld [vmem:[#allocation3 + $0x28] sm:$0x3] }
 0x766   :  { %v2254_v26 = vrot.slane %v2233_v48, 2 }
 0x768   :  { %3265 = vmatpush3.bf16.msra.mxu1 %v3264_v58  ;;  %v2235_v58 = vld [vmem:[#allocation3 + $0x38] sm:$0xfc]  ;;  %v2255_v38 = vsel %vm1391_vm8, %v2250_v21, %v2254_v26 }
 0x769   :  { %3267 = vmatprep.subr.bf16.mxu1 %v3266_v34  ;;  %v2248_v34 = vsel %vm1391_vm8, %v2246_v56, %v2247_v25  ;;  %v2259_v23 = vrot.slane %v2235_v58, 2 }
 0x76b   :  { %2210 = vmatmul.mubr.f32.vlgmr.msra.gmra.mrb[16].mxu1 %v1939_v22 }
 0x76c   :  { %2214 = vmatprep.mubr.f32.mxu1 %v4090_v18  ;;  %3269 = vmatpush3.bf16.msra.mxu1 %v3268_v15  ;;  %v2251_v18 = vsel %vm1391_vm8, %v2249_v51, %v2250_v21  ;;  %v2237_v15 = vld [vmem:[#allocation3 + $0x58] sm:$0x3] }
 0x76d   :  { %3271 = vmatprep.subr.bf16.mxu1 %v3270_v39  ;;  %v2260_v39 = vrot.slane %v4096_v55, 2 }
 0x76f   :  { %2215 = vmatmul.mubr.f32.gmra.mrb[18].mxu1 %v4087_v17  ;;  %v2261_v22 = vsel %vm1391_vm8, %v2259_v23, %v2260_v39  ;;  %v2264_v17 = vrot.slane %v2237_v15, 2 }
 0x770   :  { %2219 = vmatprep.mubr.f32.mxu1 %v1944_v43  ;;  %3273 = vmatpush3.bf16.msra.mxu1 %v3272_v32  ;;  %v2258_v32 = vsel %vm1391_vm8, %v2256_v46, %v2257_v27 }
 0x771   :  { %3275 = vmatprep.subr.bf16.mxu1 %v3274_v40  ;;  %v2262_v40 = vrot.slane %v2236_v47, 2  ;;  %v2265_v3 = vsel %vm1391_vm8, %v2260_v39, %v2264_v17 }
 0x773   :  { %2220 = vmatmul.mubr.f32.gmra.mrb[20].mxu1 %v1943_v61 }
 0x774   :  { %2224 = vmatprep.mubr.f32.mxu1 %v4096_v55  ;;  %3277 = vmatpush3.bf16.msra.mxu1 %v3276_v9  ;;  %v2263_v55 = vsel %vm1391_vm8, %v2257_v27, %v2262_v40 }
 0x775   :  { %3279 = vmatprep.subr.bf16.mxu1 %v3278_v42 }
 0x777   :  { %2225 = vmatmul.mubr.f32.gmra.mrb[22].mxu1 %v4093_v19 }
 0x778   :  { %3281 = vmatpush3.bf16.msra.mxu1 %v3280_v1  ;;  %2371 = vmatprep.mubr.f32.mxu1 %v2251_v18 }
 0x779   :  { %3283 = vmatprep.subr.bf16.mxu1 %v3282_v2 }
 0x77c   :  { %3285 = vmatpush3.bf16.msra.mxu1 %v3284_v24 }
 0x77d   :  { %3287 = vmatprep.subr.bf16.mxu1 %v3286_v7 }
 0x780   :  { %3289 = vmatpush3.bf16.msra.mxu1 %v3288_v14 }
 0x781   :  { %3291 = vmatprep.subr.bf16.mxu1 %v3290_v49 }
 0x784   :  { %3293 = vmatpush3.bf16.msra.mxu1 %v3292_v16 }
 0x785   :  { %3295 = vmatprep.subr.bf16.mxu1 %v3294_v28 }
 0x788   :  { %3297 = vmatpush3.bf16.msra.mxu1 %v3296_v41 }
 0x78b   :  { %2372 = vmatmul.mubr.f32.vlgmr.msra.gmra.mrb[24].mxu1 %v2248_v34 }
 0x78c   :  { %2376 = vmatprep.mubr.f32.mxu1 %v2255_v38 }
 0x78f   :  { %2377 = vmatmul.mubr.f32.gmra.mrb[26].mxu1 %v2253_v37 }
 0x790   :  { %2381 = vmatprep.mubr.f32.mxu1 %v2261_v22 }
 0x793   :  { %2382 = vmatmul.mubr.f32.gmra.mrb[28].mxu1 %v2258_v32 }
 0x794   :  { %2386 = vmatprep.mubr.f32.mxu1 %v2265_v3 }
 0x797   :  { %2387 = vmatmul.mubr.f32.gmra.mrb[30].mxu1 %v2263_v55 }
 0x81e   :  { %v2840_v59 = vpop.f32.mrb[8].mxu1 }
 0x81f   :  { %v2841_v30 = vpop.f32.mrb[9].mxu1 }
 0x820   :  { %v2842_v60 = vadd.f32 %v2841_v30, %v2840_v59 }
 0x822   :  { %v2843_v43 = vpop.f32.mrb[10].mxu1 }
 0x823   :  { %v2844_v9 = vpop.f32.mrb[11].mxu1 }
 0x824   :  { %v2845_v44 = vadd.f32 %v2844_v9, %v2843_v43 }
 0x826   :  { %v2846_v42 = vpop.f32.mrb[12].mxu1 }
 0x827   :  { %v2847_v54 = vpop.f32.mrb[13].mxu1 }
 0x828   :  { %v2848_v20 = vadd.f32 %v2847_v54, %v2846_v42 }
 0x82a   :  { %v2849_v19 = vpop.f32.mrb[14].mxu1 }
 0x82b   :  { %v2850_v61 = vpop.f32.mrb[15].mxu1 }
 0x82c   :  { %v2851_v50 = vadd.f32 %v2850_v61, %v2849_v19 }
 0x83e   :  { %v2884_v63 = vpop.f32.mrb[16].mxu1 }
 0x83f   :  { %v2885_v51 = vpop.f32.mrb[17].mxu1 }
 0x840   :  { %v2886_v1 = vadd.f32 %v2885_v51, %v2884_v63 }
 0x842   :  { %v2212_v21 = vadd.f32 %v2886_v1, %v2842_v60  ;;  %v2887_v2 = vpop.f32.mrb[18].mxu1 }
 0x843   :  { %v2888_v52 = vpop.f32.mrb[19].mxu1 }
 0x844   :  { %v2889_v4 = vadd.f32 %v2888_v52, %v2887_v2 }
 0x846   :  { %v2217_v53 = vadd.f32 %v2889_v4, %v2845_v44  ;;  %v2890_v5 = vpop.f32.mrb[20].mxu1 }
 0x847   :  { %v2891_v18 = vpop.f32.mrb[21].mxu1 }
 0x848   :  { %v2892_v24 = vadd.f32 %v2891_v18, %v2890_v5 }
 0x84a   :  { %v2222_v7 = vadd.f32 %v2892_v24, %v2848_v20  ;;  %v2893_v31 = vpop.f32.mrb[22].mxu1 }
 0x84b   :  { %v2894_v10 = vpop.f32.mrb[23].mxu1 }
 0x84c   :  { %v2895_v11 = vadd.f32 %v2894_v10, %v2893_v31 }
 0x84e   :  { %v2227_v12 = vadd.f32 %v2895_v11, %v2851_v50 }
 0x85e   :  { %v2928_v14 = vpop.f32.mrb[24].mxu1 }
 0x85f   :  { %v2929_v49 = vpop.f32.mrb[25].mxu1 }
 0x860   :  { %v2930_v35 = vadd.f32 %v2929_v49, %v2928_v14 }
 0x862   :  { %v4312_v62 = vadd.f32 %v2930_v35, %v2212_v21  ;;  %v2931_v0 = vpop.f32.mrb[26].mxu1 }
 0x863   :  { %v2932_v6 = vpop.f32.mrb[27].mxu1 }
 0x864   :  { %v2933_v16 = vadd.f32 %v2932_v6, %v2931_v0 }
 0x866   :  { %v4314_v28 = vadd.f32 %v2933_v16, %v2217_v53  ;;  %v2934_v29 = vpop.f32.mrb[28].mxu1 }
 0x867   :  { %v2935_v33 = vpop.f32.mrb[29].mxu1 }
 0x868   :  { %v2936_v36 = vadd.f32 %v2935_v33, %v2934_v29  ;;  %v2396_v26 = vadd.f32 %v4314_v28, %v4312_v62 }
 0x86a   :  { %v4316_v41 = vadd.f32 %v2936_v36, %v2222_v7  ;;  %v2937_v48 = vpop.f32.mrb[30].mxu1 }
 0x86b   :  { %v2938_v56 = vpop.f32.mrb[31].mxu1 }
 0x86c   :  { %v2939_v57 = vadd.f32 %v2938_v56, %v2937_v48  ;;  %v2397_v25 = vadd.f32 %v2396_v26, %v4316_v41 }
 0x86e   :  { %v4321_v58 = vadd.f32 %v2939_v57, %v2227_v12 }
 0x870   :  { %v2398_v34 = vadd.f32 %v2397_v25, %v4321_v58 }
 0x872   :  { %v2399_v8 = vrot.slane %v2398_v34, 4 }
 0x874   :  { %v2400_v38 = vadd.f32 %v2399_v8, %v2398_v34 }
 0x876   :  { %v2401_v23 = vrot.slane %v2400_v38, 2 }
 0x878   :  { %v2402_v13 = vadd.f32 %v2401_v23, %v2400_v38 }
 0x87a   :  { %v2403_v15 = vrot.slane %v2402_v13, 1 }
 0x87c   :  { %v2404_v39 = vadd.f32 %v2403_v15, %v2402_v13 }
 0x87e   :  { %2410 = vrot.lane.b32.xlu1 %v2404_v39, %s3370_s30  ;;  %2406 = vrot.lane.b32.xlu0 %v2404_v39, %s3368_s27 }
 0x882   :  { %2418 = vrot.lane.b32.xlu1 %v2404_v39, %s3369_s29  ;;  %2414 = vrot.lane.b32.xlu0 %v2404_v39, %s3367_s2 }
 0x886   :  { %2426 = vrot.lane.b32.xlu1 %v2404_v39, %s3371_s12  ;;  %2422 = vrot.lane.b32.xlu0 %v2404_v39, %s3372_s13 }
 0x88a   :  { %2434 = vrot.lane.b32.xlu1 %v2404_v39, %s3373_s14  ;;  %2430 = vrot.lane.b32.xlu0 %v2404_v39, %s3374_s15 }
 0x88e   :  { %2442 = vrot.lane.b32.xlu1 %v2404_v39, %s3375_s16  ;;  %2438 = vrot.lane.b32.xlu0 %v2404_v39, %s3376_s17 }
 0x892   :  { %2450 = vrot.lane.b32.xlu1 %v2404_v39, %s3377_s19  ;;  %2446 = vrot.lane.b32.xlu0 %v2404_v39, %s3378_s20 }
 0x896   :  { %2458 = vrot.lane.b32.xlu1 %v2404_v39, %s3366_s28  ;;  %2454 = vrot.lane.b32.xlu0 %v2404_v39, %s3379_s5 }
 0x89a   :  { %2462 = vrot.lane.b32.xlu0 %v2404_v39, %s3380_s18 }
 0x8f0   :  { %v2411_v37 = vpop.permute.xlu1 %2410  ;;  %v2407_v46 = vpop.permute.xlu0 %2406 }
 0x8f1   :  { %v2409_v22 = vadd.f32 %v2407_v46, %v2404_v39 }
 0x8f3   :  { %v2413_v17 = vadd.f32 %v2411_v37, %v2409_v22 }
 0x8f4   :  { %v2419_v47 = vpop.permute.xlu1 %2418  ;;  %v2415_v27 = vpop.permute.xlu0 %2414 }
 0x8f5   :  { %v2417_v32 = vadd.f32 %v2415_v27, %v2413_v17 }
 0x8f7   :  { %v2421_v40 = vadd.f32 %v2419_v47, %v2417_v32 }
 0x8f8   :  { %v2427_v3 = vpop.permute.xlu1 %2426  ;;  %v2423_v55 = vpop.permute.xlu0 %2422 }
 0x8f9   :  { %v2425_v59 = vadd.f32 %v2423_v55, %v2421_v40 }
 0x8fb   :  { %v2429_v30 = vadd.f32 %v2427_v3, %v2425_v59 }
 0x8fc   :  { %v2435_v60 = vpop.permute.xlu1 %2434  ;;  %v2431_v43 = vpop.permute.xlu0 %2430 }
 0x8fd   :  { %v2433_v9 = vadd.f32 %v2431_v43, %v2429_v30 }
 0x8ff   :  { %v2437_v44 = vadd.f32 %v2435_v60, %v2433_v9 }
 0x900   :  { %v2443_v42 = vpop.permute.xlu1 %2442  ;;  %v2439_v54 = vpop.permute.xlu0 %2438 }
 0x901   :  { %v2441_v20 = vadd.f32 %v2439_v54, %v2437_v44 }
 0x903   :  { %v2445_v19 = vadd.f32 %v2443_v42, %v2441_v20 }
 0x904   :  { %v2451_v61 = vpop.permute.xlu1 %2450  ;;  %v2447_v50 = vpop.permute.xlu0 %2446 }
 0x905   :  { %v2449_v63 = vadd.f32 %v2447_v50, %v2445_v19 }
 0x907   :  { %v2453_v51 = vadd.f32 %v2451_v61, %v2449_v63 }
 0x908   :  { %v2455_v1 = vpop.permute.xlu0 %2454  ;;  %v2459_v2 = vpop.permute.xlu1 %2458 }
 0x909   :  { %v2457_v21 = vadd.f32 %v2455_v1, %v2453_v51 }
 0x90b   :  { %v2461_v52 = vadd.f32 %v2459_v2, %v2457_v21 }
 0x90c   :  { %v2463_v4 = vpop.permute.xlu0 %2462 }
 0x90d   :  { %v2465_v53 = vadd.f32 %v2463_v4, %v2461_v52 }
 0x90f   :  { %v2466_v5 = vmul.f32 0.001953125, %v2465_v53 }
 0x911   :  { %2471 = vrot.lane.b32.xlu0 %v2466_v5, %s3366_s28  ;;  %2468 = vrot.lane.b32.xlu1 %v2466_v5, %s3380_s18 }
 0x915   :  { %2477 = vrot.lane.b32.xlu0 %v2466_v5, %s3377_s19  ;;  %2474 = vrot.lane.b32.xlu1 %v2466_v5, %s3379_s5 }
 0x919   :  { %2483 = vrot.lane.b32.xlu0 %v2466_v5, %s3375_s16  ;;  %2480 = vrot.lane.b32.xlu1 %v2466_v5, %s3378_s20 }
 0x91d   :  { %2489 = vrot.lane.b32.xlu0 %v2466_v5, %s3373_s14  ;;  %2486 = vrot.lane.b32.xlu1 %v2466_v5, %s3376_s17 }
 0x921   :  { %2495 = vrot.lane.b32.xlu0 %v2466_v5, %s3371_s12  ;;  %2492 = vrot.lane.b32.xlu1 %v2466_v5, %s3374_s15 }
 0x925   :  { %2501 = vrot.lane.b32.xlu0 %v2466_v5, %s3369_s29  ;;  %2498 = vrot.lane.b32.xlu1 %v2466_v5, %s3372_s13 }
 0x929   :  { %2507 = vrot.lane.b32.xlu0 %v2466_v5, %s3370_s30  ;;  %2504 = vrot.lane.b32.xlu1 %v2466_v5, %s3367_s2 }
 0x92d   :  { %2510 = vrot.lane.b32.xlu1 %v2466_v5, %s3368_s27 }
 0x983   :  { %v2472_v18 = vpop.permute.xlu0 %2471  ;;  %v2469_v24 = vpop.permute.xlu1 %2468 }
 0x984   :  { %v2513_v7 = vsel %vm351_vm1, %v2466_v5, %v2469_v24 }
 0x985   :  { %v2514_v10 = vsel %vm353_vm2, %v2513_v7, %v2472_v18 }
 0x987   :  { %v2478_v31 = vpop.permute.xlu0 %2477  ;;  %v2475_v11 = vpop.permute.xlu1 %2474 }
 0x988   :  { %v2515_v12 = vsel %vm355_vm3, %v2514_v10, %v2475_v11 }
 0x989   :  { %v2516_v49 = vsel %vm357_vm4, %v2515_v12, %v2478_v31 }
 0x98b   :  { %v2484_v14 = vpop.permute.xlu0 %2483  ;;  %v2481_v35 = vpop.permute.xlu1 %2480 }
 0x98c   :  { %v2517_v0 = vsel %vm359_vm5, %v2516_v49, %v2481_v35 }
 0x98d   :  { %v2518_v16 = vsel %vm361_vm6, %v2517_v0, %v2484_v14 }
 0x98f   :  { %v2490_v6 = vpop.permute.xlu0 %2489  ;;  %v2487_v29 = vpop.permute.xlu1 %2486 }
 0x990   :  { %v2519_v33 = vsel %vm363_vm7, %v2518_v16, %v2487_v29 }
 0x991   :  { %v2520_v48 = vsel %vm62_vm0, %v2519_v33, %v2490_v6 }
 0x993   :  { %v2496_v36 = vpop.permute.xlu0 %2495  ;;  %v2493_v56 = vpop.permute.xlu1 %2492 }
 0x994   :  { %v2521_v26 = vsel %vm4475_vm14, %v2520_v48, %v2493_v56 }
 0x995   :  { %v2522_v25 = vsel %vm368_vm9, %v2521_v26, %v2496_v36 }
 0x997   :  { %v2502_v57 = vpop.permute.xlu0 %2501  ;;  %v2499_v34 = vpop.permute.xlu1 %2498 }
 0x998   :  { %v2523_v8 = vsel %vm370_vm10, %v2522_v25, %v2499_v34 }
 0x999   :  { %v2524_v38 = vsel %vm372_vm11, %v2523_v8, %v2502_v57 }
 0x99b   :  { %v2505_v23 = vpop.permute.xlu1 %2504  ;;  %v2508_v13 = vpop.permute.xlu0 %2507 }
 0x99c   :  { %v2525_v15 = vsel %vm374_vm12, %v2524_v38, %v2505_v23 }
 0x99d   :  { %v2526_v39 = vsel %vm376_vm13, %v2525_v15, %v2508_v13 }
 0x99f   :  { %v2511_v37 = vpop.permute.xlu1 %2510 }
 0x9a0   :  { %v2527_v46 = vsel %vm4476_vm15, %v2526_v39, %v2511_v37 }
 0x9a1   :  { %v2531_v22 = vrot.slane %v2527_v46, %v3574_v45 }
 0x9a3   :  { %v4371_v17 = vsub.f32 %v4312_v62, %v2531_v22  ;;  %v4374_v47 = vsub.f32 %v4314_v28, %v2531_v22  ;;  %v4377_v27 = vsub.f32 %v4316_v41, %v2531_v22  ;;  %v4380_v32 = vsub.f32 %v4321_v58, %v2531_v22 }
 0x9a5   :  { %v2536_v40 = vmul.f32 %v4371_v17, %v4371_v17  ;;  %v2537_v3 = vmul.f32 %v4374_v47, %v4374_v47  ;;  %v2538_v55 = vmul.f32 %v4377_v27, %v4377_v27  ;;  %v2539_v28 = vmul.f32 %v4380_v32, %v4380_v32 }
 0x9a7   :  { %v2540_v62 = vadd.f32 %v2537_v3, %v2536_v40 }
 0x9a9   :  { %v2541_v59 = vadd.f32 %v2540_v62, %v2538_v55 }
 0x9ab   :  { %v2542_v30 = vadd.f32 %v2541_v59, %v2539_v28 }
 0x9ad   :  { %v2543_v41 = vrot.slane %v2542_v30, 4 }
 0x9af   :  { %v2544_v60 = vadd.f32 %v2543_v41, %v2542_v30 }
 0x9b1   :  { %v2545_v43 = vrot.slane %v2544_v60, 2 }
 0x9b3   :  { %v2546_v58 = vadd.f32 %v2545_v43, %v2544_v60 }
 0x9b5   :  { %v2547_v9 = vrot.slane %v2546_v58, 1 }
 0x9b7   :  { %v2548_v44 = vadd.f32 %v2547_v9, %v2546_v58 }
 0x9b9   :  { %2554 = vrot.lane.b32.xlu1 %v2548_v44, %s3370_s30  ;;  %2550 = vrot.lane.b32.xlu0 %v2548_v44, %s3368_s27 }
 0x9bd   :  { %2562 = vrot.lane.b32.xlu1 %v2548_v44, %s3369_s29  ;;  %2558 = vrot.lane.b32.xlu0 %v2548_v44, %s3367_s2 }
 0x9c1   :  { %2570 = vrot.lane.b32.xlu1 %v2548_v44, %s3371_s12  ;;  %2566 = vrot.lane.b32.xlu0 %v2548_v44, %s3372_s13 }
 0x9c5   :  { %2578 = vrot.lane.b32.xlu1 %v2548_v44, %s3373_s14  ;;  %2574 = vrot.lane.b32.xlu0 %v2548_v44, %s3374_s15 }
 0x9c9   :  { %2586 = vrot.lane.b32.xlu1 %v2548_v44, %s3375_s16  ;;  %2582 = vrot.lane.b32.xlu0 %v2548_v44, %s3376_s17 }
 0x9cd   :  { %2594 = vrot.lane.b32.xlu1 %v2548_v44, %s3377_s19  ;;  %2590 = vrot.lane.b32.xlu0 %v2548_v44, %s3378_s20 }
 0x9d1   :  { %2602 = vrot.lane.b32.xlu1 %v2548_v44, %s3366_s28  ;;  %2598 = vrot.lane.b32.xlu0 %v2548_v44, %s3379_s5 }
 0x9d5   :  { %2606 = vrot.lane.b32.xlu0 %v2548_v44, %s3380_s18 }
 0xa2b   :  { %v2555_v42 = vpop.permute.xlu1 %2554  ;;  %v2551_v54 = vpop.permute.xlu0 %2550 }
 0xa2c   :  { %v2553_v20 = vadd.f32 %v2551_v54, %v2548_v44  ;;  %v2611_v54 = vld [vmem:[%s4467_s9] sm:$0x1] }
 0xa2e   :  { %v2557_v19 = vadd.f32 %v2555_v42, %v2553_v20 }
 0xa2f   :  { %v2563_v61 = vpop.permute.xlu1 %2562  ;;  %v2559_v50 = vpop.permute.xlu0 %2558 }
 0xa30   :  { %v2561_v63 = vadd.f32 %v2559_v50, %v2557_v19 }
 0xa32   :  { %v2565_v51 = vadd.f32 %v2563_v61, %v2561_v63 }
 0xa33   :  { %v2571_v1 = vpop.permute.xlu1 %2570  ;;  %v2567_v21 = vpop.permute.xlu0 %2566 }
 0xa34   :  { %v2569_v2 = vadd.f32 %v2567_v21, %v2565_v51  ;;  %v2787_v51 = vld [vmem:[%s4468_s10] ss:$0 sm:$0xff] }
 0xa36   :  { %v2573_v52 = vadd.f32 %v2571_v1, %v2569_v2 }
 0xa37   :  { %v2579_v4 = vpop.permute.xlu1 %2578  ;;  %v2575_v53 = vpop.permute.xlu0 %2574 }
 0xa38   :  { %v2577_v5 = vadd.f32 %v2575_v53, %v2573_v52 }
 0xa3a   :  { %v2581_v18 = vadd.f32 %v2579_v4, %v2577_v5 }
 0xa3b   :  { %v2587_v24 = vpop.permute.xlu1 %2586  ;;  %v2583_v7 = vpop.permute.xlu0 %2582 }
 0xa3c   :  { %v2585_v31 = vadd.f32 %v2583_v7, %v2581_v18 }
 0xa3e   :  { %v2589_v10 = vadd.f32 %v2587_v24, %v2585_v31 }
 0xa3f   :  { %v2595_v11 = vpop.permute.xlu1 %2594  ;;  %v2591_v12 = vpop.permute.xlu0 %2590 }
 0xa40   :  { %v2593_v14 = vadd.f32 %v2591_v12, %v2589_v10 }
 0xa42   :  { %v2597_v49 = vadd.f32 %v2595_v11, %v2593_v14 }
 0xa43   :  { %v2599_v35 = vpop.permute.xlu0 %2598  ;;  %v2603_v6 = vpop.permute.xlu1 %2602 }
 0xa44   :  { %v2601_v0 = vadd.f32 %v2599_v35, %v2597_v49 }
 0xa46   :  { %v2605_v16 = vadd.f32 %v2603_v6, %v2601_v0 }
 0xa47   :  { %v2607_v29 = vpop.permute.xlu0 %2606 }
 0xa48   :  { %v2609_v33 = vadd.f32 %v2607_v29, %v2605_v16 }
 0xa4a   :  { %v2610_v36 = vmul.f32 0.001953125, %v2609_v33 }
 0xa4c   :  { %v2612_v48 = vadd.f32 1e-05, %v2610_v36 }
 0xa4e   :  { %3338 = vrsqrt.f32 %v2612_v48 }
 0xa58   :  { %v3339_v56 = vpop.eup %3338 }
 0xa59   :  { %2618 = vrot.lane.b32.xlu0 %v3339_v56, %s3366_s28  ;;  %2615 = vrot.lane.b32.xlu1 %v3339_v56, %s3380_s18 }
 0xa5d   :  { %2624 = vrot.lane.b32.xlu0 %v3339_v56, %s3377_s19  ;;  %2621 = vrot.lane.b32.xlu1 %v3339_v56, %s3379_s5 }
 0xa61   :  { %2630 = vrot.lane.b32.xlu0 %v3339_v56, %s3375_s16  ;;  %2627 = vrot.lane.b32.xlu1 %v3339_v56, %s3378_s20 }
 0xa65   :  { %2636 = vrot.lane.b32.xlu0 %v3339_v56, %s3373_s14  ;;  %2633 = vrot.lane.b32.xlu1 %v3339_v56, %s3376_s17 }
 0xa69   :  { %2642 = vrot.lane.b32.xlu0 %v3339_v56, %s3371_s12  ;;  %2639 = vrot.lane.b32.xlu1 %v3339_v56, %s3374_s15 }
 0xa6d   :  { %2648 = vrot.lane.b32.xlu0 %v3339_v56, %s3369_s29  ;;  %2645 = vrot.lane.b32.xlu1 %v3339_v56, %s3372_s13 }
 0xa71   :  { %2654 = vrot.lane.b32.xlu0 %v3339_v56, %s3370_s30  ;;  %2651 = vrot.lane.b32.xlu1 %v3339_v56, %s3367_s2 }
 0xa75   :  { %2657 = vrot.lane.b32.xlu1 %v3339_v56, %s3368_s27 }
 0xacb   :  { %v2619_v26 = vpop.permute.xlu0 %2618  ;;  %v2616_v57 = vpop.permute.xlu1 %2615 }
 0xacc   :  { %v2660_v25 = vsel %vm351_vm1, %v3339_v56, %v2616_v57  ;;  %vm4477_vm1 = vmmov %vm4475_vm14 }
 0xacd   :  { %v2661_v8 = vsel %vm353_vm2, %v2660_v25, %v2619_v26 }
 0xacf   :  { %v2625_v34 = vpop.permute.xlu0 %2624  ;;  %v2622_v38 = vpop.permute.xlu1 %2621 }
 0xad0   :  { %v2662_v23 = vsel %vm355_vm3, %v2661_v8, %v2622_v38 }
 0xad1   :  { %v2663_v15 = vsel %vm357_vm4, %v2662_v23, %v2625_v34 }
 0xad3   :  { %v2631_v13 = vpop.permute.xlu0 %2630  ;;  %v2628_v39 = vpop.permute.xlu1 %2627 }
 0xad4   :  { %v2664_v37 = vsel %vm359_vm5, %v2663_v15, %v2628_v39 }
 0xad5   :  { %v2665_v22 = vsel %vm361_vm6, %v2664_v37, %v2631_v13 }
 0xad7   :  { %v2637_v46 = vpop.permute.xlu0 %2636  ;;  %v2634_v40 = vpop.permute.xlu1 %2633 }
 0xad8   :  { %v2666_v3 = vsel %vm363_vm7, %v2665_v22, %v2634_v40 }
 0xad9   :  { %v2667_v62 = vsel %vm62_vm0, %v2666_v3, %v2637_v46  ;;  %vm4478_vm0 = vmmov %vm4476_vm15 }
 0xadb   :  { %v2643_v55 = vpop.permute.xlu0 %2642  ;;  %v2640_v28 = vpop.permute.xlu1 %2639 }
 0xadc   :  { %v2668_v59 = vsel %vm4477_vm1, %v2667_v62, %v2640_v28 }
 0xadd   :  { %v2669_v41 = vsel %vm368_vm9, %v2668_v59, %v2643_v55 }
 0xadf   :  { %v2649_v30 = vpop.permute.xlu0 %2648  ;;  %v2646_v60 = vpop.permute.xlu1 %2645 }
 0xae0   :  { %v2670_v43 = vsel %vm370_vm10, %v2669_v41, %v2646_v60 }
 0xae1   :  { %v2671_v58 = vsel %vm372_vm11, %v2670_v43, %v2649_v30 }
 0xae3   :  { %v2652_v9 = vpop.permute.xlu1 %2651  ;;  %v2655_v44 = vpop.permute.xlu0 %2654 }
 0xae4   :  { %v2672_v42 = vsel %vm374_vm12, %v2671_v58, %v2652_v9 }
 0xae5   :  { %v2673_v20 = vsel %vm376_vm13, %v2672_v42, %v2655_v44 }
 0xae7   :  { %v2658_v19 = vpop.permute.xlu1 %2657 }
 0xae8   :  { %v2674_v61 = vsel %vm4478_vm0, %v2673_v20, %v2658_v19 }
 0xae9   :  { %v2675_v50 = vmul.f32 %v2674_v61, %v2611_v54 }
 0xaeb   :  { %v2680_v63 = vrot.slane %v2675_v50, %v3574_v45 }
 0xaed   :  { %v2682_v1 = vmul.f32 %v2680_v63, %v4371_v17  ;;  %v2683_v21 = vmul.f32 %v2680_v63, %v4374_v47  ;;  %v2684_v2 = vmul.f32 %v2680_v63, %v4377_v27  ;;  %v2685_v52 = vmul.f32 %v2680_v63, %v4380_v32 }
 0xaef   :  { %v2693_v4 = vadd.f32 %v2787_v51, %v2682_v1  ;;  %v2694_v53 = vadd.f32 %v2787_v51, %v2683_v21  ;;  %v2695_v5 = vadd.f32 %v2787_v51, %v2684_v2  ;;  %v2696_v18 = vadd.f32 %v2787_v51, %v2685_v52 }
 0xaf1   :  { %v2697_v24 = vmax.f32 %v2693_v4, 0.0  ;;  %v2698_v7 = vmax.f32 %v2694_v53, 0.0  ;;  %v2699_v31 = vmax.f32 %v2695_v5, 0.0  ;;  %v2700_v45 = vmax.f32 %v2696_v18, 0.0 }
 0xaf3   :  { %2701 = vst [vmem:[%s4469_s11] sm:$0xff] %v2697_v24  ;;  %2702 = vst [vmem:[%s4469_s11 + $0x8] sm:$0xff] %v2698_v7 }
 0xaf4   :  { %2703 = vst [vmem:[%s4469_s11 + $0x10] sm:$0xff] %v2699_v31  ;;  %2704 = vst [vmem:[%s4469_s11 + $0x18] sm:$0xff] %v2700_v45 }
 0xaf5   :  { %2709 = vsyncpa [#allocation5], 1 }

</bundles_post_ra>
